<compile_context>
chip_gen: v5e
topology: v5e:2x2
jax: 0.10.0
libtpu: 0.0.40
codegen_flags: <defaults>
</compile_context>

<pallas_src>
import functools

import jax
import jax.numpy as jnp
from jax.experimental import pallas as pl
from jax.experimental.pallas import tpu as pltpu

VP = 128      # lane-padded vocab width for the fused TCR decoder
NEG = -1e30   # pad-lane bias: exp() -> 0, never argmax / picked


# ------------------------------ fused kernel --------------------------------

def _fused_kernel(rna_ref, tok_ref,
                  rew1_ref, reb1_ref, rew2_ref, reb2_ref,
                  wemb_ref, wenc_ref, benc_ref,
                  bw_ref, bb_ref, cb_ref,
                  rdw1_ref, rdb1_ref, rdw2_ref, rdb2_ref,
                  tdw_ref, tdb_ref,
                  main_ref, loss_ref,
                  *, L, V, l_dim, ignore_index):
    f32 = jnp.float32
    rna = rna_ref[...]                                       # [Bt, X]
    Bt = rna.shape[0]

    # ---- RNA encoder (Linear+ReLU, Linear) -> c_rna ----
    h1 = jnp.dot(rna, rew1_ref[...], preferred_element_type=f32) + reb1_ref[...]
    h1 = jnp.maximum(h1, 0.0)
    c_rna = jnp.dot(h1, rew2_ref[...], preferred_element_type=f32) + reb2_ref[...]

    # ---- TCR encoders (alpha & beta fused): vectorized mean one-hot pooling ----
    tok = tok_ref[...]                                       # [Bt, 2L] int32
    pos = jax.lax.broadcasted_iota(jnp.int32, (Bt, 2 * L), 1)
    tok_off = tok + jnp.where(pos >= L, V, 0)                # beta ids shifted by V
    cls = jax.lax.broadcasted_iota(jnp.int32, (Bt, 2 * L, 2 * V), 2)
    onehot = (cls == tok_off[:, :, None]).astype(f32)        # [Bt, 2L, 2V]
    pooled = jnp.sum(onehot, axis=1) * (1.0 / L)             # [Bt, 2V]

    emb = jnp.dot(pooled, wemb_ref[...], preferred_element_type=f32)          # [Bt, 2E]
    hab = jnp.dot(emb, wenc_ref[...], preferred_element_type=f32) + benc_ref[...]
    h_alpha = hab[:, :l_dim]
    h_beta = hab[:, l_dim:]

    # ---- L2 normalize -> bilinear gate -> sigmoid -> convex mix ----
    eps = 1e-12
    h_alpha = h_alpha * jax.lax.rsqrt(
        jnp.sum(h_alpha * h_alpha, axis=1, keepdims=True) + eps)
    h_beta = h_beta * jax.lax.rsqrt(
        jnp.sum(h_beta * h_beta, axis=1, keepdims=True) + eps)
    t_bl = jnp.dot(h_alpha, bw_ref[...], preferred_element_type=f32)          # [Bt, l]
    score = jnp.sum(t_bl * h_beta, axis=1, keepdims=True) + bb_ref[0, 0]      # SMEM scalar
    att = jax.nn.sigmoid(score)
    h_tcr = att * h_alpha + (1.0 - att) * h_beta
    c_tcr = h_tcr + c_rna

    # ---- VQ nearest code (argmin invariant to the per-row |c|^2 term) ----
    e = cb_ref[...]                                          # [K, l]
    e2 = jnp.sum(e * e, axis=1)[None, :]                     # [1, K]
    d = e2 - 2.0 * jnp.dot(c_tcr, e.T, preferred_element_type=f32)            # [Bt, K]
    K = d.shape[1]
    ik = jax.lax.broadcasted_iota(jnp.int32, d.shape, 1)
    d_min = jnp.min(d, axis=1, keepdims=True)
    first = jnp.min(jnp.where(d <= d_min, ik, K), axis=1, keepdims=True)
    z = jnp.dot((ik == first).astype(f32), e, preferred_element_type=f32)
    diffq = z - c_tcr
    sum_sq_vq = jnp.sum(diffq * diffq)
    h = z + c_rna

    # ---- decoders ----
    d1 = jnp.dot(h, rdw1_ref[...], preferred_element_type=f32) + rdb1_ref[...]
    d1 = jnp.maximum(d1, 0.0)
    rec_rna = jnp.dot(d1, rdw2_ref[...], preferred_element_type=f32) + rdb2_ref[...]
    # fused, lane-padded alpha+beta decoder: [Bt, P*128]
    rec_tcr = jnp.dot(h, tdw_ref[...], preferred_element_type=f32) + tdb_ref[...]

    # ---- losses (partial sums only; final means done in the wrapper) ----
    dr = rec_rna - rna
    sum_sq_rna = jnp.sum(dr * dr)

    P = 2 * (L - 1)
    logits = rec_tcr.reshape(Bt, P, VP)                      # lane-aligned [Bt, P, 128]
    # targets: drop token columns 0 (alpha start) and L (beta start)
    tgt = jnp.concatenate([tok[:, 1:L], tok[:, L + 1:2 * L]], axis=1)         # [Bt, P]
    m = jnp.max(logits, axis=2, keepdims=True)
    lse = jnp.log(jnp.sum(jnp.exp(logits - m), axis=2, keepdims=True)) + m
    iv = jax.lax.broadcasted_iota(jnp.int32, (Bt, P, VP), 2)
    picked = jnp.sum(jnp.where(iv == tgt[:, :, None], logits, 0.0),
                     axis=2, keepdims=True)
    nll = (lse - picked)[:, :, 0]                            # [Bt, P]
    valid = (tgt != ignore_index).astype(f32)
    sum_nll = jnp.sum(nll * valid)
    cnt = jnp.sum(valid)

    # ---- single lane-dense output stores ----
    att_wide = jnp.broadcast_to(att, (Bt, 128))
    main_ref[...] = jnp.concatenate([h_tcr, c_rna, z, h, att_wide], axis=1)

    lane = jax.lax.broadcasted_iota(jnp.int32, (1, 8, 128), 2)
    loss_ref[...] = jnp.where(lane == 0, sum_sq_rna,
                    jnp.where(lane == 1, sum_nll,
                    jnp.where(lane == 2, cnt,
                    jnp.where(lane == 3, sum_sq_vq, 0.0))))


# --------------------------- parameters (synthetic) --------------------------

def init_params(key, *, l_dim, x_dim, hidden, emb_dim, seq_len, vocab, n_codebook):
    keys = jax.random.split(key, 16)

    def dense(k, i, o):
        return jax.random.normal(k, (i, o), jnp.float32) / jnp.sqrt(jnp.float32(i))

    p = {}
    p['rna_enc_w1'] = dense(keys[0], x_dim, hidden);  p['rna_enc_b1'] = jnp.zeros((hidden,), jnp.float32)
    p['rna_enc_w2'] = dense(keys[1], hidden, l_dim);  p['rna_enc_b2'] = jnp.zeros((l_dim,), jnp.float32)
    p['rna_dec_w1'] = dense(keys[2], l_dim, hidden);  p['rna_dec_b1'] = jnp.zeros((hidden,), jnp.float32)
    p['rna_dec_w2'] = dense(keys[3], hidden, x_dim);  p['rna_dec_b2'] = jnp.zeros((x_dim,), jnp.float32)
    p['alpha_emb'] = dense(keys[4], vocab, emb_dim)
    p['beta_emb'] = dense(keys[5], vocab, emb_dim)
    p['alpha_enc_w'] = dense(keys[6], emb_dim, l_dim); p['alpha_enc_b'] = jnp.zeros((l_dim,), jnp.float32)
    p['beta_enc_w'] = dense(keys[7], emb_dim, l_dim);  p['beta_enc_b'] = jnp.zeros((l_dim,), jnp.float32)
    dec_out = (seq_len - 1) * vocab
    p['alpha_dec_w'] = dense(keys[8], l_dim, dec_out); p['alpha_dec_b'] = jnp.zeros((dec_out,), jnp.float32)
    p['beta_dec_w'] = dense(keys[9], l_dim, dec_out);  p['beta_dec_b'] = jnp.zeros((dec_out,), jnp.float32)
    p['bilin_w'] = dense(keys[10], l_dim, l_dim);      p['bilin_b'] = jnp.zeros((1,), jnp.float32)
    p['codebook'] = jax.random.normal(keys[11], (n_codebook, l_dim), jnp.float32)
    return p


def merge_params(p, *, vocab, seq_len):
    """Build fused / lane-padded weights ONCE (hoisted out of the forward)."""
    V, L = vocab, seq_len
    emb_dim = p['alpha_emb'].shape[1]
    l_dim = p['alpha_enc_w'].shape[1]
    P = 2 * (L - 1)
    f32 = jnp.float32

    # block-diagonal embedding / encoder weights -> one matmul for both chains
    w_emb = jnp.zeros((2 * V, 2 * emb_dim), f32)
    w_emb = w_emb.at[:V, :emb_dim].set(p['alpha_emb']).at[V:, emb_dim:].set(p['beta_emb'])
    w_enc = jnp.zeros((2 * emb_dim, 2 * l_dim), f32)
    w_enc = w_enc.at[:emb_dim, :l_dim].set(p['alpha_enc_w']).at[emb_dim:, l_dim:].set(p['beta_enc_w'])
    b_enc = jnp.concatenate([p['alpha_enc_b'], p['beta_enc_b']]).reshape(1, 2 * l_dim)

    # lane-padded (V -> 128) fused alpha+beta decoder; pad biases are a large
    # negative so exp() -> 0 and padded lanes are never picked / argmax.
    wa = p['alpha_dec_w'].reshape(l_dim, L - 1, V)
    wb = p['beta_dec_w'].reshape(l_dim, L - 1, V)
    ba = p['alpha_dec_b'].reshape(L - 1, V)
    bb = p['beta_dec_b'].reshape(L - 1, V)
    w_td = jnp.zeros((l_dim, P, VP), f32)
    w_td = w_td.at[:, :L - 1, :V].set(wa).at[:, L - 1:, :V].set(wb)
    b_td = jnp.full((P, VP), NEG, f32)
    b_td = b_td.at[:L - 1, :V].set(ba).at[L - 1:, :V].set(bb)

    mp = dict(p)
    mp['w_emb'] = w_emb
    mp['w_enc'] = w_enc
    mp['b_enc'] = b_enc
    mp['w_tdec_pad'] = w_td.reshape(l_dim, P * VP)
    mp['b_tdec_pad'] = b_td.reshape(1, P * VP)
    return mp


# --------------------------------- forward -----------------------------------

def vq_tcr_forward(mp, rna, tcr, *, vocab, commitment, ignore_index, b_tile=None):
    B, X = rna.shape
    L = tcr.shape[1] // 2
    V = vocab
    l_dim = mp['rna_enc_w2'].shape[1]

    b_tile = B if b_tile is None else b_tile
    assert B % b_tile == 0 and b_tile % 8 == 0, "batch tile must be multiple of 8 and divide B"
    nb = B // b_tile
    main_w = 4 * l_dim + 128   # h_tcr | c_rna | z | h | att(broadcast to 128 lanes)

    kernel = functools.partial(_fused_kernel, L=L, V=V, l_dim=l_dim,
                               ignore_index=ignore_index)

    args = (rna, tcr.astype(jnp.int32),
            mp['rna_enc_w1'], mp['rna_enc_b1'].reshape(1, -1),
            mp['rna_enc_w2'], mp['rna_enc_b2'].reshape(1, -1),
            mp['w_emb'], mp['w_enc'], mp['b_enc'],
            mp['bilin_w'], mp['bilin_b'].reshape(1, 1),
            mp['codebook'],
            mp['rna_dec_w1'], mp['rna_dec_b1'].reshape(1, -1),
            mp['rna_dec_w2'], mp['rna_dec_b2'].reshape(1, -1),
            mp['w_tdec_pad'], mp['b_tdec_pad'])

    def full2d(a):   # weight: full block, constant index_map -> VMEM-resident across grid
        return pl.BlockSpec(a.shape, lambda i: (0, 0))

    in_specs = [
        pl.BlockSpec((b_tile, X), lambda i: (i, 0)),           # rna (batch-tiled)
        pl.BlockSpec((b_tile, 2 * L), lambda i: (i, 0)),       # tcr tokens (batch-tiled)
        full2d(args[2]), full2d(args[3]),                      # rna enc
        full2d(args[4]), full2d(args[5]),
        full2d(args[6]), full2d(args[7]), full2d(args[8]),     # fused tcr emb/enc
        full2d(args[9]),                                       # bilinear weight
        pl.BlockSpec(memory_space=pltpu.MemorySpace.SMEM),     # bilinear bias (scalar path)
        full2d(args[11]),                                      # codebook
        full2d(args[12]), full2d(args[13]),                    # rna dec
        full2d(args[14]), full2d(args[15]),
        full2d(args[16]), full2d(args[17]),                    # fused padded tcr dec
    ]

    main, loss_parts = pl.pallas_call(
        kernel,
        grid=(nb,),
        out_shape=(jax.ShapeDtypeStruct((B, main_w), jnp.float32),
                   jax.ShapeDtypeStruct((nb, 8, 128), jnp.float32)),
        in_specs=in_specs,
        out_specs=(pl.BlockSpec((b_tile, main_w), lambda i: (i, 0)),
                   pl.BlockSpec((1, 8, 128), lambda i: (i, 0, 0))),
        compiler_params=pltpu.CompilerParams(
            dimension_semantics=("parallel",),          # independent batch tiles (v7x 2 TCs)
            vmem_limit_bytes=8 * 1024 * 1024),          # small budget for these tiles
    )(*args)

    h_tcr = main[:, 0:l_dim]
    c_rna = main[:, l_dim:2 * l_dim]
    z = main[:, 2 * l_dim:3 * l_dim]
    h = main[:, 3 * l_dim:4 * l_dim]
    att = main[:, 4 * l_dim:4 * l_dim + 1]

    s = loss_parts[:, 0, :]                             # [nb, 128] partial sums
    loss_rna = jnp.sum(s[:, 0]) / (B * X)
    loss_tcr = jnp.sum(s[:, 1]) / jnp.maximum(jnp.sum(s[:, 2]), 1.0)
    loss_vq = commitment * jnp.sum(s[:, 3]) / (B * l_dim)
    return att, h_tcr, c_rna, z, h, loss_rna, loss_tcr, loss_vq


# ----------------------------------- main -------------------------------------

if __name__ == "__main__":
    B = 8            # batch
    L = 8            # per-chain sequence length (tcr has 2*L columns)
    V = 24           # num_seq_labels; aa_to_id['_'] = 0 (ignore_index)
    X_DIM = 64       # hvgs
    L_DIM = 32       # dim_latent
    HIDDEN = 64
    EMB = 32
    N_CODEBOOK = 16
    COMMITMENT = 0.25

    key = jax.random.PRNGKey(0)
    k_rna, k_tcr, k_p = jax.random.split(key, 3)
    rna = jax.random.normal(k_rna, (B, X_DIM), jnp.float32)
    tcr = jax.random.randint(k_tcr, (B, 2 * L), 0, V, dtype=jnp.int32)

    params = init_params(k_p, l_dim=L_DIM, x_dim=X_DIM, hidden=HIDDEN,
                         emb_dim=EMB, seq_len=L, vocab=V, n_codebook=N_CODEBOOK)
    merged = merge_params(params, vocab=V, seq_len=L)   # hoisted; built once

    outs = vq_tcr_forward(merged, rna, tcr, vocab=V,
                          commitment=COMMITMENT, ignore_index=0, b_tile=B)
    outs = jax.block_until_ready(outs)

    tcr_att, h_tcr, c_rna, z, h, loss_rna, loss_tcr, loss_vq = outs
    assert tcr_att.shape == (B, 1) and h_tcr.shape == (B, L_DIM)
    assert c_rna.shape == (B, L_DIM) and z.shape == (B, L_DIM) and h.shape == (B, L_DIM)
    assert loss_rna.shape == () and loss_tcr.shape == () and loss_vq.shape == ()
    assert bool(jnp.isfinite(loss_rna)) and bool(jnp.isfinite(loss_tcr)) and bool(jnp.isfinite(loss_vq))
    print("KERNEL_OK")
</pallas_src>

<mosaic_0001>
module attributes {stable_mosaic.version = 11 : i64} {
  func.func @_fused_kernel(%arg0: i32, %arg1: memref<8x64xf32, #tpu.memory_space<vmem>>, %arg2: memref<8x16xi32, #tpu.memory_space<vmem>>, %arg3: memref<64x64xf32, #tpu.memory_space<vmem>>, %arg4: memref<1x64xf32, #tpu.memory_space<vmem>>, %arg5: memref<64x32xf32, #tpu.memory_space<vmem>>, %arg6: memref<1x32xf32, #tpu.memory_space<vmem>>, %arg7: memref<48x64xf32, #tpu.memory_space<vmem>>, %arg8: memref<64x64xf32, #tpu.memory_space<vmem>>, %arg9: memref<1x64xf32, #tpu.memory_space<vmem>>, %arg10: memref<32x32xf32, #tpu.memory_space<vmem>>, %arg11: memref<1x1xf32, #tpu.memory_space<smem>>, %arg12: memref<16x32xf32, #tpu.memory_space<vmem>>, %arg13: memref<32x64xf32, #tpu.memory_space<vmem>>, %arg14: memref<1x64xf32, #tpu.memory_space<vmem>>, %arg15: memref<64x64xf32, #tpu.memory_space<vmem>>, %arg16: memref<1x64xf32, #tpu.memory_space<vmem>>, %arg17: memref<32x1792xf32, #tpu.memory_space<vmem>>, %arg18: memref<1x1792xf32, #tpu.memory_space<vmem>>, %arg19: memref<8x256xf32, #tpu.memory_space<vmem>>, %arg20: memref<1x8x128xf32, #tpu.memory_space<vmem>>) attributes {dimension_semantics = [#tpu.dimension_semantics<parallel>], iteration_bounds = array<i64: 1>, scalar_prefetch = 0 : i64, scratch_operands = 0 : i64, tpu.core_type = #tpu.core_type<tc>, window_params = [{transform_indices = @transform_0, window_bounds = array<i64: 8, 64>}, {transform_indices = @transform_1, window_bounds = array<i64: 8, 16>}, {pipeline_mode = #tpu.pipeline_mode<synchronous>, transform_indices = @transform_2, window_bounds = array<i64: 64, 64>}, {pipeline_mode = #tpu.pipeline_mode<synchronous>, transform_indices = @transform_3, window_bounds = array<i64: 1, 64>}, {pipeline_mode = #tpu.pipeline_mode<synchronous>, transform_indices = @transform_4, window_bounds = array<i64: 64, 32>}, {pipeline_mode = #tpu.pipeline_mode<synchronous>, transform_indices = @transform_5, window_bounds = array<i64: 1, 32>}, {pipeline_mode = #tpu.pipeline_mode<synchronous>, transform_indices = @transform_6, window_bounds = array<i64: 48, 64>}, {pipeline_mode = #tpu.pipeline_mode<synchronous>, transform_indices = @transform_7, window_bounds = array<i64: 64, 64>}, {pipeline_mode = #tpu.pipeline_mode<synchronous>, transform_indices = @transform_8, window_bounds = array<i64: 1, 64>}, {pipeline_mode = #tpu.pipeline_mode<synchronous>, transform_indices = @transform_9, window_bounds = array<i64: 32, 32>}, {transform_indices = @transform_10, window_bounds = array<i64: 1, 1>}, {pipeline_mode = #tpu.pipeline_mode<synchronous>, transform_indices = @transform_11, window_bounds = array<i64: 16, 32>}, {pipeline_mode = #tpu.pipeline_mode<synchronous>, transform_indices = @transform_12, window_bounds = array<i64: 32, 64>}, {pipeline_mode = #tpu.pipeline_mode<synchronous>, transform_indices = @transform_13, window_bounds = array<i64: 1, 64>}, {pipeline_mode = #tpu.pipeline_mode<synchronous>, transform_indices = @transform_14, window_bounds = array<i64: 64, 64>}, {pipeline_mode = #tpu.pipeline_mode<synchronous>, transform_indices = @transform_15, window_bounds = array<i64: 1, 64>}, {pipeline_mode = #tpu.pipeline_mode<synchronous>, transform_indices = @transform_16, window_bounds = array<i64: 32, 1792>}, {pipeline_mode = #tpu.pipeline_mode<synchronous>, transform_indices = @transform_17, window_bounds = array<i64: 1, 1792>}, {transform_indices = @transform_18, window_bounds = array<i64: 8, 256>}, {transform_indices = @transform_19, window_bounds = array<i64: 1, 8, 128>}]} {
    %c0 = arith.constant 0 : index
    %c0_0 = arith.constant 0 : index
    %0 = vector.load %arg1[%c0, %c0_0] : memref<8x64xf32, #tpu.memory_space<vmem>>, vector<8x64xf32>
    %c0_1 = arith.constant 0 : index
    %c0_2 = arith.constant 0 : index
    %1 = vector.load %arg3[%c0_1, %c0_2] : memref<64x64xf32, #tpu.memory_space<vmem>>, vector<64x64xf32>
    %cst = arith.constant dense<0.000000e+00> : vector<8x64xf32>
    %2 = tpu.matmul %0, %1, %cst {dimension_numbers = #tpu.dot_dimension_numbers<[1], [0], [0], [1], [0, 0, 1, 1], [], []>} : vector<8x64xf32>, vector<64x64xf32>, vector<8x64xf32> -> vector<8x64xf32>
    %c0_3 = arith.constant 0 : index
    %c0_4 = arith.constant 0 : index
    %3 = vector.load %arg4[%c0_3, %c0_4] : memref<1x64xf32, #tpu.memory_space<vmem>>, vector<1x64xf32>
    %4 = vector.broadcast %3 : vector<1x64xf32> to vector<8x64xf32>
    %5 = arith.addf %2, %4 : vector<8x64xf32>
    %cst_5 = arith.constant 0.000000e+00 : f32
    %6 = vector.broadcast %cst_5 : f32 to vector<8x64xf32>
    %7 = arith.maximumf %5, %6 : vector<8x64xf32>
    %c0_6 = arith.constant 0 : index
    %c0_7 = arith.constant 0 : index
    %8 = vector.load %arg5[%c0_6, %c0_7] : memref<64x32xf32, #tpu.memory_space<vmem>>, vector<64x32xf32>
    %cst_8 = arith.constant dense<0.000000e+00> : vector<8x32xf32>
    %9 = tpu.matmul %7, %8, %cst_8 {dimension_numbers = #tpu.dot_dimension_numbers<[1], [0], [0], [1], [0, 0, 1, 1], [], []>} : vector<8x64xf32>, vector<64x32xf32>, vector<8x32xf32> -> vector<8x32xf32>
    %c0_9 = arith.constant 0 : index
    %c0_10 = arith.constant 0 : index
    %10 = vector.load %arg6[%c0_9, %c0_10] : memref<1x32xf32, #tpu.memory_space<vmem>>, vector<1x32xf32>
    %11 = vector.broadcast %10 : vector<1x32xf32> to vector<8x32xf32>
    %12 = arith.addf %9, %11 : vector<8x32xf32>
    %c0_11 = arith.constant 0 : index
    %c0_12 = arith.constant 0 : index
    %13 = vector.load %arg2[%c0_11, %c0_12] : memref<8x16xi32, #tpu.memory_space<vmem>>, vector<8x16xi32>
    %14 = tpu.iota {dimensions = array<i32: 1>} : vector<8x16xi32>
    %c8_i32 = arith.constant 8 : i32
    %15 = vector.broadcast %c8_i32 : i32 to vector<8x16xi32>
    %16 = arith.cmpi sge, %14, %15 : vector<8x16xi32>
    %c24_i32 = arith.constant 24 : i32
    %c0_i32 = arith.constant 0 : i32
    %17 = vector.broadcast %c24_i32 : i32 to vector<8x16xi32>
    %18 = vector.broadcast %c0_i32 : i32 to vector<8x16xi32>
    %19 = arith.select %16, %17, %18 : vector<8x16xi1>, vector<8x16xi32>
    %20 = arith.addi %13, %19 : vector<8x16xi32>
    %21 = tpu.iota {dimensions = array<i32: 2>} : vector<8x16x48xi32>
    %22 = vector.shape_cast %20 : vector<8x16xi32> to vector<8x16x1xi32>
    %23 = vector.broadcast %22 : vector<8x16x1xi32> to vector<8x16x48xi32>
    %24 = arith.cmpi eq, %21, %23 : vector<8x16x48xi32>
    %25 = arith.extui %24 : vector<8x16x48xi1> to vector<8x16x48xi32>
    %26 = arith.sitofp %25 : vector<8x16x48xi32> to vector<8x16x48xf32>
    %cst_13 = arith.constant dense<0.000000e+00> : vector<8x48xf32>
    %27 = vector.multi_reduction <add>, %26, %cst_13 [1] : vector<8x16x48xf32> to vector<8x48xf32>
    %cst_14 = arith.constant 1.250000e-01 : f32
    %28 = vector.broadcast %cst_14 : f32 to vector<8x48xf32>
    %29 = arith.mulf %27, %28 : vector<8x48xf32>
    %c0_15 = arith.constant 0 : index
    %c0_16 = arith.constant 0 : index
    %30 = vector.load %arg7[%c0_15, %c0_16] : memref<48x64xf32, #tpu.memory_space<vmem>>, vector<48x64xf32>
    %cst_17 = arith.constant dense<0.000000e+00> : vector<8x64xf32>
    %31 = tpu.matmul %29, %30, %cst_17 {dimension_numbers = #tpu.dot_dimension_numbers<[1], [0], [0], [1], [0, 0, 1, 1], [], []>} : vector<8x48xf32>, vector<48x64xf32>, vector<8x64xf32> -> vector<8x64xf32>
    %c0_18 = arith.constant 0 : index
    %c0_19 = arith.constant 0 : index
    %32 = vector.load %arg8[%c0_18, %c0_19] : memref<64x64xf32, #tpu.memory_space<vmem>>, vector<64x64xf32>
    %cst_20 = arith.constant dense<0.000000e+00> : vector<8x64xf32>
    %33 = tpu.matmul %31, %32, %cst_20 {dimension_numbers = #tpu.dot_dimension_numbers<[1], [0], [0], [1], [0, 0, 1, 1], [], []>} : vector<8x64xf32>, vector<64x64xf32>, vector<8x64xf32> -> vector<8x64xf32>
    %c0_21 = arith.constant 0 : index
    %c0_22 = arith.constant 0 : index
    %34 = vector.load %arg9[%c0_21, %c0_22] : memref<1x64xf32, #tpu.memory_space<vmem>>, vector<1x64xf32>
    %35 = vector.broadcast %34 : vector<1x64xf32> to vector<8x64xf32>
    %36 = arith.addf %33, %35 : vector<8x64xf32>
    %37 = vector.extract_strided_slice %36 {offsets = [0, 0], sizes = [8, 32], strides = [1, 1]} : vector<8x64xf32> to vector<8x32xf32>
    %38 = vector.extract_strided_slice %36 {offsets = [0, 32], sizes = [8, 32], strides = [1, 1]} : vector<8x64xf32> to vector<8x32xf32>
    %39 = arith.mulf %37, %37 : vector<8x32xf32>
    %cst_23 = arith.constant dense<0.000000e+00> : vector<8xf32>
    %40 = vector.multi_reduction <add>, %39, %cst_23 [1] : vector<8x32xf32> to vector<8xf32>
    %41 = vector.shape_cast %40 : vector<8xf32> to vector<8x1xf32>
    %cst_24 = arith.constant 9.99999996E-13 : f32
    %42 = vector.broadcast %cst_24 : f32 to vector<8x1xf32>
    %43 = arith.addf %41, %42 : vector<8x1xf32>
    %44 = math.rsqrt %43 : vector<8x1xf32>
    %45 = vector.broadcast %44 : vector<8x1xf32> to vector<8x32xf32>
    %46 = arith.mulf %37, %45 : vector<8x32xf32>
    %47 = arith.mulf %38, %38 : vector<8x32xf32>
    %cst_25 = arith.constant dense<0.000000e+00> : vector<8xf32>
    %48 = vector.multi_reduction <add>, %47, %cst_25 [1] : vector<8x32xf32> to vector<8xf32>
    %49 = vector.shape_cast %48 : vector<8xf32> to vector<8x1xf32>
    %cst_26 = arith.constant 9.99999996E-13 : f32
    %50 = vector.broadcast %cst_26 : f32 to vector<8x1xf32>
    %51 = arith.addf %49, %50 : vector<8x1xf32>
    %52 = math.rsqrt %51 : vector<8x1xf32>
    %53 = vector.broadcast %52 : vector<8x1xf32> to vector<8x32xf32>
    %54 = arith.mulf %38, %53 : vector<8x32xf32>
    %c0_27 = arith.constant 0 : index
    %c0_28 = arith.constant 0 : index
    %55 = vector.load %arg10[%c0_27, %c0_28] : memref<32x32xf32, #tpu.memory_space<vmem>>, vector<32x32xf32>
    %cst_29 = arith.constant dense<0.000000e+00> : vector<8x32xf32>
    %56 = tpu.matmul %46, %55, %cst_29 {dimension_numbers = #tpu.dot_dimension_numbers<[1], [0], [0], [1], [0, 0, 1, 1], [], []>} : vector<8x32xf32>, vector<32x32xf32>, vector<8x32xf32> -> vector<8x32xf32>
    %57 = arith.mulf %56, %54 : vector<8x32xf32>
    %cst_30 = arith.constant dense<0.000000e+00> : vector<8xf32>
    %58 = vector.multi_reduction <add>, %57, %cst_30 [1] : vector<8x32xf32> to vector<8xf32>
    %59 = vector.shape_cast %58 : vector<8xf32> to vector<8x1xf32>
    %c0_31 = arith.constant 0 : index
    %c0_32 = arith.constant 0 : index
    %60 = memref.load %arg11[%c0_31, %c0_32] : memref<1x1xf32, #tpu.memory_space<smem>>
    %61 = vector.broadcast %60 : f32 to vector<8x1xf32>
    %62 = arith.addf %59, %61 : vector<8x1xf32>
    %63 = arith.negf %62 : vector<8x1xf32>
    %64 = math.exp %63 : vector<8x1xf32>
    %cst_33 = arith.constant 1.000000e+00 : f32
    %65 = vector.broadcast %cst_33 : f32 to vector<8x1xf32>
    %66 = arith.addf %65, %64 : vector<8x1xf32>
    %67 = arith.divf %65, %66 : vector<8x1xf32>
    %68 = vector.broadcast %67 : vector<8x1xf32> to vector<8x32xf32>
    %69 = arith.mulf %68, %46 : vector<8x32xf32>
    %cst_34 = arith.constant 1.000000e+00 : f32
    %70 = vector.broadcast %cst_34 : f32 to vector<8x1xf32>
    %71 = arith.subf %70, %67 : vector<8x1xf32>
    %72 = vector.broadcast %71 : vector<8x1xf32> to vector<8x32xf32>
    %73 = arith.mulf %72, %54 : vector<8x32xf32>
    %74 = arith.addf %69, %73 : vector<8x32xf32>
    %75 = arith.addf %74, %12 : vector<8x32xf32>
    %c0_35 = arith.constant 0 : index
    %c0_36 = arith.constant 0 : index
    %76 = vector.load %arg12[%c0_35, %c0_36] : memref<16x32xf32, #tpu.memory_space<vmem>>, vector<16x32xf32>
    %77 = arith.mulf %76, %76 : vector<16x32xf32>
    %cst_37 = arith.constant dense<0.000000e+00> : vector<16xf32>
    %78 = vector.multi_reduction <add>, %77, %cst_37 [1] : vector<16x32xf32> to vector<16xf32>
    %79 = vector.shape_cast %78 : vector<16xf32> to vector<1x16xf32>
    %80 = tpu.transpose %76, [1, 0] : vector<16x32xf32> -> vector<32x16xf32>
    %cst_38 = arith.constant dense<0.000000e+00> : vector<8x16xf32>
    %81 = tpu.matmul %75, %80, %cst_38 {dimension_numbers = #tpu.dot_dimension_numbers<[1], [0], [0], [1], [0, 0, 1, 1], [], []>} : vector<8x32xf32>, vector<32x16xf32>, vector<8x16xf32> -> vector<8x16xf32>
    %cst_39 = arith.constant 2.000000e+00 : f32
    %82 = vector.broadcast %cst_39 : f32 to vector<8x16xf32>
    %83 = arith.mulf %82, %81 : vector<8x16xf32>
    %84 = vector.broadcast %79 : vector<1x16xf32> to vector<8x16xf32>
    %85 = arith.subf %84, %83 : vector<8x16xf32>
    %86 = tpu.iota {dimensions = array<i32: 1>} : vector<8x16xi32>
    %cst_40 = arith.constant dense<0x7F800000> : vector<8xf32>
    %87 = vector.multi_reduction <minimumf>, %85, %cst_40 [1] : vector<8x16xf32> to vector<8xf32>
    %88 = vector.shape_cast %87 : vector<8xf32> to vector<8x1xf32>
    %89 = vector.broadcast %88 : vector<8x1xf32> to vector<8x16xf32>
    %90 = arith.cmpf ole, %85, %89 : vector<8x16xf32>
    %c16_i32 = arith.constant 16 : i32
    %91 = vector.broadcast %c16_i32 : i32 to vector<8x16xi32>
    %92 = arith.select %90, %86, %91 : vector<8x16xi1>, vector<8x16xi32>
    %cst_41 = arith.constant dense<2147483647> : vector<8xi32>
    %93 = vector.multi_reduction <minsi>, %92, %cst_41 [1] : vector<8x16xi32> to vector<8xi32>
    %94 = vector.shape_cast %93 : vector<8xi32> to vector<8x1xi32>
    %95 = vector.broadcast %94 : vector<8x1xi32> to vector<8x16xi32>
    %96 = arith.cmpi eq, %86, %95 : vector<8x16xi32>
    %97 = arith.extui %96 : vector<8x16xi1> to vector<8x16xi32>
    %98 = arith.sitofp %97 : vector<8x16xi32> to vector<8x16xf32>
    %cst_42 = arith.constant dense<0.000000e+00> : vector<8x32xf32>
    %99 = tpu.matmul %98, %76, %cst_42 {dimension_numbers = #tpu.dot_dimension_numbers<[1], [0], [0], [1], [0, 0, 1, 1], [], []>} : vector<8x16xf32>, vector<16x32xf32>, vector<8x32xf32> -> vector<8x32xf32>
    %100 = arith.subf %99, %75 : vector<8x32xf32>
    %101 = arith.mulf %100, %100 : vector<8x32xf32>
    %102 = vector.shape_cast %101 : vector<8x32xf32> to vector<1x8x32xf32>
    %cst_43 = arith.constant dense<0.000000e+00> : vector<1xf32>
    %103 = vector.multi_reduction <add>, %102, %cst_43 [1, 2] : vector<1x8x32xf32> to vector<1xf32>
    %104 = vector.shape_cast %103 : vector<1xf32> to vector<1x1x1xf32>
    %105 = vector.extract %104[0, 0, 0] : f32 from vector<1x1x1xf32>
    %106 = arith.addf %99, %12 : vector<8x32xf32>
    %c0_44 = arith.constant 0 : index
    %c0_45 = arith.constant 0 : index
    %107 = vector.load %arg13[%c0_44, %c0_45] : memref<32x64xf32, #tpu.memory_space<vmem>>, vector<32x64xf32>
    %cst_46 = arith.constant dense<0.000000e+00> : vector<8x64xf32>
    %108 = tpu.matmul %106, %107, %cst_46 {dimension_numbers = #tpu.dot_dimension_numbers<[1], [0], [0], [1], [0, 0, 1, 1], [], []>} : vector<8x32xf32>, vector<32x64xf32>, vector<8x64xf32> -> vector<8x64xf32>
    %c0_47 = arith.constant 0 : index
    %c0_48 = arith.constant 0 : index
    %109 = vector.load %arg14[%c0_47, %c0_48] : memref<1x64xf32, #tpu.memory_space<vmem>>, vector<1x64xf32>
    %110 = vector.broadcast %109 : vector<1x64xf32> to vector<8x64xf32>
    %111 = arith.addf %108, %110 : vector<8x64xf32>
    %cst_49 = arith.constant 0.000000e+00 : f32
    %112 = vector.broadcast %cst_49 : f32 to vector<8x64xf32>
    %113 = arith.maximumf %111, %112 : vector<8x64xf32>
    %c0_50 = arith.constant 0 : index
    %c0_51 = arith.constant 0 : index
    %114 = vector.load %arg15[%c0_50, %c0_51] : memref<64x64xf32, #tpu.memory_space<vmem>>, vector<64x64xf32>
    %cst_52 = arith.constant dense<0.000000e+00> : vector<8x64xf32>
    %115 = tpu.matmul %113, %114, %cst_52 {dimension_numbers = #tpu.dot_dimension_numbers<[1], [0], [0], [1], [0, 0, 1, 1], [], []>} : vector<8x64xf32>, vector<64x64xf32>, vector<8x64xf32> -> vector<8x64xf32>
    %c0_53 = arith.constant 0 : index
    %c0_54 = arith.constant 0 : index
    %116 = vector.load %arg16[%c0_53, %c0_54] : memref<1x64xf32, #tpu.memory_space<vmem>>, vector<1x64xf32>
    %117 = vector.broadcast %116 : vector<1x64xf32> to vector<8x64xf32>
    %118 = arith.addf %115, %117 : vector<8x64xf32>
    %c0_55 = arith.constant 0 : index
    %c0_56 = arith.constant 0 : index
    %119 = vector.load %arg17[%c0_55, %c0_56] : memref<32x1792xf32, #tpu.memory_space<vmem>>, vector<32x1792xf32>
    %cst_57 = arith.constant dense<0.000000e+00> : vector<8x1792xf32>
    %120 = tpu.matmul %106, %119, %cst_57 {dimension_numbers = #tpu.dot_dimension_numbers<[1], [0], [0], [1], [0, 0, 1, 1], [], []>} : vector<8x32xf32>, vector<32x1792xf32>, vector<8x1792xf32> -> vector<8x1792xf32>
    %c0_58 = arith.constant 0 : index
    %c0_59 = arith.constant 0 : index
    %121 = vector.load %arg18[%c0_58, %c0_59] : memref<1x1792xf32, #tpu.memory_space<vmem>>, vector<1x1792xf32>
    %122 = vector.broadcast %121 : vector<1x1792xf32> to vector<8x1792xf32>
    %123 = arith.addf %120, %122 : vector<8x1792xf32>
    %124 = arith.subf %118, %0 : vector<8x64xf32>
    %125 = arith.mulf %124, %124 : vector<8x64xf32>
    %126 = vector.shape_cast %125 : vector<8x64xf32> to vector<1x8x64xf32>
    %cst_60 = arith.constant dense<0.000000e+00> : vector<1xf32>
    %127 = vector.multi_reduction <add>, %126, %cst_60 [1, 2] : vector<1x8x64xf32> to vector<1xf32>
    %128 = vector.shape_cast %127 : vector<1xf32> to vector<1x1x1xf32>
    %129 = vector.extract %128[0, 0, 0] : f32 from vector<1x1x1xf32>
    %130 = vector.shape_cast %123 : vector<8x1792xf32> to vector<8x14x128xf32>
    %131 = vector.extract_strided_slice %13 {offsets = [0, 1], sizes = [8, 7], strides = [1, 1]} : vector<8x16xi32> to vector<8x7xi32>
    %132 = vector.extract_strided_slice %13 {offsets = [0, 9], sizes = [8, 7], strides = [1, 1]} : vector<8x16xi32> to vector<8x7xi32>
    %133 = tpu.concatenate %131, %132 in 1 : vector<8x7xi32>, vector<8x7xi32> -> vector<8x14xi32>
    %cst_61 = arith.constant dense<0xFF800000> : vector<8x14xf32>
    %134 = vector.multi_reduction <maximumf>, %130, %cst_61 [2] : vector<8x14x128xf32> to vector<8x14xf32>
    %135 = vector.shape_cast %134 : vector<8x14xf32> to vector<8x14x1xf32>
    %136 = vector.broadcast %135 : vector<8x14x1xf32> to vector<8x14x128xf32>
    %137 = arith.subf %130, %136 : vector<8x14x128xf32>
    %138 = math.exp %137 : vector<8x14x128xf32>
    %cst_62 = arith.constant dense<0.000000e+00> : vector<8x14xf32>
    %139 = vector.multi_reduction <add>, %138, %cst_62 [2] : vector<8x14x128xf32> to vector<8x14xf32>
    %140 = vector.shape_cast %139 : vector<8x14xf32> to vector<8x14x1xf32>
    %141 = math.log %140 : vector<8x14x1xf32>
    %142 = arith.addf %141, %135 : vector<8x14x1xf32>
    %143 = tpu.iota {dimensions = array<i32: 2>} : vector<8x14x128xi32>
    %144 = vector.shape_cast %133 : vector<8x14xi32> to vector<8x14x1xi32>
    %145 = vector.broadcast %144 : vector<8x14x1xi32> to vector<8x14x128xi32>
    %146 = arith.cmpi eq, %143, %145 : vector<8x14x128xi32>
    %cst_63 = arith.constant 0.000000e+00 : f32
    %147 = vector.broadcast %cst_63 : f32 to vector<8x14x128xf32>
    %148 = arith.select %146, %130, %147 : vector<8x14x128xi1>, vector<8x14x128xf32>
    %cst_64 = arith.constant dense<0.000000e+00> : vector<8x14xf32>
    %149 = vector.multi_reduction <add>, %148, %cst_64 [2] : vector<8x14x128xf32> to vector<8x14xf32>
    %150 = vector.shape_cast %149 : vector<8x14xf32> to vector<8x14x1xf32>
    %151 = arith.subf %142, %150 : vector<8x14x1xf32>
    %152 = vector.shape_cast %151 : vector<8x14x1xf32> to vector<8x14xf32>
    %c0_i32_65 = arith.constant 0 : i32
    %153 = vector.broadcast %c0_i32_65 : i32 to vector<8x14xi32>
    %154 = arith.cmpi ne, %133, %153 : vector<8x14xi32>
    %155 = arith.extui %154 : vector<8x14xi1> to vector<8x14xi32>
    %156 = arith.sitofp %155 : vector<8x14xi32> to vector<8x14xf32>
    %157 = arith.mulf %152, %156 : vector<8x14xf32>
    %158 = vector.shape_cast %157 : vector<8x14xf32> to vector<1x8x14xf32>
    %cst_66 = arith.constant dense<0.000000e+00> : vector<1xf32>
    %159 = vector.multi_reduction <add>, %158, %cst_66 [1, 2] : vector<1x8x14xf32> to vector<1xf32>
    %160 = vector.shape_cast %159 : vector<1xf32> to vector<1x1x1xf32>
    %161 = vector.extract %160[0, 0, 0] : f32 from vector<1x1x1xf32>
    %162 = vector.shape_cast %156 : vector<8x14xf32> to vector<1x8x14xf32>
    %cst_67 = arith.constant dense<0.000000e+00> : vector<1xf32>
    %163 = vector.multi_reduction <add>, %162, %cst_67 [1, 2] : vector<1x8x14xf32> to vector<1xf32>
    %164 = vector.shape_cast %163 : vector<1xf32> to vector<1x1x1xf32>
    %165 = vector.extract %164[0, 0, 0] : f32 from vector<1x1x1xf32>
    %166 = vector.shape_cast %67 : vector<8x1xf32> to vector<8x1xf32>
    %167 = vector.broadcast %166 : vector<8x1xf32> to vector<8x128xf32>
    %168 = tpu.concatenate %74, %12, %99, %106, %167 in 1 : vector<8x32xf32>, vector<8x32xf32>, vector<8x32xf32>, vector<8x32xf32>, vector<8x128xf32> -> vector<8x256xf32>
    %c0_68 = arith.constant 0 : index
    %c0_69 = arith.constant 0 : index
    %169 = vector.load %arg19[%c0_68, %c0_69] : memref<8x256xf32, #tpu.memory_space<vmem>>, vector<8x256xf32>
    tpu.vector_store %arg19[%c0_68, %c0_69], %168 {strides = array<i32>} : memref<8x256xf32, #tpu.memory_space<vmem>>, vector<8x256xf32>,
    %170 = tpu.iota {dimensions = array<i32: 2>} : vector<1x8x128xi32>
    %c0_i32_70 = arith.constant 0 : i32
    %171 = vector.broadcast %c0_i32_70 : i32 to vector<1x8x128xi32>
    %172 = arith.cmpi eq, %170, %171 : vector<1x8x128xi32>
    %c1_i32 = arith.constant 1 : i32
    %173 = vector.broadcast %c1_i32 : i32 to vector<1x8x128xi32>
    %174 = arith.cmpi eq, %170, %173 : vector<1x8x128xi32>
    %c2_i32 = arith.constant 2 : i32
    %175 = vector.broadcast %c2_i32 : i32 to vector<1x8x128xi32>
    %176 = arith.cmpi eq, %170, %175 : vector<1x8x128xi32>
    %c3_i32 = arith.constant 3 : i32
    %177 = vector.broadcast %c3_i32 : i32 to vector<1x8x128xi32>
    %178 = arith.cmpi eq, %170, %177 : vector<1x8x128xi32>
    %cst_71 = arith.constant 0.000000e+00 : f32
    %179 = vector.broadcast %105 : f32 to vector<1x8x128xf32>
    %180 = vector.broadcast %cst_71 : f32 to vector<1x8x128xf32>
    %181 = arith.select %178, %179, %180 : vector<1x8x128xi1>, vector<1x8x128xf32>
    %182 = vector.broadcast %165 : f32 to vector<1x8x128xf32>
    %183 = arith.select %176, %182, %181 : vector<1x8x128xi1>, vector<1x8x128xf32>
    %184 = vector.broadcast %161 : f32 to vector<1x8x128xf32>
    %185 = arith.select %174, %184, %183 : vector<1x8x128xi1>, vector<1x8x128xf32>
    %186 = vector.broadcast %129 : f32 to vector<1x8x128xf32>
    %187 = arith.select %172, %186, %185 : vector<1x8x128xi1>, vector<1x8x128xf32>
    %c0_72 = arith.constant 0 : index
    %c0_73 = arith.constant 0 : index
    %c0_74 = arith.constant 0 : index
    %188 = vector.load %arg20[%c0_72, %c0_73, %c0_74] : memref<1x8x128xf32, #tpu.memory_space<vmem>>, vector<1x8x128xf32>
    tpu.vector_store %arg20[%c0_72, %c0_73, %c0_74], %187 {strides = array<i32>} : memref<1x8x128xf32, #tpu.memory_space<vmem>>, vector<1x8x128xf32>,
    return
  }
  func.func @transform_0(%arg0: i32) -> (i32, i32) {
    %c0_i32 = arith.constant 0 : i32
    %c0_i32_0 = arith.constant 0 : i32
    return %arg0, %c0_i32 : i32, i32
  }
  func.func @transform_1(%arg0: i32) -> (i32, i32) {
    %c0_i32 = arith.constant 0 : i32
    %c0_i32_0 = arith.constant 0 : i32
    return %arg0, %c0_i32 : i32, i32
  }
  func.func @transform_2(%arg0: i32) -> (i32, i32) {
    %c0_i32 = arith.constant 0 : i32
    %c0_i32_0 = arith.constant 0 : i32
    %c0_i32_1 = arith.constant 0 : i32
    return %c0_i32, %c0_i32_0 : i32, i32
  }
  func.func @transform_3(%arg0: i32) -> (i32, i32) {
    %c0_i32 = arith.constant 0 : i32
    %c0_i32_0 = arith.constant 0 : i32
    %c0_i32_1 = arith.constant 0 : i32
    return %c0_i32, %c0_i32_0 : i32, i32
  }
  func.func @transform_4(%arg0: i32) -> (i32, i32) {
    %c0_i32 = arith.constant 0 : i32
    %c0_i32_0 = arith.constant 0 : i32
    %c0_i32_1 = arith.constant 0 : i32
    return %c0_i32, %c0_i32_0 : i32, i32
  }
  func.func @transform_5(%arg0: i32) -> (i32, i32) {
    %c0_i32 = arith.constant 0 : i32
    %c0_i32_0 = arith.constant 0 : i32
    %c0_i32_1 = arith.constant 0 : i32
    return %c0_i32, %c0_i32_0 : i32, i32
  }
  func.func @transform_6(%arg0: i32) -> (i32, i32) {
    %c0_i32 = arith.constant 0 : i32
    %c0_i32_0 = arith.constant 0 : i32
    %c0_i32_1 = arith.constant 0 : i32
    return %c0_i32, %c0_i32_0 : i32, i32
  }
  func.func @transform_7(%arg0: i32) -> (i32, i32) {
    %c0_i32 = arith.constant 0 : i32
    %c0_i32_0 = arith.constant 0 : i32
    %c0_i32_1 = arith.constant 0 : i32
    return %c0_i32, %c0_i32_0 : i32, i32
  }
  func.func @transform_8(%arg0: i32) -> (i32, i32) {
    %c0_i32 = arith.constant 0 : i32
    %c0_i32_0 = arith.constant 0 : i32
    %c0_i32_1 = arith.constant 0 : i32
    return %c0_i32, %c0_i32_0 : i32, i32
  }
  func.func @transform_9(%arg0: i32) -> (i32, i32) {
    %c0_i32 = arith.constant 0 : i32
    %c0_i32_0 = arith.constant 0 : i32
    %c0_i32_1 = arith.constant 0 : i32
    return %c0_i32, %c0_i32_0 : i32, i32
  }
  func.func @transform_10(%arg0: i32) -> (i32, i32) {
    %c0_i32 = arith.constant 0 : i32
    %c0_i32_0 = arith.constant 0 : i32
    %c0_i32_1 = arith.constant 0 : i32
    return %c0_i32, %c0_i32_0 : i32, i32
  }
  func.func @transform_11(%arg0: i32) -> (i32, i32) {
    %c0_i32 = arith.constant 0 : i32
    %c0_i32_0 = arith.constant 0 : i32
    %c0_i32_1 = arith.constant 0 : i32
    return %c0_i32, %c0_i32_0 : i32, i32
  }
  func.func @transform_12(%arg0: i32) -> (i32, i32) {
    %c0_i32 = arith.constant 0 : i32
    %c0_i32_0 = arith.constant 0 : i32
    %c0_i32_1 = arith.constant 0 : i32
    return %c0_i32, %c0_i32_0 : i32, i32
  }
  func.func @transform_13(%arg0: i32) -> (i32, i32) {
    %c0_i32 = arith.constant 0 : i32
    %c0_i32_0 = arith.constant 0 : i32
    %c0_i32_1 = arith.constant 0 : i32
    return %c0_i32, %c0_i32_0 : i32, i32
  }
  func.func @transform_14(%arg0: i32) -> (i32, i32) {
    %c0_i32 = arith.constant 0 : i32
    %c0_i32_0 = arith.constant 0 : i32
    %c0_i32_1 = arith.constant 0 : i32
    return %c0_i32, %c0_i32_0 : i32, i32
  }
  func.func @transform_15(%arg0: i32) -> (i32, i32) {
    %c0_i32 = arith.constant 0 : i32
    %c0_i32_0 = arith.constant 0 : i32
    %c0_i32_1 = arith.constant 0 : i32
    return %c0_i32, %c0_i32_0 : i32, i32
  }
  func.func @transform_16(%arg0: i32) -> (i32, i32) {
    %c0_i32 = arith.constant 0 : i32
    %c0_i32_0 = arith.constant 0 : i32
    %c0_i32_1 = arith.constant 0 : i32
    return %c0_i32, %c0_i32_0 : i32, i32
  }
  func.func @transform_17(%arg0: i32) -> (i32, i32) {
    %c0_i32 = arith.constant 0 : i32
    %c0_i32_0 = arith.constant 0 : i32
    %c0_i32_1 = arith.constant 0 : i32
    return %c0_i32, %c0_i32_0 : i32, i32
  }
  func.func @transform_18(%arg0: i32) -> (i32, i32) {
    %c0_i32 = arith.constant 0 : i32
    %c0_i32_0 = arith.constant 0 : i32
    return %arg0, %c0_i32 : i32, i32
  }
  func.func @transform_19(%arg0: i32) -> (i32, i32, i32) {
    %c0_i32 = arith.constant 0 : i32
    %c0_i32_0 = arith.constant 0 : i32
    %c0_i32_1 = arith.constant 0 : i32
    return %arg0, %c0_i32, %c0_i32_0 : i32, i32, i32
  }
}

</mosaic_0001>

<bundles_post_ra>
// kernel: tpu_custom_call.1
= control target key start
LH: loop header
LB: loop body
LE: loop exit
PB: predicated region body
PF: predicated region fallthrough
CT: control target
= control target key end

     0   :  { %s4275_s0 = inlined_call_operand.hbm [shape: f32[8,64], index: 0, kind: input, shape index: {}]   ;;  %s4276_s1 = inlined_call_operand.hbm [shape: s32[8,16], index: 1, kind: input, shape index: {}]   ;;  %s4277_s2 = inlined_call_operand.vmem [shape: f32[64,64], index: 2, kind: input, shape index: {}]   ;;  %s4278_s3 = inlined_call_operand.vmem [shape: f32[1,64], index: 3, kind: input, shape index: {}]   ;;  %s4279_s4 = inlined_call_operand.vmem [shape: f32[64,32], index: 4, kind: input, shape index: {}]   ;;  %s4280_s5 = inlined_call_operand.hbm [shape: f32[1,32], index: 5, kind: input, shape index: {}]   ;;  %s4281_s6 = inlined_call_operand.hbm [shape: f32[48,64], index: 6, kind: input, shape index: {}]   ;;  %s4282_s7 = inlined_call_operand.hbm [shape: f32[64,64], index: 7, kind: input, shape index: {}]   ;;  %s4283_s8 = inlined_call_operand.hbm [shape: f32[1,64], index: 8, kind: input, shape index: {}]   ;;  %s4284_s9 = inlined_call_operand.vmem [shape: f32[32,32], index: 9, kind: input, shape index: {}]   ;;  %s4285_s10 = inlined_call_operand.<no memory space> [shape: f32[1,1], index: 10, kind: input, shape index: {}]   ;;  %s4286_s11 = inlined_call_operand.hbm [shape: f32[16,32], index: 11, kind: input, shape index: {}]   ;;  %s4287_s12 = inlined_call_operand.hbm [shape: f32[32,64], index: 12, kind: input, shape index: {}]   ;;  %s4288_s13 = inlined_call_operand.hbm [shape: f32[1,64], index: 13, kind: input, shape index: {}]   ;;  %s4289_s14 = inlined_call_operand.hbm [shape: f32[64,64], index: 14, kind: input, shape index: {}]   ;;  %s4290_s15 = inlined_call_operand.hbm [shape: f32[1,64], index: 15, kind: input, shape index: {}]   ;;  %s4291_s16 = inlined_call_operand.hbm [shape: f32[32,1792], index: 16, kind: input, shape index: {}]   ;;  %s4292_s17 = inlined_call_operand.vmem [shape: f32[1,1792], index: 17, kind: input, shape index: {}]   ;;  %s4293_s18 = inlined_call_operand.hbm [shape: f32[8,256], index: 18, kind: output, shape index: {0}]   ;;  %s4294_s19 = inlined_call_operand.hbm [shape: f32[1,8,128], index: 19, kind: output, shape index: {1}]  }
   0x1   :  { %4297 = sst [smem:[#allocation35_spill]] %s4275_s0 }
   0x2   :  { %4298 = sst [smem:[#allocation36_spill]] %s4276_s1 }
   0x3   :  { %4299 = sst [smem:[#allocation37_spill]] %s4277_s2 }
   0x4   :  { %4300 = sst [smem:[#allocation38_spill]] %s4278_s3 }
   0x5   :  { %26 = vsyncpa [#allocation4], 0 }
   0x6   :  { %27 = vsyncpa [#allocation7], 0 }
   0x7   :  { %28 = vsyncpa [#allocation10], 0 }
   0x8   :  { %29 = vsyncpa [#allocation13], 0 }
   0x9   :  { %30 = vsyncpa [#allocation16], 0 }
   0xa   :  { %31 = vsyncpa [#allocation19], 0 }
   0xb   :  { %32 = vsyncpa [#allocation22], 0 }
   0xc   :  { %33 = vsyncpa [#allocation5], 0  ;;  %s4301_s20 = sld [smem:[#allocation36_spill]] }
  0x12   :  { %s51_s21 = sshll.u32 %s4301_s20, 4  ;;  %s52_s21 = int_to_ptr.hbm [resolvable:$true] %s51_s21 }
  0x13   :  { %34 = vsyncpa [#allocation25], 0  ;;  %s3173_s1 = smov [#allocation6]   ;;  %s78_s24 = sshll.u32 %s4281_s6, 4  ;;  %s79_s24 = int_to_ptr.hbm [resolvable:$true] %s78_s24 }
  0x14   :  { %s53_s22 = sshll.u32 %s3173_s1, 4  ;;  %s3174_s25 = smov [#allocation9]   ;;  %s54_s22 = int_to_ptr.vmem [resolvable:$true] %s53_s22 }
  0x15   :  { %56 = dma.hbm_to_vmem [thread:$0]  %s52_s21, 128, %s54_s22, [#allocation7]  }
  0x16   :  { %s80_s3 = sshll.u32 %s3174_s25, 4  ;;  %s3175_s26 = smov 128   ;;  %s81_s3 = int_to_ptr.vmem [resolvable:$true] %s80_s3 }
  0x17   :  { %s3176_s27 = smov 8   ;;  %s105_s0 = sshll.u32 %s4283_s8, 4  ;;  %s106_s0 = int_to_ptr.hbm [resolvable:$true] %s105_s0 }
  0x18   :  { %86 = dma.hbm_to_vmem [thread:$0]  %s79_s24, 768, %s81_s3, [#allocation10], %s3175_s26, %s3175_s26, %s3176_s27  }
  0x19   :  { %s3177_s30 = smov [#allocation12]   ;;  %s132_s1 = sshll.u32 %s4287_s12, 4  ;;  %s133_s1 = int_to_ptr.hbm [resolvable:$true] %s132_s1 }
  0x1a   :  { %s107_s20 = sshll.u32 %s3177_s30, 4  ;;  %s3178_s22 = smov [#allocation15]   ;;  %s108_s20 = int_to_ptr.vmem [resolvable:$true] %s107_s20 }
  0x1b   :  { %110 = dma.hbm_to_vmem [thread:$0]  %s106_s0, 16, %s108_s20, [#allocation13]  }
  0x1c   :  { %s134_s2 = sshll.u32 %s3178_s22, 4  ;;  %s156_s24 = sshll.u32 %s4289_s14, 4  ;;  %s135_s2 = int_to_ptr.vmem [resolvable:$true] %s134_s2  ;;  %s157_s24 = int_to_ptr.hbm [resolvable:$true] %s156_s24 }
  0x1d   :  { %140 = dma.hbm_to_vmem [thread:$0]  %s133_s1, 512, %s135_s2, [#allocation16], %s3175_s26, %s3175_s26, %s3176_s27  }
  0x1e   :  { %s4302_s28 = sld [smem:[#allocation35_spill]]  ;;  %s3179_s30 = smov [#allocation18]  }
  0x1f   :  { %s158_s12 = sshll.u32 %s3179_s30, 4  ;;  %s3180_s0 = smov [#allocation3]   ;;  %s159_s12 = int_to_ptr.vmem [resolvable:$true] %s158_s12 }
  0x20   :  { %164 = dma.hbm_to_vmem [thread:$0]  %s157_s24, 1024, %s159_s12, [#allocation19], %s3175_s26, %s3175_s26, %s3176_s27  }
  0x21   :  { %s42_s14 = sshll.u32 %s3180_s0, 4  ;;  %s68_s21 = sshll.u32 %s4280_s5, 4  ;;  %s43_s14 = int_to_ptr.vmem [resolvable:$true] %s42_s14  ;;  %s69_s21 = int_to_ptr.hbm [resolvable:$true] %s68_s21 }
  0x22   :  { %s91_s2 = sshll.u32 %s4282_s7, 4  ;;  %s3181_s23 = smov [#allocation8]   ;;  %s92_s2 = int_to_ptr.hbm [resolvable:$true] %s91_s2 }
  0x23   :  { %s70_s25 = sshll.u32 %s3181_s23, 4  ;;  %s3182_s8 = smov [#allocation11]   ;;  %s71_s25 = int_to_ptr.vmem [resolvable:$true] %s70_s25 }
  0x24   :  { %s40_s29 = sshll.u32 %s4302_s28, 4  ;;  %s93_s24 = sshll.u32 %s3182_s8, 4  ;;  %s41_s29 = int_to_ptr.hbm [resolvable:$true] %s40_s29  ;;  %s94_s24 = int_to_ptr.vmem [resolvable:$true] %s93_s24 }
  0x25   :  { %45 = dma.hbm_to_vmem [thread:$0]  %s41_s29, 128, %s43_s14, [#allocation4]  }
  0x26   :  { %73 = dma.hbm_to_vmem [thread:$0]  %s69_s21, 16, %s71_s25, [#allocation7]  }
  0x27   :  { %s119_s30 = sshll.u32 %s4286_s11, 4  ;;  %s146_s7 = sshll.u32 %s4288_s13, 4  ;;  %s120_s30 = int_to_ptr.hbm [resolvable:$true] %s119_s30  ;;  %s147_s7 = int_to_ptr.hbm [resolvable:$true] %s146_s7 }
  0x28   :  { %99 = dma.hbm_to_vmem [thread:$0]  %s92_s2, 1024, %s94_s24, [#allocation10], %s3175_s26, %s3175_s26, %s3176_s27  }
  0x29   :  { %s3183_s12 = smov [#allocation14]   ;;  %s3184_s14 = smov [#allocation17]  }
  0x2a   :  { %s121_s0 = sshll.u32 %s3183_s12, 4  ;;  %s148_s11 = sshll.u32 %s3184_s14, 4  ;;  %s122_s0 = int_to_ptr.vmem [resolvable:$true] %s121_s0  ;;  %s149_s11 = int_to_ptr.vmem [resolvable:$true] %s148_s11 }
  0x2b   :  { %127 = dma.hbm_to_vmem [thread:$0]  %s120_s30, 256, %s122_s0, [#allocation13], %s3175_s26, %s3175_s26, %s3176_s27  }
  0x2c   :  { %s170_s21 = sshll.u32 %s4290_s15, 4  ;;  %s180_s13 = sshll.u32 %s4291_s16, 4  ;;  %s171_s21 = int_to_ptr.hbm [resolvable:$true] %s170_s21  ;;  %s181_s13 = int_to_ptr.hbm [resolvable:$true] %s180_s13 }
  0x2d   :  { %151 = dma.hbm_to_vmem [thread:$0]  %s147_s7, 16, %s149_s11, [#allocation16]  }
  0x2e   :  { %s3185_s2 = smov [#allocation20]   ;;  %s3186_s25 = smov [#allocation21]  }
  0x2f   :  { %s172_s23 = sshll.u32 %s3185_s2, 4  ;;  %s182_s26 = sshll.u32 %s3186_s25, 4  ;;  %s173_s23 = int_to_ptr.vmem [resolvable:$true] %s172_s23  ;;  %s183_s26 = int_to_ptr.vmem [resolvable:$true] %s182_s26 }
  0x30   :  { %175 = dma.hbm_to_vmem [thread:$0]  %s171_s21, 16, %s173_s23, [#allocation19]  }
  0x31   :  { %s3187_s27 = smov 1792   ;;  %s3188_s8 = smov 112  }
  0x32   :  { %188 = dma.hbm_to_vmem [thread:$0]  %s181_s13, 7168, %s183_s26, [#allocation22], %s3187_s27, %s3187_s27, %s3188_s8  }
  0x33   :  { %3155 = dma.done.wait [#allocation4], 128  }
  0x34   :  { %3156 = vsyncadd [#allocation4], 4294967168 }
  0x35   :  { %3157 = dma.done.wait [#allocation7], 144  }
  0x36   :  { %3158 = vsyncadd [#allocation7], 4294967152 }
  0x37   :  { %3159 = dma.done.wait [#allocation10], 1792  }
  0x38   :  { %3160 = vsyncadd [#allocation10], 4294965504 }
  0x39   :  { %3161 = dma.done.wait [#allocation13], 272  }
  0x3a   :  { %3162 = vsyncadd [#allocation13], 4294967024 }
  0x3b   :  { %3163 = dma.done.wait [#allocation16], 528  }
  0x3c   :  { %3164 = vsyncadd [#allocation16], 4294966768 }
  0x3d   :  { %3165 = dma.done.wait [#allocation19], 1040  }
  0x3e   :  { %3166 = vsyncadd [#allocation19], 4294966256 }
  0x3f   :  { %3167 = dma.done.wait [#allocation22], 7168  }
  0x40   :  { %3168 = vsyncadd [#allocation22], 4294960128  ;;  %v313_v0 = vlaneseq  ;;  %v3189_v3 = vmov 0   ;;  %v312_v5 = vld [vmem:[#allocation6] sm:$0xff]  ;;  %v3190_v26 = vmov 0.0   ;;  %vm470_vm7 = vcmask 392192  }
  0x41   :  { %v556_v40 = vld [vmem:[#allocation9 + $0x28] sm:$0xff]  ;;  %v555_v45 = vld [vmem:[#allocation9 + $0x20] sm:$0xff]  ;;  %v554_v49 = vld [vmem:[#allocation9 + $0x18] sm:$0xff]  ;;  %s3191_s15 = smov 96   ;;  %s4303_s0 = sld [smem:[#allocation37_spill]] }
  0x42   :  { %v3351_v1 = vshrl.u32 %v313_v0, 7  ;;  %v3353_v2 = vand.u32 127, %v313_v0  ;;  %591 = vmatpush.msra.mxu2 %v556_v40  ;;  %v553_v54 = vld [vmem:[#allocation9 + $0x10] sm:$0xff]  ;;  %v552_v62 = vld [vmem:[#allocation9 + $0x8] sm:$0xff]  ;;  %s4304_s11 = sld [smem:[#allocation38_spill]]  ;;  %s3197_s16 = smov 64  }
  0x43   :  { %s2548_s3 = sshll.u32 %s4293_s18, 4  ;;  %s3198_s28 = smov [#allocation23]   ;;  %s2549_s3 = int_to_ptr.hbm [resolvable:$true] %s2548_s3 }
  0x44   :  { %2660 = vset.pattern.permute.xlu1 %v3351_v1  ;;  %2659 = vset.pattern.permute.xlu0 %v3351_v1  ;;  %vm315_vm0 = vcmp.ge.s32.totalorder %v3353_v2, 8  ;;  %v3361_v10 = vadd.s32 8, %v3351_v1  ;;  %s2546_s30 = sshll.u32 %s3198_s28, 4  ;;  %s3199_s7 = smov [#allocation24]   ;;  %s2547_s30 = int_to_ptr.vmem [resolvable:$true] %s2546_s30 }
  0x45   :  { %v316_v4 = vsel %vm315_vm0, 24, %v3189_v3  ;;  %2661 = vset.pattern.permute.xlu2 %v3351_v1  ;;  %592 = vmatpush.msra.mxu2 %v555_v45 }
  0x46   :  { %v317_v6 = vadd.s32 %v316_v4, %v312_v5 }
  0x47   :  { %593 = vmatpush.msra.mxu2 %v554_v49 }
  0x48   :  { %v331_v7 = vperm.slane %v317_v6, 1  ;;  %v318_v8 = vperm.slane %v317_v6, 0  ;;  %v344_v9 = vperm.slane %v317_v6, 2  ;;  %v370_v11 = vperm.slane %v317_v6, 4 }
  0x49   :  { %v357_v12 = vperm.slane %v317_v6, 3  ;;  %v396_v13 = vperm.slane %v317_v6, 6  ;;  %v383_v14 = vperm.slane %v317_v6, 5  ;;  %v409_v15 = vperm.slane %v317_v6, 7  ;;  %594 = vmatpush.msra.mxu2 %v553_v54  ;;  %v551_v6 = vld [vmem:[#allocation9] sm:$0xff] }
  0x4b   :  { %595 = vmatpush.msra.mxu2 %v552_v62 }
  0x4c   :  { %336 = vperm.xlu1 %2660, %v331_v7   ;;  %323 = vperm.xlu0 %2659, %v318_v8  }
  0x4d   :  { %349 = vperm.xlu2 %2661, %v344_v9   ;;  %596 = vmatpush.msra.mxu2 %v551_v6 }
  0x54   :  { %2662 = vset.pattern.permute.xlu1 %v3361_v10  ;;  %375 = vperm.xlu0 %2659, %v370_v11  }
  0x55   :  { %2664 = vset.pattern.permute.xlu2 %v3361_v10 }
  0x5c   :  { %342 = vperm.xlu1 %2662, %v331_v7   ;;  %2665 = vset.pattern.permute.xlu0 %v3361_v10 }
  0x5d   :  { %355 = vperm.xlu2 %2664, %v344_v9  }
  0x64   :  { %2663 = vset.pattern.permute.xlu1 %v3351_v1  ;;  %329 = vperm.xlu0 %2665, %v318_v8  }
  0x65   :  { %368 = vperm.xlu2 %2664, %v357_v12  }
  0x6c   :  { %362 = vperm.xlu1 %2663, %v357_v12   ;;  %407 = vperm.xlu0 %2665, %v396_v13  }
  0x6d   :  { %2667 = vset.pattern.permute.xlu2 %v3351_v1 }
  0x74   :  { %2666 = vset.pattern.permute.xlu1 %v3361_v10  ;;  %2670 = vset.pattern.permute.xlu0 %v3351_v1 }
  0x75   :  { %388 = vperm.xlu2 %2667, %v383_v14  }
  0x7c   :  { %381 = vperm.xlu1 %2666, %v370_v11  }
  0x7d   :  { %401 = vperm.xlu2 %2667, %v396_v13  }
  0x84   :  { %394 = vperm.xlu1 %2666, %v383_v14  }
  0x85   :  { %2669 = vset.pattern.permute.xlu2 %v3361_v10 }
  0x8c   :  { %2668 = vset.pattern.permute.xlu1 %v3351_v1 }
  0x8d   :  { %420 = vperm.xlu2 %2669, %v409_v15  }
  0x94   :  { %414 = vperm.xlu1 %2668, %v409_v15  }
  0xa7   :  { %v350_v16 = vpop.permute.xlu2 %349 }
  0xa8   :  { %vm426_vm4 = vcmp.eq.s32.totalorder %v3353_v2, %v350_v16 }
  0xa9   :  { %v2586_v30 = vsel %vm426_vm4, 1.0, %v3190_v26  ;;  %vm569_vm4 = vcmask 1043459  }
  0xaa   :  { %v489_v41 = vsel %vm470_vm7, %v2586_v30, 0.0 }
  0xb7   :  { %v356_v18 = vpop.permute.xlu2 %355 }
  0xb8   :  { %vm427_vm8 = vcmp.eq.s32.totalorder %v3353_v2, %v356_v18 }
  0xb9   :  { %v2587_v37 = vsel %vm427_vm8, 1.0, %v3190_v26  ;;  %vm575_vm8 = vcmask 1046534  }
  0xba   :  { %v490_v50 = vsel %vm470_vm7, %v2587_v37, 0.0  ;;  %v604_v37 = vld [vmem:[#allocation11 + $0x18] sm:$0xff] }
  0xbb   :  { %v491_v59 = vadd.f32 %v490_v50, %v489_v41  ;;  %v603_v41 = vld [vmem:[#allocation11 + $0x10] sm:$0xff] }
  0xbd   :  { %v492_v12 = vrot.slane %v491_v59, 4 }
  0xbe   :  { %v324_v17 = vpop.permute.xlu0 %323  ;;  %v337_v19 = vpop.permute.xlu1 %336 }
  0xbf   :  { %v369_v21 = vpop.permute.xlu2 %368  ;;  %vm422_vm1 = vcmp.eq.s32.totalorder %v3353_v2, %v324_v17  ;;  %vm424_vm5 = vcmp.eq.s32.totalorder %v3353_v2, %v337_v19  ;;  %v608_v19 = vld [vmem:[#allocation11 + $0x38] sm:$0xff] }
  0xc0   :  { %v2582_v27 = vsel %vm422_vm1, 1.0, %v3190_v26  ;;  %vm429_vm9 = vcmp.eq.s32.totalorder %v3353_v2, %v369_v21  ;;  %v2584_v33 = vsel %vm424_vm5, 1.0, %v3190_v26  ;;  %624 = vmatpush.msra.mxu3 %v608_v19  ;;  %vm571_vm5 = vcmask 1044484  }
  0xc1   :  { %v471_v31 = vsel %vm470_vm7, %v2582_v27, 0.0  ;;  %v2589_v42 = vsel %vm429_vm9, 1.0, %v3190_v26  ;;  %v480_v46 = vsel %vm470_vm7, %v2584_v33, 0.0  ;;  %v606_v27 = vld [vmem:[#allocation11 + $0x28] sm:$0xff]  ;;  %vm577_vm9 = vcmask 1047559  }
  0xc2   :  { %v499_v53 = vsel %vm470_vm7, %v2589_v42, 0.0 }
  0xc6   :  { %v376_v20 = vpop.permute.xlu0 %375 }
  0xc7   :  { %vm430_vm10 = vcmp.eq.s32.totalorder %v3353_v2, %v376_v20  ;;  %v607_v20 = vld [vmem:[#allocation11 + $0x30] sm:$0xff] }
  0xc8   :  { %v2590_v47 = vsel %vm430_vm10, 1.0, %v3190_v26  ;;  %625 = vmatpush.msra.mxu3 %v607_v20  ;;  %vm4296_vm10 = vcmask 523264  }
  0xc9   :  { %v507_v55 = vsel %vm470_vm7, %v2590_v47, 0.0  ;;  %v602_v47 = vld [vmem:[#allocation11 + $0x8] sm:$0xff] }
  0xca   :  { %626 = vmatpush.msra.mxu3 %v606_v27 }
  0xce   :  { %v343_v22 = vpop.permute.xlu1 %342 }
  0xcf   :  { %v389_v24 = vpop.permute.xlu2 %388  ;;  %vm425_vm3 = vcmp.eq.s32.totalorder %v3353_v2, %v343_v22 }
  0xd0   :  { %v2585_v29 = vsel %vm425_vm3, 1.0, %v3190_v26  ;;  %vm432_vm14 = vcmp.eq.s32.totalorder %v3353_v2, %v389_v24  ;;  %v493_v24 = vadd.f32 %v492_v12, %v491_v59  ;;  %vm567_vm3 = vcmask 1042434  }
  0xd1   :  { %v481_v38 = vsel %vm470_vm7, %v2585_v29, 0.0  ;;  %v2592_v0 = vsel %vm432_vm14, 1.0, %v3190_v26 }
  0xd2   :  { %v482_v51 = vadd.f32 %v481_v38, %v480_v46  ;;  %v516_v13 = vsel %vm470_vm7, %v2592_v0, 0.0 }
  0xd4   :  { %v483_v63 = vrot.slane %v482_v51, 4 }
  0xd6   :  { %v330_v23 = vpop.permute.xlu0 %329  ;;  %v484_v16 = vadd.f32 %v483_v63, %v482_v51 }
  0xd7   :  { %vm423_vm2 = vcmp.eq.s32.totalorder %v3353_v2, %v330_v23  ;;  %v402_v35 = vpop.permute.xlu2 %401 }
  0xd8   :  { %v2583_v28 = vsel %vm423_vm2, 1.0, %v3190_v26  ;;  %vm434_vm12 = vcmp.eq.s32.totalorder %v3353_v2, %v402_v35  ;;  %v494_v35 = vrot.slane %v493_v24, 2  ;;  %vm565_vm2 = vcmask 1041409  }
  0xd9   :  { %v472_v32 = vsel %vm470_vm7, %v2583_v28, 0.0  ;;  %v2594_v58 = vsel %vm434_vm12, 1.0, %v3190_v26  ;;  %v485_v28 = vrot.slane %v484_v16, 2 }
  0xda   :  { %v473_v43 = vadd.f32 %v472_v32, %v471_v31  ;;  %v525_v5 = vsel %vm470_vm7, %v2594_v58, 0.0  ;;  %v605_v32 = vld [vmem:[#allocation11 + $0x20] sm:$0xff]  ;;  %v495_v45 = vadd.f32 %v494_v35, %v493_v24 }
  0xdb   :  { %v486_v38 = vadd.f32 %v485_v28, %v484_v16  ;;  %627 = vmatpush.msra.mxu3 %v605_v32 }
  0xdc   :  { %v474_v56 = vrot.slane %v473_v43, 4 }
  0xdd   :  { %628 = vmatpush.msra.mxu3 %v604_v37 }
  0xde   :  { %v363_v25 = vpop.permute.xlu1 %362  ;;  %v408_v39 = vpop.permute.xlu0 %407  ;;  %v475_v7 = vadd.f32 %v474_v56, %v473_v43  ;;  %v496_v56 = vrot.slane %v495_v45, 1 }
  0xdf   :  { %vm428_vm6 = vcmp.eq.s32.totalorder %v3353_v2, %v363_v25  ;;  %vm435_vm13 = vcmp.eq.s32.totalorder %v3353_v2, %v408_v39  ;;  %629 = vmatpush.msra.mxu3 %v603_v41  ;;  %v674_v41 = vld [vmem:[%s4284_s9 + $0x10] sm:$0xff] }
  0xe0   :  { %v2588_v34 = vsel %vm428_vm6, 1.0, %v3190_v26  ;;  %v2595_v60 = vsel %vm435_vm13, 1.0, %v3190_v26  ;;  %v476_v21 = vrot.slane %v475_v7, 2  ;;  %vm573_vm6 = vcmask 1045509  }
  0xe1   :  { %v498_v48 = vsel %vm470_vm7, %v2588_v34, 0.0  ;;  %v526_v9 = vsel %vm470_vm7, %v2595_v60, 0.0  ;;  %630 = vmatpush.msra.mxu3 %v602_v47 }
  0xe2   :  { %v500_v57 = vadd.f32 %v499_v53, %v498_v48  ;;  %v527_v18 = vadd.f32 %v526_v9, %v525_v5  ;;  %v477_v33 = vadd.f32 %v476_v21, %v475_v7  ;;  %v487_v48 = vrot.slane %v486_v38, 1 }
  0xe3   :  { %v497_v5 = vadd.f32 %v496_v56, %v495_v45 }
  0xe4   :  { %v501_v8 = vrot.slane %v500_v57, 4  ;;  %v528_v31 = vrot.slane %v527_v18, 4  ;;  %v478_v42 = vrot.slane %v477_v33, 1  ;;  %v488_v59 = vadd.f32 %v487_v48, %v486_v38 }
  0xe6   :  { %v502_v22 = vadd.f32 %v501_v8, %v500_v57  ;;  %v529_v40 = vadd.f32 %v528_v31, %v527_v18  ;;  %v479_v53 = vadd.f32 %v478_v42, %v477_v33  ;;  %v544_v7 = vmul.f32 0.125, %v488_v59  ;;  %v601_v31 = vld [vmem:[#allocation11] sm:$0xff] }
  0xe7   :  { %v421_v30 = vpop.permute.xlu2 %420  ;;  %631 = vmatpush.msra.mxu3 %v601_v31  ;;  %v2740_v33 = vld [vmem:[#allocation12] ss:$0 sm:$0xff]  ;;  %v673_v42 = vld [vmem:[%s4284_s9 + $0x8] sm:$0xff] }
  0xe8   :  { %v503_v34 = vrot.slane %v502_v22, 2  ;;  %vm437_vm0 = vcmp.eq.s32.totalorder %v3353_v2, %v421_v30  ;;  %v530_v51 = vrot.slane %v529_v40, 2  ;;  %v543_v63 = vmul.f32 0.125, %v479_v53 }
  0xea   :  { %v504_v43 = vadd.f32 %v503_v34, %v502_v22  ;;  %v531_v62 = vadd.f32 %v530_v51, %v529_v40  ;;  %v566_v12 = vsel %vm565_vm2, %v544_v7, %v543_v63  ;;  %v675_v40 = vld [vmem:[%s4284_s9 + $0x18] sm:$0xff] }
  0xeb   :  { %691 = vmatpush.msrb.mxu2 %v675_v40  ;;  %v243_v7 = vld [vmem:[%s4303_s0 + $0x18] sm:$0xff] }
  0xec   :  { %v505_v54 = vrot.slane %v504_v43, 1 }
  0xed   :  { %692 = vmatpush.msrb.mxu2 %v674_v41 }
  0xee   :  { %v382_v36 = vpop.permute.xlu1 %381  ;;  %v506_v0 = vadd.f32 %v505_v54, %v504_v43  ;;  %v672_v43 = vld [vmem:[%s4284_s9] sm:$0xff]  ;;  %s2557_s9 = sshll.u32 %s3199_s7, 4  ;;  %s2558_s9 = int_to_ptr.vmem [resolvable:$true] %s2557_s9 }
  0xef   :  { %vm431_vm11 = vcmp.eq.s32.totalorder %v3353_v2, %v382_v36  ;;  %693 = vmatpush.msrb.mxu2 %v673_v42 }
  0xf0   :  { %v2591_v44 = vsel %vm431_vm11, 1.0, %v3190_v26  ;;  %vm637_vm11 = vcmask 261120  }
  0xf1   :  { %v508_v52 = vsel %vm470_vm7, %v2591_v44, 0.0  ;;  %v2597_v44 = vsel %vm437_vm0, 1.0, %v3190_v26  ;;  %694 = vmatpush.msrb.mxu2 %v672_v43 }
  0xf2   :  { %v509_v61 = vadd.f32 %v508_v52, %v507_v55  ;;  %v535_v52 = vsel %vm470_vm7, %v2597_v44, 0.0 }
  0xf4   :  { %v510_v14 = vrot.slane %v509_v61, 4 }
  0xf6   :  { %v395_v4 = vpop.permute.xlu1 %394  ;;  %v511_v25 = vadd.f32 %v510_v14, %v509_v61 }
  0xf7   :  { %vm433_vm15 = vcmp.eq.s32.totalorder %v3353_v2, %v395_v4 }
  0xf8   :  { %v2593_v11 = vsel %vm433_vm15, 1.0, %v3190_v26  ;;  %v512_v36 = vrot.slane %v511_v25, 2 }
  0xf9   :  { %v517_v15 = vsel %vm470_vm7, %v2593_v11, 0.0  ;;  %v532_v11 = vrot.slane %v531_v62, 1 }
  0xfa   :  { %v518_v17 = vadd.f32 %v517_v15, %v516_v13  ;;  %v513_v46 = vadd.f32 %v512_v36, %v511_v25  ;;  %v546_v13 = vmul.f32 0.125, %v506_v0  ;;  %v545_v15 = vmul.f32 0.125, %v497_v5  ;;  %v247_v0 = vld [vmem:[%s4303_s0 + $0x38] sm:$0xff]  ;;  %v245_v5 = vld [vmem:[%s4303_s0 + $0x28] sm:$0xff] }
  0xfb   :  { %v533_v19 = vadd.f32 %v532_v11, %v531_v62  ;;  %264 = vmatpush.msra.mxu0 %v247_v0  ;;  %v240_v11 = vld [vmem:[%s4303_s0] sm:$0xff] }
  0xfc   :  { %v519_v23 = vrot.slane %v518_v17, 4  ;;  %v514_v57 = vrot.slane %v513_v46, 1  ;;  %v568_v20 = vsel %vm567_vm3, %v545_v15, %v566_v12  ;;  %v239_v12 = vld [vmem:[#allocation3] sm:$0xff] }
  0xfd   :  { %v570_v22 = vsel %vm569_vm4, %v546_v13, %v568_v20  ;;  %v549_v27 = vmul.f32 0.125, %v533_v19  ;;  %v282_v19 = vld [vmem:[%s4279_s4 + $0x28] sm:$0xff]  ;;  %v281_v20 = vld [vmem:[%s4279_s4 + $0x20] sm:$0xff] }
  0xfe   :  { %v520_v29 = vadd.f32 %v519_v23, %v518_v17  ;;  %v515_v6 = vadd.f32 %v514_v57, %v513_v46 }
 0x100   :  { %v521_v39 = vrot.slane %v520_v29, 2  ;;  %v547_v16 = vmul.f32 0.125, %v515_v6  ;;  %v244_v6 = vld [vmem:[%s4303_s0 + $0x20] sm:$0xff] }
 0x102   :  { %v522_v49 = vadd.f32 %v521_v39, %v520_v29  ;;  %v572_v23 = vsel %vm571_vm5, %v547_v16, %v570_v22  ;;  %v2741_v22 = vld [vmem:[%s4304_s11] ss:$0 sm:$0xff]  ;;  %s2559_s11 = sshll.u32 %s4294_s19, 4  ;;  %s2560_s11 = int_to_ptr.hbm [resolvable:$true] %s2559_s11 }
 0x104   :  { %v523_v60 = vrot.slane %v522_v49, 1 }
 0x106   :  { %v415_v50 = vpop.permute.xlu1 %414  ;;  %v524_v8 = vadd.f32 %v523_v60, %v522_v49 }
 0x107   :  { %vm436_vm1 = vcmp.eq.s32.totalorder %v3353_v2, %v415_v50 }
 0x108   :  { %v2596_v55 = vsel %vm436_vm1, 1.0, %v3190_v26  ;;  %v548_v18 = vmul.f32 0.125, %v524_v8  ;;  %v242_v8 = vld [vmem:[%s4303_s0 + $0x10] sm:$0xff] }
 0x109   :  { %v534_v58 = vsel %vm470_vm7, %v2596_v55, 0.0 }
 0x10a   :  { %v536_v61 = vadd.f32 %v535_v52, %v534_v58  ;;  %v574_v25 = vsel %vm573_vm6, %v548_v18, %v572_v23  ;;  %v283_v18 = vld [vmem:[%s4279_s4 + $0x30] sm:$0xff] }
 0x10b   :  { %v576_v29 = vsel %vm575_vm8, %v549_v27, %v574_v25  ;;  %v279_v23 = vld [vmem:[%s4279_s4 + $0x10] sm:$0xff]  ;;  %v278_v27 = vld [vmem:[%s4279_s4 + $0x8] sm:$0xff] }
 0x10c   :  { %v537_v4 = vrot.slane %v536_v61, 4 }
 0x10e   :  { %v538_v9 = vadd.f32 %v537_v4, %v536_v61  ;;  %v246_v4 = vld [vmem:[%s4303_s0 + $0x30] sm:$0xff] }
 0x10f   :  { %265 = vmatpush.msra.mxu0 %v246_v4 }
 0x110   :  { %v539_v14 = vrot.slane %v538_v9, 2 }
 0x111   :  { %266 = vmatpush.msra.mxu0 %v245_v5 }
 0x112   :  { %v540_v17 = vadd.f32 %v539_v14, %v538_v9  ;;  %v241_v9 = vld [vmem:[%s4303_s0 + $0x8] sm:$0xff] }
 0x113   :  { %267 = vmatpush.msra.mxu0 %v244_v6 }
 0x114   :  { %v541_v21 = vrot.slane %v540_v17, 1 }
 0x115   :  { %268 = vmatpush.msra.mxu0 %v243_v7 }
 0x116   :  { %v542_v24 = vadd.f32 %v541_v21, %v540_v17  ;;  %v284_v17 = vld [vmem:[%s4279_s4 + $0x38] sm:$0xff] }
 0x117   :  { %269 = vmatpush.msra.mxu0 %v242_v8  ;;  %300 = vmatpush.msra.mxu1 %v284_v17  ;;  %v280_v21 = vld [vmem:[%s4279_s4 + $0x18] sm:$0xff] }
 0x118   :  { %v550_v28 = vmul.f32 0.125, %v542_v24 }
 0x119   :  { %270 = vmatpush.msra.mxu0 %v241_v9  ;;  %301 = vmatpush.msra.mxu1 %v283_v18 }
 0x11a   :  { %v578_v30 = vsel %vm577_vm9, %v550_v28, %v576_v29  ;;  %v277_v29 = vld [vmem:[%s4279_s4] sm:$0xff]  ;;  %s3192_s4 = smov 126  }
 0x11b   :  { %2598 = vmatmul.msk.f32.vlgmr.msra.gmra.mxu2 %vm470_vm7, %v578_v30  ;;  %271 = vmatpush.msra.mxu0 %v240_v11  ;;  %v708_v30 = vstv %s4285_s10  ;;  %s3193_s10 = smov 127  }
 0x11c   :  { %2580 = vmatmul.msk.f32.vlgmr.msra.gmra.mxu0 %vm4296_vm10, %v239_v12  ;;  %302 = vmatpush.msra.mxu1 %v282_v19 }
 0x11e   :  { %303 = vmatpush.msra.mxu1 %v281_v20 }
 0x120   :  { %304 = vmatpush.msra.mxu1 %v280_v21 }
 0x122   :  { %305 = vmatpush.msra.mxu1 %v279_v23 }
 0x124   :  { %306 = vmatpush.msra.mxu1 %v278_v27 }
 0x126   :  { %307 = vmatpush.msra.mxu1 %v277_v29 }
 0x199   :  { %v273_v24 = vpop.f32.mrf.mxu0 }
 0x19a   :  { %v274_v25 = vadd.f32 %v2741_v22, %v273_v24 }
 0x19c   :  { %v276_v28 = vmax.f32 %v274_v25, 0.0 }
 0x19e   :  { %v598_v32 = vpop.f32.mrf.mxu2  ;;  %2581 = vmatmul.msk.f32.vlgmr.msra.gmra.mxu1 %vm4296_vm10, %v276_v28 }
 0x19f   :  { %2599 = vmatmul.msk.f32.vlgmr.msra.gmra.mxu3 %vm4296_vm10, %v598_v32 }
 0x222   :  { %v633_v34 = vpop.f32.mrf.mxu3 }
 0x223   :  { %v634_v35 = vadd.f32 %v2740_v33, %v633_v34  ;;  %v739_v34 = vld [vmem:[#allocation14 + $0x8] sm:$0xff] }
 0x224   :  { %2602 = vmatpush.xpose.msk.msrb.mxu0 %vm637_vm11, %v739_v34  ;;  %1192 = vmatpush.msrb.mxu1 %v739_v34 }
 0x225   :  { %v636_v36 = vmul.f32 %v634_v35, %v634_v35 }
 0x227   :  { %654 = vrot.lane.b32.xlu2 %v636_v36, %s3191_s15  ;;  %v638_v37 = vsel %vm637_vm11, %v636_v36, 0.0 }
 0x228   :  { %639 = vadd.xlane.f32.xlu1 %v638_v37 }
 0x281   :  { %v655_v38 = vpop.permute.xlu2 %654 }
 0x282   :  { %v657_v39 = vsel %vm637_vm11, %v655_v38, 0.0 }
 0x283   :  { %658 = vadd.xlane.f32.xlu0 %v657_v39 }
 0x29b   :  { %v640_v44 = vpop.xlane.xlu1 %639 }
 0x29c   :  { %v641_v45 = vadd.f32 1e-12, %v640_v44 }
 0x29e   :  { %2745 = vrsqrt.f32 %v641_v45  ;;  %vm648_vm12 = vweird.f32 %v641_v45 }
 0x2a4   :  { %v2746_v46 = vpop.eup %2745 }
 0x2a5   :  { %v643_v47 = vmul.f32 %v2746_v46, %v641_v45  ;;  %vm649_vm7 = vweird.f32 %v2746_v46 }
 0x2a6   :  { %vm650_vm13 = vmor %vm648_vm12, %vm649_vm7 }
 0x2a7   :  { %v644_v48 = vmul.f32 %v2746_v46, %v643_v47 }
 0x2a9   :  { %v645_v49 = vmul.f32 0.5, %v644_v48 }
 0x2ab   :  { %v646_v50 = vsub.f32 1.5, %v645_v49  ;;  %v738_v49 = vld [vmem:[#allocation14] sm:$0xff] }
 0x2ac   :  { %2603 = vmatpush.xpose.msk.msrb.mxu0 %vm637_vm11, %v738_v49  ;;  %1193 = vmatpush.msrb.mxu1 %v738_v49 }
 0x2ad   :  { %v647_v51 = vmul.f32 %v2746_v46, %v646_v50  ;;  %v741_v50 = vmul.f32 %v739_v34, %v739_v34 }
 0x2af   :  { %v651_v52 = vsel %vm650_vm13, %v2746_v46, %v647_v51  ;;  %v740_v51 = vmul.f32 %v738_v49, %v738_v49 }
 0x2b0   :  { %v3446_v53 = vmul.f32 %v651_v52, %v634_v35  ;;  %v745_v52 = vsel %vm637_vm11, %v741_v50, 0.0 }
 0x2b2   :  { %2600 = vmatmul.msk.f32.vlgmr.msrb.gmra.mxu2 %vm637_vm11, %v3446_v53 }
 0x2f6   :  { %v659_v54 = vpop.xlane.xlu0 %658 }
 0x2f7   :  { %v660_v55 = vadd.f32 1e-12, %v659_v54  ;;  %v742_v54 = vsel %vm637_vm11, %v740_v51, 0.0 }
 0x2f8   :  { %743 = vadd.xlane.f32.xlu0 %v742_v54 }
 0x2f9   :  { %2747 = vrsqrt.f32 %v660_v55  ;;  %vm667_vm15 = vweird.f32 %v660_v55 }
 0x2ff   :  { %v2748_v56 = vpop.eup %2747 }
 0x300   :  { %v662_v57 = vmul.f32 %v2748_v56, %v660_v55  ;;  %vm668_vm14 = vweird.f32 %v2748_v56  ;;  %v2742_v55 = vld [vmem:[#allocation8] ss:$0 sm:$0xff] }
 0x301   :  { %vm669_vm0 = vmor %vm667_vm15, %vm668_vm14  ;;  %vm982_vm14 = vcmask 130112   ;;  %vm1013_vm15 = vcmask 130048  }
 0x302   :  { %v663_v58 = vmul.f32 %v2748_v56, %v662_v57 }
 0x304   :  { %v664_v59 = vmul.f32 0.5, %v663_v58 }
 0x306   :  { %v665_v60 = vsub.f32 1.5, %v664_v59 }
 0x308   :  { %v666_v61 = vmul.f32 %v2748_v56, %v665_v60 }
 0x30a   :  { %v670_v62 = vsel %vm669_vm0, %v2748_v56, %v666_v61  ;;  %v309_v56 = vpop.f32.mrf.mxu1 }
 0x30b   :  { %v3450_v63 = vmul.f32 %v670_v62, %v634_v35  ;;  %v3518_v58 = vadd.f32 %v2742_v55, %v309_v56 }
 0x30d   :  { %700 = vrot.lane.b32.xlu2 %v3450_v63, %s3191_s15 }
 0x335   :  { %v696_v13 = vpop.f32.mrf.mxu2 }
 0x367   :  { %v701_v14 = vpop.permute.xlu2 %700 }
 0x368   :  { %v703_v15 = vmul.f32 %v701_v14, %v696_v13 }
 0x36a   :  { %v704_v16 = vsel %vm637_vm11, %v703_v15, 0.0 }
 0x36b   :  { %705 = vadd.xlane.f32.xlu2 %v704_v16  ;;  %v744_v14 = vpop.xlane.xlu0 %743 }
 0x373   :  { %746 = vadd.xlane.f32.xlu2 %v745_v52 }
 0x3de   :  { %v706_v31 = vpop.xlane.xlu2 %705 }
 0x3df   :  { %v709_v32 = vadd.f32 %v708_v30, %v706_v31 }
 0x3e1   :  { %v2601_v33 = vmul.f32 -1.442695, %v709_v32 }
 0x3e3   :  { %2749 = vpow2.f32 %v2601_v33 }
 0x3e6   :  { %v747_v11 = vpop.xlane.xlu2 %746 }
 0x3e9   :  { %v2750_v35 = vpop.eup %2749 }
 0x3ea   :  { %v713_v36 = vadd.f32 1.0, %v2750_v35 }
 0x3ec   :  { %2751 = vrcp.f32 %v713_v36  ;;  %v725_v40 = vand.u32 2147483648, %v713_v36  ;;  %v723_v42 = vand.u32 2147483647, %v713_v36  ;;  %vm719_vm7 = vweird.f32 %v713_v36 }
 0x3ee   :  { %v726_v44 = vor.u32 1.1754944e-38, %v725_v40  ;;  %vm724_vm13 = vcmp.eq.f32.partialorder %v723_v42, 8.507059e+37 }
 0x3f2   :  { %v2752_v37 = vpop.eup %2751 }
 0x3f3   :  { %v715_v38 = vmul.f32 %v2752_v37, %v713_v36  ;;  %vm720_vm1 = vweird.f32 %v2752_v37 }
 0x3f4   :  { %vm721_vm12 = vmor %vm719_vm7, %vm720_vm1 }
 0x3f5   :  { %v716_v39 = vsub.f32 1.0, %v715_v38 }
 0x3f7   :  { %v717_v41 = vmul.f32 %v2752_v37, %v716_v39 }
 0x3f9   :  { %v718_v43 = vadd.f32 %v2752_v37, %v717_v41 }
 0x3fb   :  { %v722_v45 = vsel %vm721_vm12, %v2752_v37, %v718_v43 }
 0x3fc   :  { %v727_v46 = vsel %vm724_vm13, %v726_v44, %v722_v45 }
 0x3fd   :  { %v730_v47 = vsub.f32 1.0, %v727_v46  ;;  %2527 = vst [vmem:[#allocation23 + $0x8] sm:$0xff] %v727_v46  ;;  %v729_v57 = vmul.f32 %v727_v46, %v3446_v53 }
 0x3ff   :  { %v731_v48 = vmul.f32 %v730_v47, %v3450_v63 }
 0x401   :  { %733 = vrot.lane.b32.xlu1 %v731_v48, %s3191_s15 }
 0x473   :  { %v734_v59 = vpop.permute.xlu1 %733 }
 0x474   :  { %v3520_v60 = vadd.f32 %v734_v59, %v729_v57  ;;  %v3593_v57 = vadd.s32 4294967288, %v3353_v2 }
 0x476   :  { %v3524_v61 = vadd.f32 %v3520_v60, %v3518_v58 }
 0x478   :  { %2604 = vmatmul.msk.f32.vlgmr.msrb.gmra.mxu0 %vm637_vm11, %v3524_v61 }
 0x4f5   :  { %v774_v62 = vpop.f32.mrf.mxu0 }
 0x4f6   :  { %v777_v63 = vmul.f32 2.0, %v774_v62 }
 0x4f8   :  { %v792_v0 = vperm.slane %v777_v63, 1  ;;  %v779_v4 = vperm.slane %v777_v63, 0  ;;  %v805_v53 = vperm.slane %v777_v63, 2  ;;  %v831_v5 = vperm.slane %v777_v63, 4 }
 0x4f9   :  { %v818_v6 = vperm.slane %v777_v63, 3  ;;  %v844_v7 = vperm.slane %v777_v63, 5  ;;  %v857_v8 = vperm.slane %v777_v63, 6  ;;  %v870_v9 = vperm.slane %v777_v63, 7 }
 0x4fa   :  { %797 = vperm.xlu1 %2668, %v792_v0   ;;  %790 = vperm.xlu2 %2669, %v779_v4  }
 0x4fb   :  { %784 = vperm.xlu0 %2670, %v779_v4  }
 0x502   :  { %2671 = vset.pattern.permute.xlu1 %v3361_v10  ;;  %816 = vperm.xlu2 %2669, %v805_v53  }
 0x503   :  { %836 = vperm.xlu0 %2670, %v831_v5  }
 0x50a   :  { %803 = vperm.xlu1 %2671, %v792_v0   ;;  %829 = vperm.xlu2 %2669, %v818_v6  }
 0x50b   :  { %2675 = vset.pattern.permute.xlu0 %v3361_v10 }
 0x512   :  { %2672 = vset.pattern.permute.xlu1 %v3351_v1  ;;  %2674 = vset.pattern.permute.xlu2 %v3351_v1 }
 0x513   :  { %855 = vperm.xlu0 %2675, %v844_v7  }
 0x51a   :  { %810 = vperm.xlu1 %2672, %v805_v53   ;;  %849 = vperm.xlu2 %2674, %v844_v7  }
 0x51b   :  { %2678 = vset.pattern.permute.xlu0 %v3189_v3 }
 0x522   :  { %823 = vperm.xlu1 %2672, %v818_v6   ;;  %2677 = vset.pattern.permute.xlu2 %v3361_v10 }
 0x52a   :  { %2673 = vset.pattern.permute.xlu1 %v3361_v10  ;;  %868 = vperm.xlu2 %2677, %v857_v8  }
 0x532   :  { %842 = vperm.xlu1 %2673, %v831_v5   ;;  %881 = vperm.xlu2 %2677, %v870_v9  }
 0x53a   :  { %2676 = vset.pattern.permute.xlu1 %v3351_v1  ;;  %2680 = vset.pattern.permute.xlu2 %v3189_v3 }
 0x542   :  { %862 = vperm.xlu1 %2676, %v857_v8  }
 0x54a   :  { %875 = vperm.xlu1 %2676, %v870_v9  }
 0x552   :  { %2679 = vset.pattern.permute.xlu1 %v3189_v3 }
 0x554   :  { %v791_v12 = vpop.permute.xlu2 %790 }
 0x555   :  { %v3538_v13 = vsub.f32 %v747_v11, %v791_v12 }
 0x557   :  { %935 = vperm.xlu1 %2679, %v3538_v13  }
 0x55c   :  { %v817_v19 = vpop.permute.xlu2 %816 }
 0x55d   :  { %v3547_v20 = vsub.f32 %v747_v11, %v817_v19 }
 0x564   :  { %v830_v30 = vpop.permute.xlu2 %829 }
 0x565   :  { %v3562_v32 = vsub.f32 %v747_v11, %v830_v30 }
 0x56c   :  { %v798_v15 = vpop.permute.xlu1 %797 }
 0x56d   :  { %v3541_v16 = vsub.f32 %v744_v14, %v798_v15  ;;  %v785_v17 = vpop.permute.xlu0 %784 }
 0x56e   :  { %v3543_v18 = vsub.f32 %v744_v14, %v785_v17 }
 0x56f   :  { %938 = vperm.xlu2 %2680, %v3541_v16  }
 0x570   :  { %932 = vperm.xlu0 %2678, %v3543_v18  }
 0x574   :  { %v850_v34 = vpop.permute.xlu2 %849 }
 0x575   :  { %v837_v21 = vpop.permute.xlu0 %836  ;;  %v3568_v35 = vsub.f32 %v744_v14, %v850_v34 }
 0x576   :  { %v3552_v24 = vsub.f32 %v744_v14, %v837_v21 }
 0x578   :  { %947 = vperm.xlu0 %2678, %v3547_v20  }
 0x57c   :  { %v804_v22 = vpop.permute.xlu1 %803 }
 0x57d   :  { %v3550_v23 = vsub.f32 %v747_v11, %v804_v22 }
 0x57f   :  { %941 = vperm.xlu1 %2679, %v3550_v23  }
 0x580   :  { %956 = vperm.xlu0 %2678, %v3552_v24  }
 0x584   :  { %v869_v36 = vpop.permute.xlu2 %868 }
 0x585   :  { %v856_v25 = vpop.permute.xlu0 %855  ;;  %v3571_v38 = vsub.f32 %v747_v11, %v869_v36 }
 0x586   :  { %v3556_v27 = vsub.f32 %v747_v11, %v856_v25 }
 0x588   :  { %965 = vperm.xlu0 %2678, %v3556_v27  }
 0x58c   :  { %v811_v28 = vpop.permute.xlu1 %810  ;;  %v882_v42 = vpop.permute.xlu2 %881 }
 0x58d   :  { %v3559_v29 = vsub.f32 %v744_v14, %v811_v28  ;;  %v3580_v44 = vsub.f32 %v747_v11, %v882_v42 }
 0x58f   :  { %944 = vperm.xlu2 %2680, %v3559_v29  }
 0x594   :  { %v824_v31 = vpop.permute.xlu1 %823 }
 0x595   :  { %v3564_v33 = vsub.f32 %v744_v14, %v824_v31 }
 0x597   :  { %950 = vperm.xlu1 %2679, %v3564_v33   ;;  %953 = vperm.xlu2 %2680, %v3562_v32  }
 0x59f   :  { %962 = vperm.xlu2 %2680, %v3568_v35  }
 0x5a4   :  { %v843_v37 = vpop.permute.xlu1 %842 }
 0x5a5   :  { %v3573_v39 = vsub.f32 %v747_v11, %v843_v37 }
 0x5a7   :  { %959 = vperm.xlu1 %2679, %v3573_v39   ;;  %971 = vperm.xlu2 %2680, %v3571_v38  }
 0x5b4   :  { %v863_v40 = vpop.permute.xlu1 %862 }
 0x5b5   :  { %v3577_v41 = vsub.f32 %v744_v14, %v863_v40 }
 0x5b7   :  { %968 = vperm.xlu1 %2679, %v3577_v41  }
 0x5bc   :  { %v876_v43 = vpop.permute.xlu1 %875 }
 0x5bd   :  { %v3582_v45 = vsub.f32 %v744_v14, %v876_v43 }
 0x5bf   :  { %977 = vperm.xlu1 %2679, %v3580_v44   ;;  %974 = vperm.xlu0 %2678, %v3582_v45  }
 0x5c7   :  { %2682 = vset.pattern.permute.xlu1 %v3361_v10  ;;  %2681 = vset.pattern.permute.xlu0 %v3351_v1 }
 0x5c9   :  { %v939_v46 = vpop.permute.xlu2 %938  ;;  %v936_v47 = vpop.permute.xlu1 %935 }
 0x5ca   :  { %v984_v63 = vperm.slane %v939_v46, %v3353_v2  ;;  %v981_v4 = vperm.slane %v936_v47, %v3593_v57 }
 0x5cf   :  { %1060 = vperm.xlu1 %2682, %v3353_v2   ;;  %1054 = vperm.xlu0 %2681, %v3353_v2  }
 0x5d7   :  { %2683 = vset.pattern.permute.xlu1 %v3189_v3  ;;  %2684 = vset.pattern.permute.xlu0 %v3189_v3 }
 0x5e2   :  { %v933_v48 = vpop.permute.xlu0 %932 }
 0x5e3   :  { %v979_v0 = vperm.slane %v933_v48, %v3353_v2 }
 0x5e5   :  { %v983_v12 = vsel %vm982_vm14, %v981_v4, %v979_v0 }
 0x5e9   :  { %v945_v49 = vpop.permute.xlu2 %944 }
 0x5ea   :  { %v948_v51 = vpop.permute.xlu0 %947  ;;  %v987_v6 = vperm.slane %v945_v49, %v3353_v2 }
 0x5eb   :  { %v988_v7 = vperm.slane %v948_v51, %v3593_v57 }
 0x5ed   :  { %v989_v22 = vsel %vm982_vm14, %v988_v7, %v987_v6 }
 0x5f1   :  { %v942_v50 = vpop.permute.xlu1 %941  ;;  %v954_v52 = vpop.permute.xlu2 %953 }
 0x5f2   :  { %v957_v55 = vpop.permute.xlu0 %956  ;;  %v985_v62 = vperm.slane %v942_v50, %v3593_v57  ;;  %v991_v14 = vperm.slane %v954_v52, %v3593_v57 }
 0x5f3   :  { %v993_v17 = vperm.slane %v957_v55, %v3353_v2 }
 0x5f4   :  { %v986_v53 = vsel %vm982_vm14, %v985_v62, %v984_v63 }
 0x5f5   :  { %v1005_v15 = vsel %vm565_vm2, %v986_v53, %v983_v12 }
 0x5f6   :  { %v1006_v34 = vsel %vm567_vm3, %v989_v22, %v1005_v15 }
 0x5f9   :  { %v963_v59 = vpop.permute.xlu2 %962 }
 0x5fa   :  { %v966_v8 = vpop.permute.xlu0 %965  ;;  %v996_v30 = vperm.slane %v963_v59, %v3353_v2 }
 0x5fb   :  { %v997_v31 = vperm.slane %v966_v8, %v3593_v57 }
 0x5fd   :  { %v998_v47 = vsel %vm982_vm14, %v997_v31, %v996_v30 }
 0x601   :  { %v972_v19 = vpop.permute.xlu2 %971 }
 0x602   :  { %v1000_v36 = vperm.slane %v972_v19, %v3593_v57 }
 0x609   :  { %v951_v54 = vpop.permute.xlu1 %950 }
 0x60a   :  { %v990_v5 = vperm.slane %v951_v54, %v3353_v2 }
 0x60c   :  { %v992_v21 = vsel %vm982_vm14, %v991_v14, %v990_v5 }
 0x60d   :  { %v1007_v37 = vsel %vm569_vm4, %v992_v21, %v1006_v34 }
 0x619   :  { %v960_v56 = vpop.permute.xlu1 %959 }
 0x61a   :  { %v994_v9 = vperm.slane %v960_v56, %v3593_v57 }
 0x61c   :  { %v995_v25 = vsel %vm982_vm14, %v994_v9, %v993_v17 }
 0x61d   :  { %v1008_v40 = vsel %vm571_vm5, %v995_v25, %v1007_v37 }
 0x61e   :  { %v1009_v50 = vsel %vm573_vm6, %v998_v47, %v1008_v40 }
 0x629   :  { %v969_v11 = vpop.permute.xlu1 %968 }
 0x62a   :  { %v999_v28 = vperm.slane %v969_v11, %v3353_v2 }
 0x62c   :  { %v1001_v42 = vsel %vm982_vm14, %v1000_v36, %v999_v28 }
 0x62d   :  { %v1010_v52 = vsel %vm575_vm8, %v1001_v42, %v1009_v50 }
 0x631   :  { %v978_v43 = vpop.permute.xlu1 %977  ;;  %v975_v46 = vpop.permute.xlu0 %974 }
 0x632   :  { %v1003_v48 = vperm.slane %v978_v43, %v3593_v57  ;;  %v1002_v49 = vperm.slane %v975_v46, %v3353_v2 }
 0x634   :  { %v1004_v51 = vsel %vm982_vm14, %v1003_v48, %v1002_v49 }
 0x635   :  { %v1011_v54 = vsel %vm577_vm9, %v1004_v51, %v1010_v52 }
 0x636   :  { %v1014_v55 = vsel %vm1013_vm15, %v1011_v54, inf }
 0x637   :  { %1015 = vmin.xlane.f32.xlu2 %v1014_v55 }
 0x641   :  { %v1061_v59 = vpop.permute.xlu1 %1060  ;;  %v1055_v62 = vpop.permute.xlu0 %1054 }
 0x6aa   :  { %v1016_v56 = vpop.xlane.xlu2 %1015 }
 0x6ab   :  { %v1021_v63 = vperm.slane %v1016_v56, 3  ;;  %v1018_v0 = vperm.slane %v1016_v56, 0  ;;  %v1025_v6 = vperm.slane %v1016_v56, 7  ;;  %v1020_v7 = vperm.slane %v1016_v56, 2 }
 0x6ac   :  { %v1019_v8 = vperm.slane %v1016_v56, 1  ;;  %v1022_v12 = vperm.slane %v1016_v56, 4  ;;  %v1024_v14 = vperm.slane %v1016_v56, 6 }
 0x6ad   :  { %vm1041_vm0 = vcmp.le.f32.partialorder %v3562_v32, %v1021_v63  ;;  %vm1035_vm1 = vcmp.le.f32.partialorder %v3538_v13, %v1018_v0  ;;  %vm1034_vm7 = vcmp.le.f32.partialorder %v3543_v18, %v1018_v0  ;;  %vm1048_vm12 = vcmp.le.f32.partialorder %v3582_v45, %v1025_v6 }
 0x6ae   :  { %v1069_v4 = vsel %vm1041_vm0, %v1061_v59, 16  ;;  %v1063_v53 = vsel %vm1035_vm1, %v1061_v59, 16  ;;  %v1062_v5 = vsel %vm1034_vm7, %v1055_v62, 16  ;;  %vm1038_vm13 = vcmp.le.f32.partialorder %v3559_v29, %v1020_v7 }
 0x6af   :  { %1100 = vperm.xlu2 %2680, %v1069_v4   ;;  %1082 = vperm.xlu0 %2684, %v1063_v53   ;;  %vm1036_vm10 = vcmp.le.f32.partialorder %v3541_v16, %v1019_v8  ;;  %v1076_v32 = vsel %vm1048_vm12, %v1055_v62, 16  ;;  %v1066_v9 = vsel %vm1038_vm13, %v1055_v62, 16  ;;  %vm1040_vm0 = vcmp.le.f32.partialorder %v3564_v33, %v1021_v63 }
 0x6b0   :  { %1079 = vperm.xlu1 %2683, %v1062_v5   ;;  %v1064_v13 = vsel %vm1036_vm10, %v1055_v62, 16  ;;  %vm1037_vm1 = vcmp.le.f32.partialorder %v3550_v23, %v1019_v8  ;;  %v1068_v18 = vsel %vm1040_vm0, %v1055_v62, 16  ;;  %vm1043_vm7 = vcmp.le.f32.partialorder %v3573_v39, %v1022_v12 }
 0x6b1   :  { %v1065_v11 = vsel %vm1037_vm1, %v1061_v59, 16  ;;  %vm1039_vm12 = vcmp.le.f32.partialorder %v3547_v20, %v1020_v7  ;;  %v1071_v16 = vsel %vm1043_vm7, %v1061_v59, 16  ;;  %v1023_v45 = vperm.slane %v1016_v56, 5 }
 0x6b2   :  { %v1067_v29 = vsel %vm1039_vm12, %v1061_v59, 16  ;;  %vm1042_vm13 = vcmp.le.f32.partialorder %v3552_v24, %v1022_v12  ;;  %vm1047_vm0 = vcmp.le.f32.partialorder %v3571_v38, %v1024_v14  ;;  %vm1046_vm7 = vcmp.le.f32.partialorder %v3577_v41, %v1024_v14 }
 0x6b3   :  { %vm1045_vm10 = vcmp.le.f32.partialorder %v3556_v27, %v1023_v45  ;;  %v1070_v33 = vsel %vm1042_vm13, %v1055_v62, 16  ;;  %vm1044_vm1 = vcmp.le.f32.partialorder %v3568_v35, %v1023_v45  ;;  %v1075_v39 = vsel %vm1047_vm0, %v1061_v59, 16  ;;  %v2817_v27 = vld [vmem:[#allocation6] sm:$0xff] }
 0x6b4   :  { %v1073_v23 = vsel %vm1045_vm10, %v1061_v59, 16  ;;  %v1072_v20 = vsel %vm1044_vm1, %v1055_v62, 16  ;;  %v1074_v15 = vsel %vm1046_vm7, %v1055_v62, 16  ;;  %vm1049_vm12 = vcmp.le.f32.partialorder %v3580_v44, %v1025_v6 }
 0x6b5   :  { %v1077_v24 = vsel %vm1049_vm12, %v1061_v59, 16  ;;  %vm1883_vm13 = vcmask 56320   ;;  %vm1659_vm7 = vcmask 1047556  }
 0x6b7   :  { %1121 = vperm.xlu2 %2680, %v1076_v32   ;;  %1091 = vperm.xlu0 %2684, %v1066_v9  }
 0x6b8   :  { %1085 = vperm.xlu1 %2683, %v1064_v13  }
 0x6bf   :  { %1097 = vperm.xlu0 %2684, %v1068_v18   ;;  %2687 = vset.pattern.permute.xlu2 %v3351_v1 }
 0x6c0   :  { %1088 = vperm.xlu1 %2683, %v1065_v11  }
 0x6c7   :  { %1106 = vperm.xlu0 %2684, %v1071_v16  }
 0x6c8   :  { %1094 = vperm.xlu1 %2683, %v1067_v29  }
 0x6cf   :  { %1112 = vperm.xlu0 %2684, %v1073_v23  }
 0x6d0   :  { %1103 = vperm.xlu1 %2683, %v1070_v33  }
 0x6d7   :  { %1118 = vperm.xlu0 %2684, %v1075_v39  }
 0x6d8   :  { %1109 = vperm.xlu1 %2683, %v1072_v20  }
 0x6df   :  { %2686 = vset.pattern.permute.xlu0 %v3361_v10 }
 0x6e0   :  { %1115 = vperm.xlu1 %2683, %v1074_v15  }
 0x6e8   :  { %1124 = vperm.xlu1 %2683, %v1077_v24  }
 0x6f0   :  { %1881 = vrot.lane.b32.xlu1 %v2817_v27, %s3192_s4 }
 0x6f1   :  { %2685 = vset.pattern.permute.xlu1 %v3351_v1 }
 0x709   :  { %v1101_v34 = vpop.permute.xlu2 %1100 }
 0x70a   :  { %v1136_v62 = vperm.slane %v1101_v34, %v3593_v57 }
 0x711   :  { %v1122_v4 = vpop.permute.xlu2 %1121 }
 0x712   :  { %v1147_v13 = vperm.slane %v1122_v4, %v3353_v2  ;;  %v1293_v4 = vld [vmem:[#allocation21 + $0x78] sm:$0xff] }
 0x721   :  { %v1083_v38 = vpop.permute.xlu0 %1082 }
 0x722   :  { %v1080_v35 = vpop.permute.xlu1 %1079  ;;  %v1127_v40 = vperm.slane %v1083_v38, %v3593_v57 }
 0x723   :  { %v1126_v37 = vperm.slane %v1080_v35, %v3353_v2 }
 0x725   :  { %v1128_v50 = vsel %vm982_vm14, %v1127_v40, %v1126_v37 }
 0x729   :  { %v1092_v19 = vpop.permute.xlu0 %1091 }
 0x72a   :  { %v1086_v17 = vpop.permute.xlu1 %1085  ;;  %v1132_v43 = vperm.slane %v1092_v19, %v3353_v2 }
 0x72b   :  { %v1129_v42 = vperm.slane %v1086_v17, %v3353_v2 }
 0x731   :  { %v1098_v22 = vpop.permute.xlu0 %1097 }
 0x732   :  { %v1089_v21 = vpop.permute.xlu1 %1088  ;;  %v1135_v51 = vperm.slane %v1098_v22, %v3353_v2 }
 0x733   :  { %v1130_v44 = vperm.slane %v1089_v21, %v3593_v57 }
 0x734   :  { %v1137_v6 = vsel %vm982_vm14, %v1136_v62, %v1135_v51  ;;  %v1307_v51 = vld [vmem:[#allocation21 + $0xe8] sm:$0xff] }
 0x735   :  { %v1131_v47 = vsel %vm982_vm14, %v1130_v44, %v1129_v42 }
 0x736   :  { %v1150_v55 = vsel %vm565_vm2, %v1131_v47, %v1128_v50  ;;  %v1320_v47 = vld [vmem:[#allocation21 + $0x150] sm:$0xff]  ;;  %v1306_v50 = vld [vmem:[#allocation21 + $0xe0] sm:$0xff] }
 0x737   :  { %1378 = vmatpush.msra.mxu0 %v1320_v47  ;;  %v1301_v47 = vld [vmem:[#allocation21 + $0xb8] sm:$0xff] }
 0x739   :  { %v1107_v25 = vpop.permute.xlu0 %1106  ;;  %1379 = vmatpush.msra.mxu0 %v1306_v50  ;;  %v1287_v50 = vld [vmem:[#allocation21 + $0x48] sm:$0xff] }
 0x73a   :  { %v1095_v41 = vpop.permute.xlu1 %1094  ;;  %v1139_v56 = vperm.slane %v1107_v25, %v3593_v57 }
 0x73b   :  { %v1133_v36 = vperm.slane %v1095_v41, %v3593_v57 }
 0x73d   :  { %v1134_v48 = vsel %vm982_vm14, %v1133_v36, %v1132_v43 }
 0x73e   :  { %v1151_v63 = vsel %vm567_vm3, %v1134_v48, %v1150_v55  ;;  %v1321_v48 = vld [vmem:[#allocation21 + $0x158] sm:$0xff] }
 0x73f   :  { %v1152_v8 = vsel %vm569_vm4, %v1137_v6, %v1151_v63  ;;  %1398 = vmatpush.msra.mxu1 %v1321_v48  ;;  %v1279_v6 = vld [vmem:[#allocation21 + $0x8] sm:$0xff] }
 0x740   :  { %v1303_v48 = vld [vmem:[#allocation21 + $0xc8] sm:$0xff] }
 0x741   :  { %v1113_v31 = vpop.permute.xlu0 %1112  ;;  %1399 = vmatpush.msra.mxu1 %v1307_v51  ;;  %v1289_v51 = vld [vmem:[#allocation21 + $0x58] sm:$0xff] }
 0x742   :  { %v1104_v28 = vpop.permute.xlu1 %1103  ;;  %v1142_v0 = vperm.slane %v1113_v31, %v3593_v57 }
 0x743   :  { %v1138_v49 = vperm.slane %v1104_v28, %v3353_v2  ;;  %1400 = vmatpush.msra.mxu1 %v1293_v4 }
 0x745   :  { %v1140_v53 = vsel %vm982_vm14, %v1139_v56, %v1138_v49  ;;  %v1213_v49 = vld [vmem:[#allocation15 + $0x10] sm:$0xff]  ;;  %1401 = vmatpush.msra.mxu1 %v1279_v6 }
 0x746   :  { %v1153_v18 = vsel %vm571_vm5, %v1140_v53, %v1152_v8  ;;  %v1211_v53 = vld [vmem:[#allocation15] sm:$0xff]  ;;  %v1323_v8 = vld [vmem:[#allocation21 + $0x168] sm:$0xff] }
 0x749   :  { %v1119_v54 = vpop.permute.xlu0 %1118 }
 0x74a   :  { %v1110_v30 = vpop.permute.xlu1 %1109  ;;  %v1145_v5 = vperm.slane %v1119_v54, %v3593_v57 }
 0x74b   :  { %v1141_v52 = vperm.slane %v1110_v30, %v3353_v2 }
 0x74d   :  { %v1143_v7 = vsel %vm982_vm14, %v1142_v0, %v1141_v52  ;;  %v1212_v52 = vld [vmem:[#allocation15 + $0x8] sm:$0xff]  ;;  %v1292_v0 = vld [vmem:[#allocation21 + $0x70] sm:$0xff] }
 0x74e   :  { %v1154_v12 = vsel %vm573_vm6, %v1143_v7, %v1153_v18  ;;  %1380 = vmatpush.msra.mxu0 %v1292_v0  ;;  %v1322_v7 = vld [vmem:[#allocation21 + $0x160] sm:$0xff]  ;;  %v1291_v0 = vld [vmem:[#allocation21 + $0x68] sm:$0xff] }
 0x74f   :  { %v1310_v18 = vld [vmem:[#allocation21 + $0x100] sm:$0xff] }
 0x752   :  { %v1116_v46 = vpop.permute.xlu1 %1115 }
 0x753   :  { %v1144_v59 = vperm.slane %v1116_v46, %v3353_v2  ;;  %v1214_v46 = vld [vmem:[#allocation15 + $0x18] sm:$0xff] }
 0x754   :  { %1234 = vmatpush.msrb.mxu3 %v1214_v46  ;;  %v1318_v46 = vld [vmem:[#allocation21 + $0x140] sm:$0xff] }
 0x755   :  { %v1146_v32 = vsel %vm982_vm14, %v1145_v5, %v1144_v59  ;;  %v1278_v5 = vld [vmem:[#allocation21] sm:$0xff] }
 0x756   :  { %v1155_v29 = vsel %vm575_vm8, %v1146_v32, %v1154_v12  ;;  %1235 = vmatpush.msrb.mxu3 %v1213_v49  ;;  %1381 = vmatpush.msra.mxu0 %v1278_v5  ;;  %v1324_v32 = vld [vmem:[#allocation21 + $0x170] sm:$0xff]  ;;  %v1295_v12 = vld [vmem:[#allocation21 + $0x88] sm:$0xff] }
 0x757   :  { %v1304_v49 = vld [vmem:[#allocation21 + $0xd0] sm:$0xff] }
 0x758   :  { %1236 = vmatpush.msrb.mxu3 %v1212_v52  ;;  %1438 = vmatpush.msrb.mxu0 %v1323_v8  ;;  %v1290_v52 = vld [vmem:[#allocation21 + $0x60] sm:$0xff] }
 0x75a   :  { %v1125_v9 = vpop.permute.xlu1 %1124  ;;  %1237 = vmatpush.msrb.mxu3 %v1211_v53 }
 0x75b   :  { %v1148_v11 = vperm.slane %v1125_v9, %v3593_v57  ;;  %v1308_v9 = vld [vmem:[#allocation21 + $0xf0] sm:$0xff] }
 0x75c   :  { %1418 = vmatpush.msra.mxu3 %v1322_v7 }
 0x75d   :  { %v1149_v16 = vsel %vm982_vm14, %v1148_v11, %v1147_v13  ;;  %v1309_v13 = vld [vmem:[#allocation21 + $0xf8] sm:$0xff]  ;;  %v1294_v11 = vld [vmem:[#allocation21 + $0x80] sm:$0xff] }
 0x75e   :  { %v1156_v45 = vsel %vm577_vm9, %v1149_v16, %v1155_v29  ;;  %1419 = vmatpush.msra.mxu3 %v1308_v9  ;;  %1439 = vmatpush.msrb.mxu0 %v1309_v13  ;;  %v1296_v16 = vld [vmem:[#allocation21 + $0x90] sm:$0xff] }
 0x75f   :  { %v1157_v23 = vsel %vm1013_vm15, %v1156_v45, 2147483647  ;;  %v1280_v29 = vld [vmem:[#allocation21 + $0x10] sm:$0xff]  ;;  %v1281_v45 = vld [vmem:[#allocation21 + $0x18] sm:$0xff] }
 0x760   :  { %v1159_v33 = vshra.s32 %v1157_v23, 16  ;;  %v1158_v39 = vand.u32 65535, %v1157_v23  ;;  %1420 = vmatpush.msra.mxu3 %v1294_v11  ;;  %1440 = vmatpush.msrb.mxu0 %v1295_v12  ;;  %v1282_v23 = vld [vmem:[#allocation21 + $0x20] sm:$0xff]  ;;  %v1250_v13 = vld [vmem:[#allocation18 + $0x38] sm:$0xff] }
 0x761   :  { %1266 = vmatpush.msra.mxu2 %v1250_v13  ;;  %v1248_v11 = vld [vmem:[#allocation18 + $0x28] sm:$0xff]  ;;  %v1246_v12 = vld [vmem:[#allocation18 + $0x18] sm:$0xff] }
 0x762   :  { %v1161_v14 = vcvt.s32.f32 %v1159_v33  ;;  %v1160_v15 = vcvt.s32.f32 %v1158_v39  ;;  %v1882_v35 = vpop.permute.xlu1 %1881  ;;  %1421 = vmatpush.msra.mxu3 %v1280_v29  ;;  %1441 = vmatpush.msrb.mxu0 %v1281_v45 }
 0x764   :  { %1162 = vmin.xlane.f32.xlu0 %v1161_v14 }
 0x778   :  { %1879 = vrot.lane.b32.xlu0 %v2817_v27, %s3193_s10 }
 0x7d7   :  { %v1163_v20 = vpop.xlane.xlu0 %1162 }
 0x7d8   :  { %vm1164_vm10 = vcmp.eq.f32.partialorder %v1161_v14, %v1163_v20  ;;  %v1169_v25 = vcvt.f32.s32 %v1163_v20  ;;  %v1325_v20 = vld [vmem:[#allocation21 + $0x178] sm:$0xff] }
 0x7d9   :  { %v1165_v24 = vsel %vm1164_vm10, %v1160_v15, inf  ;;  %v1327_v15 = vld [vmem:[#allocation21 + $0x188] sm:$0xff] }
 0x7da   :  { %1166 = vmin.xlane.f32.xlu2 %v1165_v24  ;;  %v1170_v31 = vshll.u32 %v1169_v25, 16  ;;  %v1328_v24 = vld [vmem:[#allocation21 + $0x190] sm:$0xff]  ;;  %v1283_v25 = vld [vmem:[#allocation21 + $0x28] sm:$0xff] }
 0x7ea   :  { %v1880_v38 = vpop.permute.xlu0 %1879 }
 0x7eb   :  { %v3678_v17 = vsel %vm1883_vm13, %v1880_v38, %v1882_v35  ;;  %v1311_v38 = vld [vmem:[#allocation21 + $0x108] sm:$0xff] }
 0x7ec   :  { %v2062_v19 = vperm.slane %v3678_v17, 0  ;;  %v2075_v21 = vperm.slane %v3678_v17, 1  ;;  %v2088_v27 = vperm.slane %v3678_v17, 2  ;;  %v2140_v22 = vperm.slane %v3678_v17, 6 }
 0x7ed   :  { %v2101_v41 = vperm.slane %v3678_v17, 3  ;;  %v2127_v28 = vperm.slane %v3678_v17, 5  ;;  %v2153_v37 = vperm.slane %v3678_v17, 7  ;;  %vm2254_vm1 = vcmp.ne.s32.totalorder %v3678_v17, 0 }
 0x7ee   :  { %2067 = vperm.xlu1 %2685, %v2062_v19   ;;  %2073 = vperm.xlu0 %2686, %v2062_v19   ;;  %v3700_v40 = vsel %vm2254_vm1, 1.0, %v3190_v26  ;;  %v1313_v19 = vld [vmem:[#allocation21 + $0x118] sm:$0xff]  ;;  %v2114_v5 = vperm.slane %v3678_v17, 4  ;;  %v1245_v17 = vld [vmem:[#allocation18 + $0x10] sm:$0xff] }
 0x7ef   :  { %v2258_v42 = vperm.slane %v3700_v40, 0  ;;  %v2271_v43 = vperm.slane %v3700_v40, 1  ;;  %v2310_v54 = vperm.slane %v3700_v40, 4  ;;  %v2323_v55 = vperm.slane %v3700_v40, 5 }
 0x7f0   :  { %v2336_v59 = vperm.slane %v3700_v40, 6  ;;  %v2349_v62 = vperm.slane %v3700_v40, 7  ;;  %v2284_v29 = vperm.slane %v3700_v40, 2  ;;  %v2297_v45 = vperm.slane %v3700_v40, 3 }
 0x7f1   :  { %v3710_v56 = vpack.i.bf16 %v2323_v55, %v2310_v54  ;;  %v1333_v54 = vld [vmem:[#allocation21 + $0x1b8] sm:$0xff]  ;;  %v1319_v55 = vld [vmem:[#allocation21 + $0x148] sm:$0xff] }
 0x7f2   :  { %2080 = vperm.xlu2 %2687, %v2075_v21   ;;  %v3716_v63 = vpack.i.bf16 %v2349_v62, %v2336_v59  ;;  %v1305_v62 = vld [vmem:[#allocation21 + $0xd8] sm:$0xff] }
 0x7f6   :  { %2688 = vset.pattern.permute.xlu1 %v3361_v10  ;;  %2151 = vperm.xlu0 %2686, %v2140_v22  }
 0x7fa   :  { %2093 = vperm.xlu2 %2687, %v2088_v27  }
 0x7fe   :  { %2086 = vperm.xlu1 %2688, %v2075_v21   ;;  %v1314_v21 = vld [vmem:[#allocation21 + $0x120] sm:$0xff] }
 0x802   :  { %2106 = vperm.xlu2 %2687, %v2101_v41  }
 0x806   :  { %2099 = vperm.xlu1 %2688, %v2088_v27  }
 0x80a   :  { %2689 = vset.pattern.permute.xlu2 %v3361_v10 }
 0x80e   :  { %2112 = vperm.xlu1 %2688, %v2101_v41   ;;  %v1300_v41 = vld [vmem:[#allocation21 + $0xb0] sm:$0xff] }
 0x812   :  { %2125 = vperm.xlu2 %2689, %v2114_v5  }
 0x816   :  { %2690 = vset.pattern.permute.xlu1 %v3351_v1 }
 0x81a   :  { %2138 = vperm.xlu2 %2689, %v2127_v28  }
 0x81e   :  { %2132 = vperm.xlu1 %2690, %v2127_v28   ;;  %v1247_v28 = vld [vmem:[#allocation18 + $0x20] sm:$0xff] }
 0x822   :  { %2691 = vset.pattern.permute.xlu2 %v3351_v1 }
 0x826   :  { %2145 = vperm.xlu1 %2690, %v2140_v22   ;;  %v1299_v22 = vld [vmem:[#allocation21 + $0xa8] sm:$0xff] }
 0x82a   :  { %2158 = vperm.xlu2 %2691, %v2153_v37  }
 0x82e   :  { %2692 = vset.pattern.permute.xlu1 %v3361_v10 }
 0x836   :  { %2164 = vperm.xlu1 %2692, %v2153_v37   ;;  %v1244_v37 = vld [vmem:[#allocation18 + $0x8] sm:$0xff] }
 0x83e   :  { %2693 = vset.pattern.permute.xlu1 %v3351_v1 }
 0x84d   :  { %v1167_v30 = vpop.xlane.xlu2 %1166 }
 0x84e   :  { %v1168_v34 = vcvt.f32.s32 %v1167_v30  ;;  %v1285_v30 = vld [vmem:[#allocation21 + $0x38] sm:$0xff] }
 0x850   :  { %v1171_v44 = vadd.s32 %v1170_v31, %v1168_v34  ;;  %v1286_v31 = vld [vmem:[#allocation21 + $0x40] sm:$0xff]  ;;  %v1329_v34 = vld [vmem:[#allocation21 + $0x198] sm:$0xff] }
 0x852   :  { %vm1172_vm0 = vcmp.eq.s32.totalorder %v3353_v2, %v1171_v44  ;;  %v1331_v44 = vld [vmem:[#allocation21 + $0x1a8] sm:$0xff] }
 0x853   :  { %v2605_v36 = vsel %vm1172_vm0, 1.0, %v3190_v26  ;;  %v3705_v26 = vpack.i.bf16 %v2271_v43, %v2258_v42  ;;  %v1315_v42 = vld [vmem:[#allocation21 + $0x128] sm:$0xff]  ;;  %v1317_v43 = vld [vmem:[#allocation21 + $0x138] sm:$0xff] }
 0x854   :  { %2606 = vmatmul.msk.f32.vlgmr.msrb.gmra.mxu1 %vm1013_vm15, %v2605_v36  ;;  %v1332_v36 = vld [vmem:[#allocation21 + $0x1b0] sm:$0xff]  ;;  %vm4305_vm15 = vcmask 523264  }
 0x855   :  { %2695 = vperm.xlu1 %2693, %v3705_v26   ;;  %1458 = vmatpush.msrb.mxu1 %v1324_v32  ;;  %vm4306_vm12 = vmmov %vm4305_vm15 }
 0x856   :  { %2700 = vperm.xlu0 %2686, %v3705_v26   ;;  %v1298_v26 = vld [vmem:[#allocation21 + $0xa0] sm:$0xff] }
 0x857   :  { %1459 = vmatpush.msrb.mxu1 %v1310_v18  ;;  %v1249_v18 = vld [vmem:[#allocation18 + $0x30] sm:$0xff] }
 0x858   :  { %1267 = vmatpush.msra.mxu2 %v1249_v18 }
 0x859   :  { %1460 = vmatpush.msrb.mxu1 %v1296_v16 }
 0x85a   :  { %1268 = vmatpush.msra.mxu2 %v1248_v11 }
 0x85b   :  { %1461 = vmatpush.msrb.mxu1 %v1282_v23 }
 0x85c   :  { %1269 = vmatpush.msra.mxu2 %v1247_v28 }
 0x85d   :  { %2716 = vperm.xlu1 %2693, %v3710_v56  }
 0x85e   :  { %1270 = vmatpush.msra.mxu2 %v1246_v12 }
 0x860   :  { %v3747_v59 = vpop.permute.xlu1 %2067  ;;  %1271 = vmatpush.msra.mxu2 %v1245_v17 }
 0x862   :  { %1272 = vmatpush.msra.mxu2 %v1244_v37  ;;  %v2744_v37 = vld [vmem:[#allocation20] ss:$0 sm:$0xff] }
 0x865   :  { %2731 = vset.pattern.permute.xlu1 %v3361_v10 }
 0x86d   :  { %2733 = vperm.xlu1 %2731, %v3716_v63  }
 0x870   :  { %v3755_v4 = vpop.permute.xlu1 %2086 }
 0x875   :  { %2739 = vset.pattern.permute.xlu1 %v3189_v3 }
 0x878   :  { %v3759_v53 = vpop.permute.xlu1 %2099 }
 0x880   :  { %v3762_v6 = vpop.permute.xlu1 %2112 }
 0x890   :  { %v3766_v7 = vpop.permute.xlu1 %2132 }
 0x891   :  { %vm2176_vm10 = vcmp.eq.s32.totalorder %v3353_v2, %v3766_v7 }
 0x898   :  { %v3771_v8 = vpop.permute.xlu1 %2145 }
 0x8a8   :  { %v3773_v32 = vpop.permute.xlu1 %2164 }
 0x8c7   :  { %v3775_v9 = vpop.permute.xlu1 %2695 }
 0x8cf   :  { %v3777_v16 = vpop.permute.xlu1 %2716 }
 0x8d1   :  { %v3720_v33 = vpop.f32.mrf.mxu1 }
 0x8d2   :  { %v3724_v14 = vadd.f32 %v3720_v33, %v3518_v58  ;;  %v1198_v39 = vsub.f32 %v3720_v33, %v3524_v61  ;;  %v1297_v61 = vld [vmem:[#allocation21 + $0x98] sm:$0xff] }
 0x8d4   :  { %2607 = vmatmul.msk.f32.vlgmr.msrb.gmra.mxu3 %vm637_vm11, %v3724_v14  ;;  %2609 = vmatmul.msk.f32.vlgmr.msra.gmra.mxu0 %vm637_vm11, %v3724_v14  ;;  %v1199_v35 = vmul.f32 %v1198_v39, %v1198_v39  ;;  %v1243_v39 = vld [vmem:[#allocation18] sm:$0xff] }
 0x8d5   :  { %2610 = vmatmul.msk.f32.vlgmr.msra.gmra.mxu1 %vm637_vm11, %v3724_v14  ;;  %1478 = vmatpush.msrb.mxu3 %v1325_v20  ;;  %v2709_v20 = vpack.i.bf16 %v2297_v45, %v2284_v29 }
 0x8d6   :  { %v1200_v27 = vsel %vm637_vm11, %v1199_v35, 0.0  ;;  %1518 = vmatpush.msra.mxu0 %v1327_v15  ;;  %1538 = vmatpush.msra.mxu1 %v1328_v24  ;;  %v1326_v15 = vld [vmem:[#allocation21 + $0x180] sm:$0xff]  ;;  %v1312_v24 = vld [vmem:[#allocation21 + $0x110] sm:$0xff] }
 0x8d7   :  { %1201 = vadd.xlane.f32.xlu1 %v1200_v27  ;;  %1479 = vmatpush.msrb.mxu3 %v1311_v38  ;;  %v1284_v35 = vld [vmem:[#allocation21 + $0x30] sm:$0xff] }
 0x8d8   :  { %1519 = vmatpush.msra.mxu0 %v1313_v19  ;;  %1539 = vmatpush.msra.mxu1 %v1314_v21 }
 0x8d9   :  { %1480 = vmatpush.msrb.mxu3 %v1297_v61  ;;  %1273 = vmatpush.msra.mxu2 %v1243_v39 }
 0x8da   :  { %1520 = vmatpush.msra.mxu0 %v1299_v22  ;;  %1540 = vmatpush.msra.mxu1 %v1300_v41  ;;  %v2743_v41 = vld [vmem:[#allocation17] ss:$0 sm:$0xff] }
 0x8db   :  { %1481 = vmatpush.msrb.mxu3 %v1283_v25  ;;  %1498 = vmatpush.msrb.mxu2 %v1326_v15 }
 0x8dc   :  { %2611 = vmatmul.msk.f32.vlgmr.msra.gmra.mxu3 %vm637_vm11, %v3724_v14  ;;  %2612 = vmatmul.msk.f32.vlgmr.msrb.gmra.mxu0 %vm637_vm11, %v3724_v14 }
 0x8dd   :  { %2613 = vmatmul.msk.f32.vlgmr.msrb.gmra.mxu1 %vm637_vm11, %v3724_v14  ;;  %1521 = vmatpush.msra.mxu0 %v1285_v30 }
 0x8de   :  { %1541 = vmatpush.msra.mxu1 %v1286_v31  ;;  %1558 = vmatpush.msra.mxu3 %v1329_v34 }
 0x8df   :  { %1598 = vmatpush.msrb.mxu0 %v1331_v44  ;;  %v3782_v23 = vpop.permute.xlu1 %2733  ;;  %2710 = vperm.xlu0 %2686, %v2709_v20   ;;  %v1330_v44 = vld [vmem:[#allocation21 + $0x1a0] sm:$0xff] }
 0x8e0   :  { %1618 = vmatpush.msrb.mxu1 %v1332_v36  ;;  %1559 = vmatpush.msra.mxu3 %v1315_v42  ;;  %v1302_v36 = vld [vmem:[#allocation21 + $0xc0] sm:$0xff]  ;;  %v3798_v42 = vld [vmem:[%s4292_s17] sm:$0xff] }
 0x8e1   :  { %1599 = vmatpush.msrb.mxu0 %v1317_v43  ;;  %1499 = vmatpush.msrb.mxu2 %v1312_v24  ;;  %v1341_v43 = vperm.slane %v3798_v42, 3  ;;  %v1345_v12 = vperm.slane %v3798_v42, 7 }
 0x8e2   :  { %1619 = vmatpush.msrb.mxu1 %v1318_v46  ;;  %1560 = vmatpush.msra.mxu3 %v1301_v47  ;;  %v1339_v47 = vperm.slane %v3798_v42, 1 }
 0x8e3   :  { %1600 = vmatpush.msrb.mxu0 %v1303_v48  ;;  %1500 = vmatpush.msrb.mxu2 %v1298_v26  ;;  %v1338_v48 = vperm.slane %v3798_v42, 0  ;;  %v1342_v26 = vperm.slane %v3798_v42, 4 }
 0x8e4   :  { %1620 = vmatpush.msrb.mxu1 %v1304_v49  ;;  %2614 = vmatmul.msk.f32.vlgmr.msrb.gmra.mxu3 %vm637_vm11, %v3724_v14  ;;  %v1340_v49 = vperm.slane %v3798_v42, 2 }
 0x8e5   :  { %2616 = vmatmul.msk.f32.vlgmr.msra.gmra.mxu0 %vm637_vm11, %v3724_v14  ;;  %2617 = vmatmul.msk.f32.vlgmr.msra.gmra.mxu1 %vm637_vm11, %v3724_v14 }
 0x8e6   :  { %1561 = vmatpush.msra.mxu3 %v1287_v50  ;;  %1601 = vmatpush.msrb.mxu0 %v1289_v51  ;;  %v3804_v50 = vpop.permute.xlu2 %2080 }
 0x8e7   :  { %1621 = vmatpush.msrb.mxu1 %v1290_v52  ;;  %1501 = vmatpush.msrb.mxu2 %v1284_v35  ;;  %vm2168_vm13 = vcmp.eq.s32.totalorder %v3353_v2, %v3804_v50 }
 0x8e8   :  { %1638 = vmatpush.msrb.mxu3 %v1333_v54  ;;  %2705 = vperm.xlu2 %2691, %v2709_v20   ;;  %v1343_v54 = vperm.slane %v3798_v42, 5 }
 0x8e9   :  { %2714 = vset.pattern.permute.xlu0 %v3351_v1  ;;  %v1316_v1 = vld [vmem:[#allocation21 + $0x130] sm:$0xff] }
 0x8ea   :  { %1639 = vmatpush.msrb.mxu3 %v1319_v55  ;;  %v3807_v55 = vpop.permute.xlu0 %2073 }
 0x8ec   :  { %1640 = vmatpush.msrb.mxu3 %v1305_v62  ;;  %v3194_v62 = vmov 1983009808  }
 0x8ed   :  { %2618 = vmatmul.msk.f32.vlgmr.msra.gmra.mxu3 %vm637_vm11, %v3724_v14  ;;  %2620 = vmatmul.msk.f32.vlgmr.msrb.gmra.mxu0 %vm637_vm11, %v3724_v14 }
 0x8ee   :  { %2621 = vmatmul.msk.f32.vlgmr.msrb.gmra.mxu1 %vm637_vm11, %v3724_v14  ;;  %1641 = vmatpush.msrb.mxu3 %v1291_v0  ;;  %v1664_v0 = vunpack.c.l.s4 %v3194_v62 }
 0x8f0   :  { %2720 = vset.pattern.permute.xlu2 %v3361_v10  ;;  %v1288_v10 = vld [vmem:[#allocation21 + $0x50] sm:$0xff]  ;;  %v3810_v29 = vunpack.c.0.s8 %v1664_v0 }
 0x8f1   :  { %2119 = vperm.xlu0 %2714, %v2114_v5  }
 0x8f5   :  { %2622 = vmatmul.msk.f32.vlgmr.msrb.gmra.mxu3 %vm637_vm11, %v3724_v14 }
 0x8f8   :  { %2722 = vperm.xlu2 %2720, %v3710_v56  }
 0x8f9   :  { %2727 = vperm.xlu0 %2714, %v3716_v63  }
 0x900   :  { %2737 = vset.pattern.permute.xlu2 %v3189_v3 }
 0x901   :  { %2738 = vset.pattern.permute.xlu0 %v3189_v3 }
 0x94a   :  { %v1202_v38 = vpop.xlane.xlu1 %1201 }
 0x94b   :  { %v1203_v19 = vrot.slane %v1202_v38, 4 }
 0x94d   :  { %v1204_v21 = vadd.f32 %v1203_v19, %v1202_v38 }
 0x94f   :  { %v1205_v27 = vrot.slane %v1204_v21, 2 }
 0x951   :  { %v1206_v61 = vadd.f32 %v1205_v27, %v1204_v21  ;;  %v1383_v56 = vpop.f32.mrf.mxu0 }
 0x952   :  { %v1403_v3 = vpop.f32.mrf.mxu1  ;;  %v1384_v13 = vadd.f32 %v1383_v56, %v1338_v48 }
 0x953   :  { %v1207_v22 = vrot.slane %v1206_v61, 1  ;;  %v1404_v52 = vadd.f32 %v1403_v3, %v1339_v47 }
 0x954   :  { %v1661_v39 = vrot.slane %v1384_v13, 4 }
 0x955   :  { %v1208_v25 = vadd.f32 %v1207_v22, %v1206_v61  ;;  %v1673_v28 = vrot.slane %v1404_v52, 4  ;;  %v3816_v61 = vpop.permute.xlu2 %2093 }
 0x956   :  { %vm2170_vm1 = vcmp.eq.s32.totalorder %v3353_v2, %v3816_v61 }
 0x957   :  { %2624 = vpush %v1208_v25  ;;  %v1239_v30 = vpop.f32.mrf.mxu3 }
 0x958   :  { %v1240_v31 = vadd.f32 %v2743_v41, %v1239_v30  ;;  %v3195_v30 = vmov 1934713408  }
 0x959   :  { %v1443_v46 = vpop.f32.mrf.mxu0 }
 0x95a   :  { %v1242_v34 = vmax.f32 %v1240_v31, 0.0  ;;  %v1444_v51 = vadd.f32 %v1443_v46, %v1341_v43  ;;  %v1463_v38 = vpop.f32.mrf.mxu1  ;;  %v1712_v31 = vunpack.c.l.s4 %v3195_v30  ;;  %v1344_v46 = vperm.slane %v3798_v42, 6 }
 0x95c   :  { %2608 = vmatmul.msk.f32.vlgmr.msra.gmra.mxu2 %vm4305_vm15, %v1242_v34  ;;  %v1671_v11 = vrot.slane %v1444_v51, 4  ;;  %v1674_v20 = vsel %vm1659_vm7, %v1444_v51, %v1673_v28  ;;  %v3820_v34 = vpop.permute.xlu0 %2151  ;;  %v3832_v51 = vunpack.c.0.s8 %v1712_v31 }
 0x95d   :  { %1578 = vmatpush.msra.mxu2 %v1330_v44  ;;  %v1682_v41 = vperm.slane %v1674_v20, %v3810_v29  ;;  %v2818_v44 = vld [vmem:[#allocation3] sm:$0xff] }
 0x95e   :  { %v1672_v24 = vsel %vm1659_vm7, %v1671_v11, %v1404_v52 }
 0x95f   :  { %1579 = vmatpush.msra.mxu2 %v1316_v1  ;;  %v1423_v63 = vpop.f32.mrf.mxu3  ;;  %v1719_v3 = vrot.slane %v1682_v41, 4 }
 0x960   :  { %v1424_v18 = vadd.f32 %v1423_v63, %v1340_v49 }
 0x961   :  { %1580 = vmatpush.msra.mxu2 %v1302_v36  ;;  %v3823_v36 = vperm.slane %v1672_v24, %v3810_v29  ;;  %v1335_v24 = vld [vmem:[%s4292_s17 + $0x8] sm:$0x3f]  ;;  %s3196_s17 = smov 32  }
 0x962   :  { %v1523_v45 = vpop.f32.mrf.mxu0  ;;  %v1658_v15 = vrot.slane %v1424_v18, 4  ;;  %v1662_v19 = vsel %vm1659_vm7, %v1424_v18, %v1661_v39  ;;  %v1351_v7 = vperm.slane %v1335_v24, 5 }
 0x963   :  { %1581 = vmatpush.msra.mxu2 %v1288_v10  ;;  %v1524_v21 = vadd.f32 %v1523_v45, %v1345_v12  ;;  %v1464_v10 = vadd.f32 %v1463_v38, %v1342_v26  ;;  %v1670_v56 = vperm.slane %v1662_v19, %v3810_v29  ;;  %v3841_v12 = vpop.permute.xlu2 %2106 }
 0x964   :  { %2615 = vmatmul.msk.f32.vlgmr.msrb.gmra.mxu2 %vm637_vm11, %v3724_v14  ;;  %v1660_v25 = vsel %vm1659_vm7, %v1658_v15, %v1384_v13  ;;  %v3849_v26 = vpop.permute.xlu0 %2700 }
 0x965   :  { %v1695_v63 = vrot.slane %v1524_v21, 4  ;;  %v3829_v48 = vperm.slane %v1660_v25, %v3810_v29  ;;  %v1685_v42 = vrot.slane %v1464_v10, 4  ;;  %v1721_v15 = vrot.slane %v1670_v56, 4 }
 0x967   :  { %v1483_v5 = vpop.f32.mrf.mxu3 }
 0x968   :  { %v1484_v17 = vadd.f32 %v1483_v5, %v1343_v54  ;;  %v1707_v54 = vrot.slane %v3823_v36, 4  ;;  %v1720_v5 = vsel %vm1659_vm7, %v1719_v3, %v1670_v56 }
 0x969   :  { %v1726_v45 = vperm.slane %v1720_v5, %v3832_v51 }
 0x96a   :  { %v1697_v27 = vrot.slane %v1484_v17, 4  ;;  %v1696_v49 = vsel %vm1659_vm7, %v1695_v63, %v1484_v17  ;;  %v1708_v28 = vsel %vm1659_vm7, %v1707_v54, %v3829_v48 }
 0x96b   :  { %v1702_v18 = vperm.slane %v1696_v49, %v3810_v29  ;;  %v3853_v38 = vperm.slane %v1708_v28, %v3832_v51  ;;  %v1765_v31 = vrot.slane %v1726_v45, 4 }
 0x96c   :  { %2619 = vmatmul.msk.f32.vlgmr.msra.gmra.mxu2 %vm637_vm11, %v3724_v14  ;;  %v1698_v43 = vsel %vm1659_vm7, %v1524_v21, %v1697_v27  ;;  %v1347_v21 = vperm.slane %v1335_v24, 1 }
 0x96d   :  { %v1706_v62 = vperm.slane %v1698_v43, %v3810_v29  ;;  %v1731_v19 = vrot.slane %v1702_v18, 4  ;;  %v1757_v63 = vrot.slane %v3853_v38, 4  ;;  %v1722_v43 = vsel %vm1659_vm7, %v1682_v41, %v1721_v15  ;;  %v3885_v15 = vpop.permute.xlu0 %2710 }
 0x96e   :  { %v3877_v41 = vperm.slane %v1722_v43, %v3832_v51 }
 0x96f   :  { %v1743_v39 = vrot.slane %v1706_v62, 4 }
 0x970   :  { %v1563_v11 = vpop.f32.mrf.mxu3 }
 0x978   :  { %v1643_v5 = vpop.f32.mrf.mxu3 }
 0x988   :  { %s2625_s18 = spop %2624 }
 0x9df   :  { %v1275_v35 = vpop.f32.mrf.mxu2 }
 0x9e0   :  { %v1276_v22 = vadd.f32 %v2744_v37, %v1275_v35 }
 0x9e2   :  { %v1646_v1 = vsub.f32 %v1276_v22, %v2818_v44  ;;  %v1543_v44 = vpop.f32.mrf.mxu1 }
 0x9e4   :  { %v1647_v47 = vmul.f32 %v1646_v1, %v1646_v1 }
 0x9e6   :  { %v1648_v52 = vsel %vm4306_vm12, %v1647_v47, 0.0  ;;  %v3867_v47 = vadd.f32 %v1563_v11, %v1347_v21  ;;  %v1348_v11 = vperm.slane %v1335_v24, 2  ;;  %vm2166_vm12 = vcmp.eq.s32.totalorder %v3353_v2, %v3747_v59 }
 0x9e7   :  { %v1503_v0 = vpop.f32.mrf.mxu2  ;;  %1649 = vadd.xlane.f32.xlu2 %v1648_v52 }
 0x9e8   :  { %v1504_v13 = vadd.f32 %v1503_v0, %v1344_v46  ;;  %v1346_v46 = vperm.slane %v1335_v24, 0  ;;  %v1349_v0 = vperm.slane %v1335_v24, 3 }
 0x9ea   :  { %v1683_v17 = vrot.slane %v1504_v13, 4  ;;  %v1686_v37 = vsel %vm1659_vm7, %v1504_v13, %v1685_v42  ;;  %v1603_v42 = vpop.f32.mrf.mxu0  ;;  %v3879_v13 = vpop.permute.xlu2 %2125 }
 0x9eb   :  { %v1694_v20 = vperm.slane %v1686_v37, %v3810_v29  ;;  %v1604_v21 = vadd.f32 %v1603_v42, %v1349_v0 }
 0x9ec   :  { %v1684_v35 = vsel %vm1659_vm7, %v1683_v17, %v1464_v10  ;;  %v1785_v17 = vrot.slane %v3867_v47, 4 }
 0x9ed   :  { %v1690_v27 = vperm.slane %v1684_v35, %v3810_v29  ;;  %v1744_v22 = vsel %vm1659_vm7, %v1743_v39, %v1694_v20  ;;  %v1745_v25 = vrot.slane %v1694_v20, 4  ;;  %v1544_v20 = vadd.f32 %v1543_v44, %v1346_v46 }
 0x9ee   :  { %v1750_v30 = vperm.slane %v1744_v22, %v3832_v51  ;;  %v1350_v22 = vperm.slane %v1335_v24, 4  ;;  %v1783_v42 = vrot.slane %v1604_v21, 4 }
 0x9ef   :  { %v1732_v1 = vsel %vm1659_vm7, %v1731_v19, %v1690_v27  ;;  %v1733_v49 = vrot.slane %v1690_v27, 4  ;;  %v1746_v54 = vsel %vm1659_vm7, %v1706_v62, %v1745_v25  ;;  %v1583_v37 = vpop.f32.mrf.mxu2  ;;  %v1644_v62 = vadd.f32 %v1643_v5, %v1351_v7 }
 0x9f0   :  { %v3862_v10 = vsel %vm1659_vm7, %v1750_v30, %v1765_v31  ;;  %v1738_v56 = vperm.slane %v1732_v1, %v3832_v51  ;;  %v1763_v28 = vrot.slane %v1750_v30, 4  ;;  %v3883_v39 = vperm.slane %v1746_v54, %v3832_v51  ;;  %v1623_v31 = vpop.f32.mrf.mxu1 }
 0x9f1   :  { %1911 = vmax.xlane.f32.xlu2 %v3862_v10  ;;  %v2192_v3 = vsel %vm2176_vm10, %v3862_v10, 0.0  ;;  %v1734_v35 = vsel %vm1659_vm7, %v1702_v18, %v1733_v49  ;;  %v1709_v19 = vrot.slane %v3829_v48, 4  ;;  %v1769_v27 = vrot.slane %v3877_v41, 4 }
 0x9f2   :  { %2223 = vadd.xlane.f32.xlu1 %v2192_v3  ;;  %v3872_v52 = vsel %vm1659_vm7, %v1738_v56, %v1757_v63  ;;  %v1584_v25 = vadd.f32 %v1583_v37, %v1348_v11  ;;  %v3891_v30 = vsel %vm1659_vm7, %v1763_v28, %v1726_v45  ;;  %v1786_v1 = vsel %vm1659_vm7, %v1604_v21, %v1785_v17  ;;  %v3911_v54 = vpop.permute.xlu2 %2138  ;;  %v2120_v28 = vpop.permute.xlu0 %2119 }
 0x9f3   :  { %1891 = vmax.xlane.f32.xlu0 %v3872_v52  ;;  %v3899_v18 = vsel %vm1659_vm7, %v3883_v39, %v1769_v27  ;;  %v1742_v48 = vperm.slane %v1734_v35, %v3832_v51  ;;  %v1773_v44 = vrot.slane %v1544_v20, 4  ;;  %v1805_v24 = vrot.slane %v1644_v62, 4 }
 0x9f4   :  { %v2184_v45 = vsel %vm2168_vm13, %v3872_v52, 0.0  ;;  %v1710_v63 = vsel %vm1659_vm7, %v3823_v36, %v1709_v19  ;;  %v1624_v43 = vadd.f32 %v1623_v31, %v1350_v22  ;;  %v3907_v50 = vperm.slane %v1786_v1, %v3810_v29 }
 0x9f5   :  { %v1774_v46 = vsel %vm1659_vm7, %v1584_v25, %v1773_v44  ;;  %v1755_v3 = vrot.slane %v1738_v56, 4  ;;  %v1759_v7 = vrot.slane %v1742_v48, 4  ;;  %v1806_v49 = vsel %vm1659_vm7, 0.0, %v1805_v24 }
 0x9f6   :  { %v3914_v0 = vperm.slane %v1774_v46, %v3810_v29  ;;  %v1718_v5 = vperm.slane %v1710_v63, %v3832_v51  ;;  %v1795_v11 = vrot.slane %v1624_v43, 4  ;;  %v1827_v36 = vrot.slane %v3907_v50, 4 }
 0x9f7   :  { %v3920_v17 = vsel %vm1659_vm7, %v1755_v3, %v3853_v38  ;;  %v1814_v56 = vperm.slane %v1806_v49, %v3810_v29  ;;  %vm2174_vm0 = vcmp.eq.s32.totalorder %v3353_v2, %v2120_v28  ;;  %v1771_v37 = vrot.slane %v1584_v25, 4 }
 0x9f8   :  { %v3926_v35 = vsel %vm1659_vm7, %v1759_v7, %v1718_v5  ;;  %v3929_v19 = vperm.slane %v1644_v62, %v3810_v29  ;;  %v2190_v21 = vsel %vm2174_vm0, %v3891_v30, 0.0  ;;  %v1784_v38 = vsel %vm1659_vm7, %v1783_v42, %v3867_v47 }
 0x9f9   :  { %1906 = vmax.xlane.f32.xlu2 %v3891_v30  ;;  %v1828_v27 = vsel %vm1659_vm7, %v1827_v36, %v3914_v0  ;;  %v1796_v22 = vsel %vm1659_vm7, 0.0, %v1795_v11  ;;  %v1851_v25 = vrot.slane %v1814_v56, 4  ;;  %v1772_v31 = vsel %vm1659_vm7, %v1771_v37, %v1544_v20 }
 0x9fa   :  { %1921 = vmax.xlane.f32.xlu1 %v3899_v18  ;;  %v1790_v1 = vperm.slane %v1784_v38, %v3810_v29  ;;  %v1839_v62 = vrot.slane %v3929_v19, 4  ;;  %v1761_v44 = vrot.slane %v1718_v5, 4  ;;  %v1834_v24 = vperm.slane %v1828_v27, %v3832_v51  ;;  %v2159_v63 = vpop.permute.xlu2 %2158 }
 0x9fb   :  { %2203 = vadd.xlane.f32.xlu0 %v2184_v45  ;;  %v1804_v45 = vperm.slane %v1796_v22, %v3810_v29  ;;  %v1800_v47 = vperm.slane %v1624_v43, %v3810_v29  ;;  %v1778_v46 = vperm.slane %v1772_v31, %v3810_v29  ;;  %vm2180_vm15 = vcmp.eq.s32.totalorder %v3353_v2, %v2159_v63 }
 0x9fc   :  { %v3948_v3 = vsel %vm1659_vm7, %v1742_v48, %v1761_v44  ;;  %v2186_v20 = vsel %vm2170_vm1, %v3926_v35, 0.0  ;;  %v1815_v49 = vrot.slane %v1790_v1, 4  ;;  %v2196_v61 = vsel %vm2180_vm15, %v3899_v18, 0.0 }
 0x9fd   :  { %v1852_v7 = vsel %vm1659_vm7, %v1851_v25, %v1804_v45  ;;  %v1840_v43 = vsel %vm1659_vm7, %v1839_v62, %v1800_v47  ;;  %v1873_v5 = vrot.slane %v1834_v24, 4  ;;  %v1767_v36 = vrot.slane %v3883_v39, 4 }
 0x9fe   :  { %v1858_v29 = vperm.slane %v1852_v7, %v3832_v51  ;;  %v1816_v48 = vsel %vm1659_vm7, %v1815_v49, %v1778_v46  ;;  %v3959_v42 = vperm.slane %v1840_v43, %v3832_v51  ;;  %v1853_v37 = vrot.slane %v1804_v45, 4 }
 0x9ff   :  { %v3968_v28 = vperm.slane %v1816_v48, %v3832_v51  ;;  %v2182_v38 = vsel %vm2166_vm12, %v3920_v17, 0.0  ;;  %vm1887_vm10 = vcmask 1045504   ;;  %v3978_v59 = vsel %vm1659_vm7, %v1767_v36, %v3877_v41 }
 0xa00   :  { %v3962_v11 = vsel %vm1659_vm7, %v1858_v29, %v1873_v5  ;;  %v1863_v22 = vrot.slane %v3959_v42, 4  ;;  %v1854_v39 = vsel %vm1659_vm7, %v1814_v56, %v1853_v37  ;;  %v1817_v25 = vrot.slane %v1778_v46, 4 }
 0xa01   :  { %1885 = vmax.xlane.f32.xlu2 %v3920_v17  ;;  %v1913_v27 = vsel %vm1887_vm10, %v3962_v11, -inf  ;;  %vm2167_vm13 = vcmp.eq.s32.totalorder %v3353_v2, %v3807_v55  ;;  %v1871_v62 = vrot.slane %v1858_v29, 4  ;;  %v1862_v56 = vperm.slane %v1854_v39, %v3832_v51 }
 0xa02   :  { %1896 = vmax.xlane.f32.xlu1 %v3926_v35  ;;  %vm2172_vm0 = vcmp.eq.s32.totalorder %v3353_v2, %v3841_v12  ;;  %v1841_v7 = vrot.slane %v1800_v47, 4  ;;  %vm2179_vm1 = vcmp.eq.s32.totalorder %v3353_v2, %v3820_v34  ;;  %vm2177_vm15 = vcmp.eq.s32.totalorder %v3353_v2, %v3911_v54 }
 0xa03   :  { %2218 = vadd.xlane.f32.xlu0 %v2190_v21  ;;  %v1829_v21 = vrot.slane %v3914_v0, 4  ;;  %v3983_v0 = vsel %vm1659_vm7, %v1863_v22, %v3968_v28  ;;  %v3994_v41 = vsel %vm1659_vm7, %v1871_v62, %v1834_v24  ;;  %v2188_v63 = vsel %vm2172_vm0, %v3948_v3, 0.0  ;;  %v4054_v62 = vpop.permute.xlu2 %2705 }
 0xa04   :  { %v2183_v44 = vsel %vm2167_vm13, %v3983_v0, 0.0  ;;  %v1875_v46 = vrot.slane %v1862_v56, 4  ;;  %vm2178_vm12 = vcmp.eq.s32.totalorder %v3353_v2, %v3771_v8  ;;  %v2193_v43 = vsel %vm2177_vm15, %v3962_v11, 0.0 }
 0xa05   :  { %v1830_v31 = vsel %vm1659_vm7, %v3907_v50, %v1829_v21  ;;  %v1818_v50 = vsel %vm1659_vm7, %v1790_v1, %v1817_v25  ;;  %v2200_v55 = vsel %vm1887_vm10, %v2183_v44, 0.0  ;;  %v1842_v1 = vsel %vm1659_vm7, %v3929_v19, %v1841_v7 }
 0xa06   :  { %v1838_v45 = vperm.slane %v1830_v31, %v3832_v51  ;;  %v1826_v24 = vperm.slane %v1818_v50, %v3832_v51  ;;  %v2194_v5 = vsel %vm2178_vm12, %v3978_v59, 0.0  ;;  %v1850_v47 = vperm.slane %v1842_v1, %v3832_v51 }
 0xa07   :  { %v2225_v19 = vsel %vm1887_vm10, %v2193_v43, 0.0  ;;  %vm2175_vm13 = vcmp.eq.s32.totalorder %v3353_v2, %v3879_v13  ;;  %vm2173_vm0 = vcmp.eq.s32.totalorder %v3353_v2, %v3762_v6  ;;  %v1865_v25 = vrot.slane %v3968_v28, 4 }
 0xa08   :  { %v4003_v12 = vsel %vm1659_vm7, %v1875_v46, %v1838_v45  ;;  %v1877_v29 = vrot.slane %v1838_v45, 4  ;;  %v2191_v8 = vsel %vm2175_vm13, %v3994_v41, 0.0  ;;  %v1867_v13 = vrot.slane %v1850_v47, 4 }
 0xa09   :  { %1901 = vmax.xlane.f32.xlu2 %v3948_v3  ;;  %v2195_v49 = vsel %vm2179_vm1, %v4003_v12, 0.0  ;;  %v2220_v36 = vsel %vm1887_vm10, %v2191_v8, 0.0  ;;  %vm2171_vm1 = vcmp.eq.s32.totalorder %v3353_v2, %v3759_v53  ;;  %v1918_v39 = vsel %vm1887_vm10, %v4003_v12, -inf }
 0xa0a   :  { %2208 = vadd.xlane.f32.xlu1 %v2186_v20  ;;  %v1908_v20 = vsel %vm1887_vm10, %v3994_v41, -inf  ;;  %v2230_v34 = vsel %vm1887_vm10, %v2195_v49, 0.0  ;;  %v4030_v48 = vsel %vm1659_vm7, %v1862_v56, %v1877_v29  ;;  %v4037_v6 = vsel %vm1659_vm7, %v1867_v13, %v1826_v24 }
 0xa0b   :  { %2233 = vadd.xlane.f32.xlu0 %v2196_v61  ;;  %v1869_v61 = vrot.slane %v1826_v24, 4  ;;  %v1923_v21 = vsel %vm1887_vm10, %v4030_v48, -inf  ;;  %v4050_v31 = vsel %vm1659_vm7, %v3959_v42, %v1865_v25  ;;  %v1898_v56 = vsel %vm1887_vm10, %v4037_v6, -inf  ;;  %v4062_v42 = vpop.permute.xlu2 %2722 }
 0xa0c   :  { %v1893_v53 = vsel %vm1887_vm10, %v4050_v31, -inf  ;;  %vm2169_vm15 = vcmp.eq.s32.totalorder %v3353_v2, %v3755_v4 }
 0xa0d   :  { %v4021_v54 = vsel %vm1659_vm7, %v1850_v47, %v1869_v61  ;;  %v2185_v44 = vsel %vm2169_vm15, %v4050_v31, 0.0  ;;  %vm2181_vm7 = vcmp.eq.s32.totalorder %v3353_v2, %v3773_v32 }
 0xa0e   :  { %v2189_v51 = vsel %vm2173_vm0, %v4021_v54, 0.0  ;;  %v2205_v28 = vsel %vm1887_vm10, %v2185_v44, 0.0  ;;  %v2197_v45 = vsel %vm2181_vm7, %v4030_v48, 0.0  ;;  %v1903_v24 = vsel %vm1887_vm10, %v4021_v54, -inf }
 0xa0f   :  { %v2215_v37 = vsel %vm1887_vm10, %v2189_v51, 0.0 }
 0xa11   :  { %2198 = vadd.xlane.f32.xlu2 %v2182_v38  ;;  %v2187_v38 = vsel %vm2171_vm1, %v4037_v6, 0.0 }
 0xa12   :  { %1914 = vmax.xlane.f32.xlu1 %v1913_v27  ;;  %v1888_v27 = vsel %vm1887_vm10, %v3983_v0, -inf  ;;  %v2210_v22 = vsel %vm1887_vm10, %v2187_v38, 0.0 }
 0xa13   :  { %1916 = vmax.xlane.f32.xlu0 %v3978_v59 }
 0xa19   :  { %2213 = vadd.xlane.f32.xlu2 %v2188_v63  ;;  %v2235_v63 = vsel %vm1887_vm10, %v2197_v45, 0.0 }
 0xa1a   :  { %2201 = vadd.xlane.f32.xlu1 %v2200_v55 }
 0xa1b   :  { %1909 = vmax.xlane.f32.xlu0 %v1908_v20  ;;  %v4068_v20 = vpop.permute.xlu0 %2727 }
 0xa21   :  { %2228 = vadd.xlane.f32.xlu2 %v2194_v5 }
 0xa22   :  { %2231 = vadd.xlane.f32.xlu1 %v2230_v34 }
 0xa23   :  { %2226 = vadd.xlane.f32.xlu0 %v2225_v19 }
 0xa29   :  { %2221 = vadd.xlane.f32.xlu2 %v2220_v36 }
 0xa2a   :  { %2216 = vadd.xlane.f32.xlu1 %v2215_v37 }
 0xa2b   :  { %1924 = vmax.xlane.f32.xlu0 %v1923_v21 }
 0xa31   :  { %1889 = vmax.xlane.f32.xlu2 %v1888_v27 }
 0xa33   :  { %2211 = vadd.xlane.f32.xlu0 %v2210_v22 }
 0xa39   :  { %1919 = vmax.xlane.f32.xlu2 %v1918_v39 }
 0xa41   :  { %1894 = vmax.xlane.f32.xlu2 %v1893_v53 }
 0xa49   :  { %1899 = vmax.xlane.f32.xlu2 %v1898_v56 }
 0xa51   :  { %2206 = vadd.xlane.f32.xlu2 %v2205_v28 }
 0xa59   :  { %2236 = vadd.xlane.f32.xlu2 %v2235_v63 }
 0xa5a   :  { %v1650_v50 = vpop.xlane.xlu2 %1649 }
 0xa5b   :  { %v1651_v55 = vrot.slane %v1650_v50, 4 }
 0xa5d   :  { %v1652_v46 = vadd.f32 %v1651_v55, %v1650_v50 }
 0xa5f   :  { %v1653_v4 = vrot.slane %v1652_v46, 2 }
 0xa61   :  { %1904 = vmax.xlane.f32.xlu2 %v1903_v24  ;;  %v1654_v7 = vadd.f32 %v1653_v4, %v1652_v46 }
 0xa63   :  { %v1655_v1 = vrot.slane %v1654_v7, 1 }
 0xa64   :  { %v4072_v49 = vpop.xlane.xlu2 %1911 }
 0xa65   :  { %v1936_v32 = vsub.f32 %v3862_v10, %v4072_v49  ;;  %v4076_v43 = vpop.xlane.xlu1 %2223  ;;  %v1656_v61 = vadd.f32 %v1655_v1, %v1654_v7 }
 0xa66   :  { %v4078_v5 = vpop.xlane.xlu0 %1891 }
 0xa67   :  { %v1962_v47 = vmul.f32 1.442695, %v1936_v32  ;;  %v1928_v34 = vsub.f32 %v3872_v52, %v4078_v5  ;;  %2626 = vpush %v1656_v61 }
 0xa69   :  { %2753 = vpow2.f32 %v1962_v47  ;;  %v1946_v19 = vmul.f32 1.442695, %v1928_v34 }
 0xa6b   :  { %2755 = vpow2.f32 %v1946_v19 }
 0xa6c   :  { %v4082_v29 = vpop.xlane.xlu2 %1906 }
 0xa6d   :  { %v1934_v8 = vsub.f32 %v3891_v30, %v4082_v29  ;;  %v4086_v51 = vpop.xlane.xlu1 %1921 }
 0xa6e   :  { %v4088_v10 = vpop.xlane.xlu0 %2203  ;;  %v1940_v52 = vsub.f32 %v3899_v18, %v4086_v51 }
 0xa6f   :  { %v2754_v36 = vpop.eup %2753  ;;  %v1958_v37 = vmul.f32 1.442695, %v1934_v8 }
 0xa70   :  { %1999 = vadd.xlane.f32.xlu1 %v2754_v36  ;;  %v1970_v39 = vmul.f32 1.442695, %v1940_v52 }
 0xa71   :  { %v2756_v21 = vpop.eup %2755  ;;  %2757 = vpow2.f32 %v1958_v37 }
 0xa72   :  { %1979 = vadd.xlane.f32.xlu0 %v2756_v21 }
 0xa74   :  { %v4092_v13 = vpop.xlane.xlu2 %1885 }
 0xa75   :  { %v1926_v38 = vsub.f32 %v3920_v17, %v4092_v13  ;;  %v4096_v27 = vpop.xlane.xlu1 %1896 }
 0xa76   :  { %v1930_v30 = vsub.f32 %v3926_v35, %v4096_v27  ;;  %v4100_v22 = vpop.xlane.xlu0 %2218 }
 0xa77   :  { %v1942_v25 = vmul.f32 1.442695, %v1926_v38  ;;  %v2758_v56 = vpop.eup %2757 }
 0xa78   :  { %v1950_v53 = vmul.f32 1.442695, %v1930_v30 }
 0xa79   :  { %2759 = vpow2.f32 %v1942_v25 }
 0xa7a   :  { %2761 = vpow2.f32 %v1950_v53  ;;  %1994 = vadd.xlane.f32.xlu0 %v2758_v56 }
 0xa7b   :  { %2763 = vpow2.f32 %v1970_v39 }
 0xa7c   :  { %v4102_v18 = vpop.xlane.xlu2 %1901 }
 0xa7d   :  { %v1932_v17 = vsub.f32 %v3948_v3, %v4102_v18  ;;  %v4106_v44 = vpop.xlane.xlu1 %2208 }
 0xa7e   :  { %v4108_v28 = vpop.xlane.xlu0 %2233 }
 0xa7f   :  { %v2760_v35 = vpop.eup %2759  ;;  %v1954_v45 = vmul.f32 1.442695, %v1932_v17 }
 0xa80   :  { %v2762_v63 = vpop.eup %2761  ;;  %1974 = vadd.xlane.f32.xlu2 %v2760_v35 }
 0xa81   :  { %v2764_v50 = vpop.eup %2763  ;;  %2765 = vpow2.f32 %v1954_v45  ;;  %1984 = vadd.xlane.f32.xlu1 %v2762_v63 }
 0xa82   :  { %2009 = vadd.xlane.f32.xlu0 %v2764_v50 }
 0xa84   :  { %v4110_v55 = vpop.xlane.xlu2 %2198 }
 0xa85   :  { %v4112_v46 = vpop.xlane.xlu1 %1914 }
 0xa86   :  { %v1937_v4 = vsub.f32 %v3962_v11, %v4112_v46  ;;  %v4116_v3 = vpop.xlane.xlu0 %1916 }
 0xa87   :  { %v2766_v24 = vpop.eup %2765  ;;  %v1938_v7 = vsub.f32 %v3978_v59, %v4116_v3 }
 0xa88   :  { %v1964_v1 = vmul.f32 1.442695, %v1937_v4  ;;  %1989 = vadd.xlane.f32.xlu2 %v2766_v24 }
 0xa89   :  { %v1966_v32 = vmul.f32 1.442695, %v1938_v7 }
 0xa8a   :  { %2767 = vpow2.f32 %v1964_v1 }
 0xa8b   :  { %2769 = vpow2.f32 %v1966_v32 }
 0xa8c   :  { %v4120_v61 = vpop.xlane.xlu2 %2213 }
 0xa8e   :  { %v4122_v47 = vpop.xlane.xlu0 %1909 }
 0xa8f   :  { %v1935_v34 = vsub.f32 %v3994_v41, %v4122_v47 }
 0xa90   :  { %v2768_v19 = vpop.eup %2767 }
 0xa91   :  { %v2770_v11 = vpop.eup %2769  ;;  %v1960_v8 = vmul.f32 1.442695, %v1935_v34  ;;  %v2001_v36 = vsel %vm1887_vm10, %v2768_v19, 0.0 }
 0xa92   :  { %2002 = vadd.xlane.f32.xlu0 %v2001_v36  ;;  %2004 = vadd.xlane.f32.xlu2 %v2770_v11  ;;  %v4159_v36 = vpop.xlane.xlu1 %2201 }
 0xa93   :  { %2771 = vpow2.f32 %v1960_v8 }
 0xa94   :  { %v4127_v59 = vpop.xlane.xlu2 %2228 }
 0xa96   :  { %v4136_v39 = vpop.xlane.xlu0 %2226 }
 0xa98   :  { %s2627_s5 = spop %2626 }
 0xa99   :  { %v2772_v37 = vpop.eup %2771 }
 0xa9a   :  { %v1996_v21 = vsel %vm1887_vm10, %v2772_v37, 0.0 }
 0xa9b   :  { %1997 = vadd.xlane.f32.xlu2 %v1996_v21 }
 0xa9c   :  { %v4130_v52 = vpop.xlane.xlu2 %2221 }
 0xa9e   :  { %v4143_v45 = vpop.xlane.xlu0 %1924 }
 0xa9f   :  { %v1941_v4 = vsub.f32 %v4030_v48, %v4143_v45 }
 0xaa1   :  { %v1972_v7 = vmul.f32 1.442695, %v1941_v4 }
 0xaa4   :  { %v4132_v38 = vpop.xlane.xlu2 %1889 }
 0xaa5   :  { %v1927_v41 = vsub.f32 %v3983_v0, %v4132_v38 }
 0xaa7   :  { %v1944_v30 = vmul.f32 1.442695, %v1927_v41  ;;  %v4165_v41 = vpop.xlane.xlu1 %2231 }
 0xaa9   :  { %2773 = vpow2.f32 %v1944_v30 }
 0xaac   :  { %v4138_v25 = vpop.xlane.xlu2 %1919 }
 0xaad   :  { %v1939_v53 = vsub.f32 %v4003_v12, %v4138_v25 }
 0xaaf   :  { %v2774_v56 = vpop.eup %2773  ;;  %v1968_v17 = vmul.f32 1.442695, %v1939_v53 }
 0xab0   :  { %v1976_v35 = vsel %vm1887_vm10, %v2774_v56, 0.0 }
 0xab1   :  { %2775 = vpow2.f32 %v1968_v17  ;;  %1977 = vadd.xlane.f32.xlu1 %v1976_v35  ;;  %v4171_v17 = vpop.xlane.xlu1 %2216  ;;  %v4173_v35 = vpop.xlane.xlu0 %2211 }
 0xab4   :  { %v4145_v63 = vpop.xlane.xlu2 %1894 }
 0xab5   :  { %v1929_v0 = vsub.f32 %v4050_v31, %v4145_v63 }
 0xab7   :  { %v2776_v50 = vpop.eup %2775  ;;  %v1948_v24 = vmul.f32 1.442695, %v1929_v0 }
 0xab8   :  { %v2006_v12 = vsel %vm1887_vm10, %v2776_v50, 0.0 }
 0xab9   :  { %2777 = vpow2.f32 %v1948_v24  ;;  %2007 = vadd.xlane.f32.xlu1 %v2006_v12 }
 0xaba   :  { %2779 = vpow2.f32 %v1972_v7 }
 0xabc   :  { %v4152_v1 = vpop.xlane.xlu2 %1899 }
 0xabd   :  { %v1931_v32 = vsub.f32 %v4037_v6, %v4152_v1 }
 0xabf   :  { %v2778_v34 = vpop.eup %2777  ;;  %v1952_v19 = vmul.f32 1.442695, %v1931_v32 }
 0xac0   :  { %v1981_v31 = vsel %vm1887_vm10, %v2778_v34, 0.0  ;;  %v2780_v48 = vpop.eup %2779 }
 0xac1   :  { %2781 = vpow2.f32 %v1952_v19  ;;  %1982 = vadd.xlane.f32.xlu2 %v1981_v31  ;;  %v2011_v37 = vsel %vm1887_vm10, %v2780_v48, 0.0  ;;  %v2719_v31 = vunpack.i.h.bf16 %v3777_v16 }
 0xac4   :  { %v4157_v11 = vpop.xlane.xlu2 %2206 }
 0xac7   :  { %v2782_v8 = vpop.eup %2781 }
 0xac8   :  { %v1986_v21 = vsel %vm1887_vm10, %v2782_v8, 0.0 }
 0xac9   :  { %2012 = vadd.xlane.f32.xlu2 %v2011_v37  ;;  %1987 = vadd.xlane.f32.xlu0 %v1986_v21 }
 0xacc   :  { %v4163_v6 = vpop.xlane.xlu2 %2236 }
 0xad4   :  { %v4167_v30 = vpop.xlane.xlu2 %1904 }
 0xad5   :  { %v1933_v53 = vsub.f32 %v4021_v54, %v4167_v30 }
 0xad7   :  { %v1956_v56 = vmul.f32 1.442695, %v1933_v53 }
 0xad9   :  { %2783 = vpow2.f32 %v1956_v56 }
 0xadf   :  { %v2784_v0 = vpop.eup %2783 }
 0xae0   :  { %v1991_v50 = vsel %vm1887_vm10, %v2784_v0, 0.0  ;;  %vm2490_vm10 = vcmask 113664  }
 0xae1   :  { %1992 = vadd.xlane.f32.xlu1 %v1991_v50  ;;  %v2698_v50 = vunpack.i.h.bf16 %v3775_v9 }
 0xae3   :  { %v2000_v4 = vpop.xlane.xlu1 %1999 }
 0xae4   :  { %2785 = vlog2.f32 %v2000_v4  ;;  %v2718_v4 = vunpack.i.l.bf16 %v3777_v16 }
 0xae5   :  { %v1980_v24 = vpop.xlane.xlu0 %1979 }
 0xae6   :  { %2787 = vlog2.f32 %v1980_v24 }
 0xaea   :  { %v2786_v12 = vpop.eup %2785 }
 0xaeb   :  { %v2035_v7 = vmul.f32 0.6931472, %v2786_v12 }
 0xaec   :  { %v2788_v32 = vpop.eup %2787 }
 0xaed   :  { %v2056_v34 = vadd.f32 %v2035_v7, %v4072_v49  ;;  %v2019_v54 = vmul.f32 0.6931472, %v2788_v32  ;;  %v1995_v19 = vpop.xlane.xlu0 %1994 }
 0xaee   :  { %2789 = vlog2.f32 %v1995_v19 }
 0xaef   :  { %v2248_v48 = vsub.f32 %v2056_v34, %v4076_v43  ;;  %v2048_v8 = vadd.f32 %v2019_v54, %v4078_v5 }
 0xaf1   :  { %v2388_v37 = vmul.f32 %v2719_v31, %v2248_v48  ;;  %v2240_v56 = vsub.f32 %v2048_v8, %v4088_v10  ;;  %v2697_v10 = vunpack.i.l.bf16 %v3775_v9 }
 0xaf3   :  { %2441 = vperm.xlu2 %2737, %v2388_v37   ;;  %v1975_v21 = vpop.xlane.xlu2 %1974  ;;  %v2380_v24 = vmul.f32 %v2698_v50, %v2240_v56 }
 0xaf4   :  { %v2790_v53 = vpop.eup %2789  ;;  %2791 = vlog2.f32 %v1975_v21  ;;  %v1985_v16 = vpop.xlane.xlu1 %1984  ;;  %v2708_v21 = vunpack.i.h.bf16 %v4054_v62 }
 0xaf5   :  { %v2031_v0 = vmul.f32 0.6931472, %v2790_v53  ;;  %v2010_v54 = vpop.xlane.xlu0 %2009 }
 0xaf7   :  { %v2054_v49 = vadd.f32 %v2031_v0, %v4082_v29 }
 0xaf9   :  { %v2246_v12 = vsub.f32 %v2054_v49, %v4100_v22 }
 0xafa   :  { %v2792_v43 = vpop.eup %2791 }
 0xafb   :  { %v2015_v7 = vmul.f32 0.6931472, %v2792_v43  ;;  %2417 = vperm.xlu2 %2737, %v2380_v24   ;;  %v1990_v5 = vpop.xlane.xlu2 %1989  ;;  %v2386_v32 = vmul.f32 %v2718_v4, %v2246_v12  ;;  %v2725_v12 = vunpack.i.h.bf16 %v4062_v42 }
 0xafc   :  { %2793 = vlog2.f32 %v1990_v5 }
 0xafd   :  { %v2046_v34 = vadd.f32 %v2015_v7, %v4092_v13  ;;  %2435 = vperm.xlu0 %2738, %v2386_v32   ;;  %2795 = vlog2.f32 %v1985_v16 }
 0xaff   :  { %v2238_v19 = vsub.f32 %v2046_v34, %v4110_v55 }
 0xb01   :  { %v2378_v29 = vmul.f32 %v2697_v10, %v2238_v19 }
 0xb02   :  { %v2794_v31 = vpop.eup %2793 }
 0xb03   :  { %v2027_v48 = vmul.f32 0.6931472, %v2794_v31  ;;  %2411 = vperm.xlu2 %2737, %v2378_v29   ;;  %v2796_v9 = vpop.eup %2795 }
 0xb05   :  { %v2052_v22 = vadd.f32 %v2027_v48, %v4102_v18  ;;  %v2003_v8 = vpop.xlane.xlu0 %2002  ;;  %v2005_v37 = vpop.xlane.xlu2 %2004  ;;  %v2023_v18 = vmul.f32 0.6931472, %v2796_v9 }
 0xb06   :  { %2797 = vlog2.f32 %v2003_v8 }
 0xb07   :  { %v2244_v13 = vsub.f32 %v2052_v22, %v4120_v61  ;;  %2799 = vlog2.f32 %v2005_v37  ;;  %v2729_v61 = vunpack.i.l.bf16 %v4068_v20  ;;  %v2050_v32 = vadd.f32 %v2023_v18, %v4096_v27 }
 0xb09   :  { %v2384_v53 = vmul.f32 %v2708_v21, %v2244_v13 }
 0xb0b   :  { %2429 = vperm.xlu1 %2739, %v2384_v53  }
 0xb0c   :  { %v2798_v55 = vpop.eup %2797 }
 0xb0d   :  { %v2800_v56 = vpop.eup %2799  ;;  %v2037_v0 = vmul.f32 0.6931472, %v2798_v55 }
 0xb0e   :  { %v2039_v50 = vmul.f32 0.6931472, %v2800_v56  ;;  %v1998_v49 = vpop.xlane.xlu2 %1997 }
 0xb0f   :  { %v2057_v4 = vadd.f32 %v2037_v0, %v4112_v46  ;;  %2801 = vlog2.f32 %v1998_v49  ;;  %v2242_v46 = vsub.f32 %v2050_v32, %v4106_v44  ;;  %v2702_v44 = vunpack.i.l.bf16 %v3849_v26 }
 0xb10   :  { %v2058_v24 = vadd.f32 %v2039_v50, %v4116_v3  ;;  %v2707_v3 = vunpack.i.l.bf16 %v4054_v62 }
 0xb11   :  { %v2249_v43 = vsub.f32 %v2057_v4, %v4136_v39 }
 0xb12   :  { %v2250_v7 = vsub.f32 %v2058_v24, %v4127_v59  ;;  %v2382_v31 = vmul.f32 %v2707_v3, %v2242_v46  ;;  %v2724_v59 = vunpack.i.l.bf16 %v4062_v42  ;;  %v2735_v3 = vunpack.i.l.bf16 %v3782_v23 }
 0xb13   :  { %v2389_v5 = vmul.f32 %v2725_v12, %v2249_v43 }
 0xb14   :  { %v2390_v34 = vmul.f32 %v2729_v61, %v2250_v7 }
 0xb15   :  { %v2802_v10 = vpop.eup %2801  ;;  %2444 = vperm.xlu0 %2738, %v2389_v5  }
 0xb16   :  { %2447 = vperm.xlu1 %2739, %v2390_v34   ;;  %v2033_v19 = vmul.f32 0.6931472, %v2802_v10  ;;  %v2713_v34 = vunpack.i.h.bf16 %v3885_v15 }
 0xb18   :  { %v2055_v29 = vadd.f32 %v2033_v19, %v4122_v47 }
 0xb1a   :  { %v2247_v39 = vsub.f32 %v2055_v29, %v4130_v52 }
 0xb1c   :  { %v2387_v48 = vmul.f32 %v2724_v59, %v2247_v39 }
 0xb1e   :  { %2423 = vperm.xlu1 %2739, %v2382_v31  }
 0xb24   :  { %v1978_v16 = vpop.xlane.xlu1 %1977 }
 0xb25   :  { %2803 = vlog2.f32 %v1978_v16 }
 0xb26   :  { %2438 = vperm.xlu1 %2739, %v2387_v48   ;;  %2805 = vlog2.f32 %v2010_v54 }
 0xb2b   :  { %v2804_v27 = vpop.eup %2803 }
 0xb2c   :  { %v2017_v22 = vmul.f32 0.6931472, %v2804_v27  ;;  %v2806_v52 = vpop.eup %2805  ;;  %v2008_v32 = vpop.xlane.xlu1 %2007 }
 0xb2d   :  { %v2043_v9 = vmul.f32 0.6931472, %v2806_v52 }
 0xb2e   :  { %v2047_v8 = vadd.f32 %v2017_v22, %v4132_v38  ;;  %v2703_v38 = vunpack.i.h.bf16 %v3849_v26  ;;  %v2730_v26 = vunpack.i.h.bf16 %v4068_v20 }
 0xb30   :  { %v2239_v62 = vsub.f32 %v2047_v8, %v4159_v36  ;;  %v2060_v36 = vadd.f32 %v2043_v9, %v4086_v51  ;;  %v2736_v51 = vunpack.i.h.bf16 %v3782_v23 }
 0xb32   :  { %v2379_v37 = vmul.f32 %v2702_v44, %v2239_v62  ;;  %v2252_v24 = vsub.f32 %v2060_v36, %v4108_v28 }
 0xb34   :  { %v1983_v47 = vpop.xlane.xlu2 %1982  ;;  %2414 = vperm.xlu1 %2739, %v2379_v37   ;;  %v2392_v7 = vmul.f32 %v2730_v26, %v2252_v24 }
 0xb35   :  { %2807 = vlog2.f32 %v1983_v47 }
 0xb3b   :  { %v2808_v21 = vpop.eup %2807 }
 0xb3c   :  { %v2021_v42 = vmul.f32 0.6931472, %v2808_v21  ;;  %v1988_v13 = vpop.xlane.xlu0 %1987  ;;  %v2013_v53 = vpop.xlane.xlu2 %2012 }
 0xb3d   :  { %2809 = vlog2.f32 %v1988_v13 }
 0xb3e   :  { %v2049_v55 = vadd.f32 %v2021_v42, %v4145_v63  ;;  %2811 = vlog2.f32 %v2013_v53  ;;  %v2712_v63 = vunpack.i.l.bf16 %v3885_v15 }
 0xb3f   :  { %2813 = vlog2.f32 %v2008_v32 }
 0xb40   :  { %v2241_v56 = vsub.f32 %v2049_v55, %v4157_v11 }
 0xb42   :  { %v2381_v54 = vmul.f32 %v2703_v38, %v2241_v56 }
 0xb43   :  { %v2810_v0 = vpop.eup %2809 }
 0xb44   :  { %v2812_v50 = vpop.eup %2811  ;;  %v2025_v49 = vmul.f32 0.6931472, %v2810_v0  ;;  %2420 = vperm.xlu0 %2738, %v2381_v54  }
 0xb45   :  { %v2045_v4 = vmul.f32 0.6931472, %v2812_v50  ;;  %v2814_v20 = vpop.eup %2813 }
 0xb46   :  { %v2051_v18 = vadd.f32 %v2025_v49, %v4152_v1 }
 0xb47   :  { %v2061_v12 = vadd.f32 %v2045_v4, %v4143_v45 }
 0xb48   :  { %v2243_v11 = vsub.f32 %v2051_v18, %v4173_v35 }
 0xb49   :  { %v2253_v43 = vsub.f32 %v2061_v12, %v4163_v6  ;;  %v2041_v6 = vmul.f32 0.6931472, %v2814_v20 }
 0xb4a   :  { %v2383_v61 = vmul.f32 %v2712_v63, %v2243_v11 }
 0xb4b   :  { %v2393_v5 = vmul.f32 %v2736_v51, %v2253_v43  ;;  %v2059_v46 = vadd.f32 %v2041_v6, %v4138_v25 }
 0xb4c   :  { %2426 = vperm.xlu2 %2737, %v2383_v61   ;;  %2453 = vperm.xlu0 %2738, %v2392_v7  }
 0xb4d   :  { %2456 = vperm.xlu1 %2739, %v2393_v5  }
 0xb54   :  { %v1993_v28 = vpop.xlane.xlu1 %1992 }
 0xb55   :  { %2815 = vlog2.f32 %v1993_v28  ;;  %2512 = vrot.lane.b32.xlu1 %v3518_v58, %s3196_s17  ;;  %v2251_v58 = vsub.f32 %v2059_v46, %v4165_v41 }
 0xb57   :  { %v2391_v29 = vmul.f32 %v2735_v3, %v2251_v58 }
 0xb5b   :  { %v2816_v45 = vpop.eup %2815 }
 0xb5c   :  { %v2029_v1 = vmul.f32 0.6931472, %v2816_v45 }
 0xb5d   :  { %2516 = vrot.lane.b32.xlu1 %v3720_v33, %s3197_s16  ;;  %v2501_v33 = vsel %vm2490_vm10, %v3700_v40, 0.0 }
 0xb5e   :  { %v2053_v35 = vadd.f32 %v2029_v1, %v4167_v30  ;;  %v2442_v30 = vpop.permute.xlu2 %2441 }
 0xb5f   :  { %v2473_v4 = vperm.slane %v2442_v30, %v3353_v2 }
 0xb60   :  { %v2245_v10 = vsub.f32 %v2053_v35, %v4171_v17 }
 0xb62   :  { %v2385_v19 = vmul.f32 %v2713_v34, %v2245_v10 }
 0xb64   :  { %2432 = vperm.xlu2 %2737, %v2385_v19  }
 0xb65   :  { %2519 = vrot.lane.b32.xlu1 %v3724_v14, %s3191_s15 }
 0xb66   :  { %v2418_v25 = vpop.permute.xlu2 %2417 }
 0xb67   :  { %v2461_v22 = vperm.slane %v2418_v25, %v3353_v2 }
 0xb6c   :  { %2450 = vperm.xlu2 %2737, %v2391_v29  }
 0xb6e   :  { %v2412_v59 = vpop.permute.xlu2 %2411 }
 0xb6f   :  { %v2436_v39 = vpop.permute.xlu0 %2435  ;;  %v2458_v40 = vperm.slane %v2412_v59, %v3353_v2 }
 0xb70   :  { %v2470_v36 = vperm.slane %v2436_v39, %v3353_v2  ;;  %v2532_v39 = vstv %s2625_s18 }
 0xb76   :  { %2502 = vadd.xlane.f32.xlu0 %v2501_v33 }
 0xb7d   :  { %v2430_v15 = vpop.permute.xlu1 %2429 }
 0xb7e   :  { %v2467_v52 = vperm.slane %v2430_v15, %v3353_v2 }
 0xb87   :  { %v2445_v16 = vpop.permute.xlu0 %2444 }
 0xb88   :  { %v2448_v17 = vpop.permute.xlu1 %2447  ;;  %v2474_v50 = vperm.slane %v2445_v16, %v3593_v57 }
 0xb89   :  { %v2476_v26 = vperm.slane %v2448_v17, %v3353_v2 }
 0xb8a   :  { %v2475_v43 = vsel %vm982_vm14, %v2474_v50, %v2473_v4 }
 0xb90   :  { %v2424_v31 = vpop.permute.xlu1 %2423 }
 0xb91   :  { %v2464_v21 = vperm.slane %v2424_v31, %v3353_v2 }
 0xb98   :  { %v2439_v14 = vpop.permute.xlu1 %2438 }
 0xb99   :  { %v2471_v9 = vperm.slane %v2439_v14, %v3593_v57 }
 0xb9b   :  { %v2472_v49 = vsel %vm982_vm14, %v2471_v9, %v2470_v36 }
 0xba6   :  { %v2427_v48 = vpop.permute.xlu2 %2426  ;;  %v2415_v27 = vpop.permute.xlu1 %2414 }
 0xba7   :  { %v2459_v8 = vperm.slane %v2415_v27, %v3593_v57  ;;  %v2465_v62 = vperm.slane %v2427_v48, %v3593_v57 }
 0xba9   :  { %v2460_v37 = vsel %vm982_vm14, %v2459_v8, %v2458_v40  ;;  %v2466_v55 = vsel %vm982_vm14, %v2465_v62, %v2464_v21 }
 0xbb6   :  { %v2421_v41 = vpop.permute.xlu0 %2420 }
 0xbb7   :  { %v2462_v23 = vperm.slane %v2421_v41, %v3593_v57  ;;  %v2538_v41 = vstv %s2627_s5 }
 0xbb9   :  { %v2463_v44 = vsel %vm982_vm14, %v2462_v23, %v2461_v22 }
 0xbba   :  { %v2482_v42 = vsel %vm565_vm2, %v2463_v44, %v2460_v37  ;;  %vm2524_vm2 = vcmask 785408  }
 0xbbb   :  { %v2483_v56 = vsel %vm567_vm3, %v2466_v55, %v2482_v42  ;;  %vm4307_vm3 = vcmask 523264  }
 0xbbe   :  { %v2433_v47 = vpop.permute.xlu2 %2432  ;;  %v2454_v0 = vpop.permute.xlu0 %2453 }
 0xbbf   :  { %v2468_v13 = vperm.slane %v2433_v47, %v3593_v57  ;;  %v2457_v53 = vpop.permute.xlu1 %2456  ;;  %v2479_v18 = vperm.slane %v2454_v0, %v3353_v2 }
 0xbc0   :  { %v2480_v24 = vperm.slane %v2457_v53, %v3593_v57 }
 0xbc1   :  { %v2469_v38 = vsel %vm982_vm14, %v2468_v13, %v2467_v52 }
 0xbc2   :  { %v2484_v54 = vsel %vm569_vm4, %v2469_v38, %v2483_v56  ;;  %v2481_v5 = vsel %vm982_vm14, %v2480_v24, %v2479_v18  ;;  %vm2531_vm4 = vcmp.eq.s32.totalorder %v3353_v2, 3 }
 0xbc3   :  { %v2485_v63 = vsel %vm571_vm5, %v2472_v49, %v2484_v54  ;;  %vm2530_vm5 = vcmp.eq.s32.totalorder %v3353_v2, 2  ;;  %v2533_v16 = vsel %vm2531_vm4, %v2532_v39, 0.0 }
 0xbc4   :  { %v2486_v7 = vsel %vm573_vm6, %v2475_v43, %v2485_v63  ;;  %vm2529_vm6 = vcmp.eq.s32.totalorder %v3353_v2, 1 }
 0xbc6   :  { %v2451_v12 = vpop.permute.xlu2 %2450 }
 0xbc7   :  { %v2477_v11 = vperm.slane %v2451_v12, %v3593_v57  ;;  %v2513_v51 = vpop.permute.xlu1 %2512 }
 0xbc8   :  { %v2522_v57 = vsel %vm637_vm11, %v3520_v60, %v2513_v51 }
 0xbc9   :  { %v2478_v61 = vsel %vm982_vm14, %v2477_v11, %v2476_v26 }
 0xbca   :  { %v2487_v32 = vsel %vm575_vm8, %v2478_v61, %v2486_v7  ;;  %vm2528_vm8 = vcmp.eq.s32.totalorder %v3353_v2, 0 }
 0xbcb   :  { %v2488_v28 = vsel %vm577_vm9, %v2481_v5, %v2487_v32 }
 0xbcc   :  { %v2491_v20 = vsel %vm2490_vm10, %v2488_v28, 0.0 }
 0xbcd   :  { %2492 = vadd.xlane.f32.xlu2 %v2491_v20 }
 0xbcf   :  { %v2517_v45 = vpop.permute.xlu1 %2516 }
 0xbd0   :  { %v2523_v1 = vsel %vm4307_vm3, %v2522_v57, %v2517_v45 }
 0xbd7   :  { %v2520_v6 = vpop.permute.xlu1 %2519 }
 0xbd8   :  { %v2525_v35 = vsel %vm2524_vm2, %v2523_v1, %v2520_v6 }
 0xbd9   :  { %2526 = vst [vmem:[#allocation23] sm:$0xff] %v2525_v35 }
 0xbda   :  { %2551 = dma.vmem_to_hbm [thread:$0]  %s2547_s30, 256, %s2549_s3, [#allocation5]  }
 0xbe9   :  { %v2503_v34 = vpop.xlane.xlu0 %2502 }
 0xbea   :  { %v2504_v10 = vrot.slane %v2503_v34, 4 }
 0xbec   :  { %v2505_v46 = vadd.f32 %v2504_v10, %v2503_v34 }
 0xbee   :  { %v2506_v19 = vrot.slane %v2505_v46, 2 }
 0xbf0   :  { %v2507_v29 = vadd.f32 %v2506_v19, %v2505_v46 }
 0xbf2   :  { %v2508_v30 = vrot.slane %v2507_v29, 1 }
 0xbf4   :  { %v2509_v31 = vadd.f32 %v2508_v30, %v2507_v29 }
 0xc40   :  { %v2493_v58 = vpop.xlane.xlu2 %2492 }
 0xc41   :  { %v2494_v60 = vrot.slane %v2493_v58, 4 }
 0xc43   :  { %v2495_v3 = vadd.f32 %v2494_v60, %v2493_v58 }
 0xc45   :  { %v2496_v33 = vrot.slane %v2495_v3, 2 }
 0xc47   :  { %v2497_v15 = vadd.f32 %v2496_v33, %v2495_v3 }
 0xc49   :  { %v2498_v17 = vrot.slane %v2497_v15, 1 }
 0xc4b   :  { %v2499_v25 = vadd.f32 %v2498_v17, %v2497_v15 }
 0xc4d   :  { %2628 = vpush %v2499_v25 }
 0xc4e   :  { %2630 = vpush %v2509_v31 }
 0xc7e   :  { %s2629_s29 = spop %2628 }
 0xc7f   :  { %v2536_v59 = vstv %s2629_s29  ;;  %s2631_s12 = spop %2630 }
 0xc80   :  { %v2534_v14 = vstv %s2631_s12 }
 0xc81   :  { %v2535_v48 = vsel %vm2530_vm5, %v2534_v14, %v2533_v16 }
 0xc82   :  { %v2537_v27 = vsel %vm2529_vm6, %v2536_v59, %v2535_v48 }
 0xc83   :  { %v2539_v23 = vsel %vm2528_vm8, %v2538_v41, %v2537_v27 }
 0xc84   :  { %2540 = vst [vmem:[#allocation24] sm:$0xff] %v2539_v23 }
 0xc85   :  { %2562 = dma.vmem_to_hbm [thread:$0]  %s2558_s9, 128, %s2560_s11, [#allocation25]  }
 0xc86   :  { %3169 = dma.done.wait [#allocation5], 256  }
 0xc87   :  { %3170 = vsyncadd [#allocation5], 4294967040 }
 0xc88   :  { %3171 = dma.done.wait [#allocation25], 128  }
 0xc89   :  { %3172 = vsyncadd [#allocation25], 4294967168 }
 0xc8a   :  { %2571 = vsyncpa [#allocation4], 1 }
 0xc8b   :  { %2572 = vsyncpa [#allocation7], 1 }
 0xc8c   :  { %2573 = vsyncpa [#allocation10], 1 }
 0xc8d   :  { %2574 = vsyncpa [#allocation13], 1 }
 0xc8e   :  { %2575 = vsyncpa [#allocation16], 1 }
 0xc8f   :  { %2576 = vsyncpa [#allocation19], 1 }
 0xc90   :  { %2577 = vsyncpa [#allocation22], 1 }
 0xc91   :  { %2578 = vsyncpa [#allocation5], 1 }
 0xc92   :  { %2579 = vsyncpa [#allocation25], 1 }

</bundles_post_ra>
